<compile_context>
chip_gen: v7x
topology: tpu7x:2x2x1
jax: 0.10.0
libtpu: 0.0.40
codegen_flags: <defaults>
</compile_context>

<pallas_src>
import jax
import jax.numpy as jnp
from jax.experimental import pallas as pl
from jax.experimental.pallas import tpu as pltpu

N_NODES = 45   # implied by reshape(x, (1, 90)) with 2 output features after gc1
_SLAB_W = 24   # lane width of the packed-constants slab

_FLOPS_PER_GRAPH = 2 * (45 * 2 * 2 + 45 * 45 * 2 + 90 * 180
                        + 45 * 4 * 8 + 45 * 45 * 8 + 360)


# ------------------------------ fused kernel --------------------------------

def _critic_block_kernel(x_ref, adj_ref, fc1_wf_ref, consts_ref, out_ref):
    """Forward for one block of graphs; all operands resident in VMEM."""
    f32, bf16 = jnp.float32, jnp.bfloat16
    bb = x_ref.shape[0]

    # Packed-constant slab: static slices of a single DMA'd (45, 24) tile.
    fc1_bf = consts_ref[:, 0:4]        # (45, 4)  fc1 bias (+ folded gc1 bias)
    c2 = consts_ref[:, 4:12]           # (45, 8)  fc2 weight in node space
    gc2_w = consts_ref[0:4, 12:20]     # (4, 8)
    gc1_w = consts_ref[0:2, 20:22]     # (2, 2)
    out_b = consts_ref[0:1, 22:23]     # (1, 1)   fc2 bias (+ folded gc2 bias)

    for b in range(bb):                # trace-time unroll over graphs in block
        xb = x_ref[b]                  # (45, 2)  f32
        adjb = adj_ref[b]              # (45, 45) bf16

        # gc1 support (K=2) on the VPU; adj contraction on the MXU.
        s1 = xb[:, 0:1] * gc1_w[0:1, :] + xb[:, 1:2] * gc1_w[1:2, :]       # (45,2)
        h1 = jnp.dot(adjb, s1.astype(bf16), preferred_element_type=f32)    # (45,2)
        h1b = h1.astype(bf16)
        h1_f0, h1_f1 = h1b[:, 0:1], h1b[:, 1:2]

        # fc1 (flatten/unflatten folded into 8 node-space (45,45) matrices),
        # fused with gc2's support = H2 @ W_gc2 (K=4 broadcast-FMA on the VPU).
        support2 = None
        for g in range(4):             # unrolled at trace time
            col = (jnp.dot(fc1_wf_ref[g], h1_f0, preferred_element_type=f32) +
                   jnp.dot(fc1_wf_ref[4 + g], h1_f1, preferred_element_type=f32) +
                   fc1_bf[:, g:g + 1])                                     # (45,1) == H2[:, g]
            contrib = col * gc2_w[g:g + 1, :]                              # (45,8)
            support2 = contrib if g == 0 else support2 + contrib

        # gc2 adj contraction (bias folded into out_b).
        h3 = jnp.dot(adjb, support2.astype(bf16), preferred_element_type=f32)  # (45,8)

        # fc2 (flatten folded into c2): dot-product + fused scalar bias.
        # TODO(synk): F.dropout(p=0.5) is identity in eval mode (implemented);
        # training-mode dropout would use pltpu.prng_seed + prng_random_bits.
        yb = jnp.sum(h3 * c2, keepdims=True) + out_b                       # (1,1)
        out_ref[b, :, :] = yb


# ------------------------------- wrapper -------------------------------------

@jax.jit
def critic_forward(folded, x, adj):
    """x: (45,2) or (B,45,2); adj: (45,45) or (B,45,45). Returns (1,1) / (B,1)."""
    single = x.ndim == 2
    if single:
        x = x[None]
        adj = adj[None]
    B = x.shape[0]
    BB = 4 if B % 4 == 0 else (2 if B % 2 == 0 else 1)   # graphs per grid step
    n = N_NODES

    x = x.astype(jnp.float32)
    adj_bf16 = adj.astype(jnp.bfloat16)                  # adj contractions in bf16
    fc1_wf = folded["fc1_wf"]
    consts = folded["consts"]

    bytes_accessed = (4 * x.size + 2 * adj_bf16.size + 2 * fc1_wf.size
                      + 4 * consts.size + 4 * B)

    out = pl.pallas_call(
        _critic_block_kernel,
        out_shape=jax.ShapeDtypeStruct((B, 1, 1), jnp.float32),
        grid=(B // BB,),
        in_specs=[
            pl.BlockSpec((BB, n, 2), lambda i: (i, 0, 0)),    # x  (per block)
            pl.BlockSpec((BB, n, n), lambda i: (i, 0, 0)),    # adj (per block)
            pl.BlockSpec((8, n, n), lambda i: (0, 0, 0)),     # folded fc1 weights (resident)
            pl.BlockSpec((n, _SLAB_W), lambda i: (0, 0)),     # packed constants (resident)
        ],
        out_specs=pl.BlockSpec((BB, 1, 1), lambda i: (i, 0, 0)),
        compiler_params=pltpu.CompilerParams(dimension_semantics=("parallel",)),
        cost_estimate=pl.CostEstimate(flops=_FLOPS_PER_GRAPH * B,
                                      transcendentals=0,
                                      bytes_accessed=int(bytes_accessed)),
    )(x, adj_bf16, fc1_wf, consts)

    out = out.reshape(B, 1)
    return out[0:1] if single else out


# -------------------------- parameter construction --------------------------

def init_params(key):
    ks = jax.random.split(key, 8)

    def u(k, shape, bound):
        return jax.random.uniform(k, shape, jnp.float32, -bound, bound)

    return {
        # GraphConvolution(2, 2): W (in, out), b (out,)
        "gc1_w": u(ks[0], (2, 2), 2.0 ** -0.5),
        "gc1_b": u(ks[1], (2,), 2.0 ** -0.5),
        # nn.Linear(90, 180) stored PyTorch-style (out, in): y = v @ W.T + b
        "fc1_w": u(ks[2], (180, 90), 90.0 ** -0.5),
        "fc1_b": u(ks[3], (180,), 90.0 ** -0.5),
        # GraphConvolution(4, 8)
        "gc2_w": u(ks[4], (4, 8), 8.0 ** -0.5),
        "gc2_b": u(ks[5], (8,), 8.0 ** -0.5),
        # nn.Linear(360, 1) stored (out, in)
        "fc2_w": u(ks[6], (1, 360), 360.0 ** -0.5),
        "fc2_b": u(ks[7], (1,), 360.0 ** -0.5),
    }


def fold_params(p):
    """One-time host-side folds: absorb the activation reshapes, gc1_b, gc2_b,
    and pack every small constant into a single (45, 24) slab."""
    n = N_NODES
    w_io = p["fc1_w"].T                                   # (90, 180) = (in, out)
    w4 = w_io.reshape(n, 2, n, 4)                         # [n, f, m, g]
    fc1_wf = jnp.transpose(w4, (1, 3, 2, 0)).reshape(8, n, n)   # [(f*4+g), m, n]

    # gc1 bias folded through W_fc1 into the node-space fc1 bias.
    fc1_bf = p["fc1_b"].reshape(n, 4) + jnp.einsum("f,nfmg->mg", p["gc1_b"], w4)
    # fc2 flatten folded: C2[m, j] = W_fc2[0, 8m + j].
    c2 = p["fc2_w"].reshape(n, 8)
    # gc2 bias folded into the scalar output bias.
    out_bias = p["fc2_b"][0] + jnp.dot(p["gc2_b"], jnp.sum(c2, axis=0))

    consts = jnp.zeros((n, _SLAB_W), jnp.float32)
    consts = consts.at[:, 0:4].set(fc1_bf)
    consts = consts.at[:, 4:12].set(c2)
    consts = consts.at[0:4, 12:20].set(p["gc2_w"])
    consts = consts.at[0:2, 20:22].set(p["gc1_w"])
    consts = consts.at[0, 22].set(out_bias)

    return {"fc1_wf": fc1_wf.astype(jnp.bfloat16),        # (8, 45, 45) bf16
            "consts": consts}                              # (45, 24) f32


# --------------------------- pure-JAX reference ------------------------------

def critic_forward_ref(p, x, adj):
    hp = lambda a, b: jnp.dot(a, b, precision="highest")
    h = hp(adj, hp(x, p["gc1_w"])) + p["gc1_b"]
    h = h.reshape(1, 90)
    h = hp(h, p["fc1_w"].T) + p["fc1_b"]
    h = h.reshape(45, 4)
    h = hp(adj, hp(h, p["gc2_w"])) + p["gc2_b"]
    h = h.reshape(1, 360)
    h = hp(h, p["fc2_w"].T) + p["fc2_b"]
    return h  # (1, 1); F.dropout(p=0.5) is identity in eval mode


# ----------------------------------- main ------------------------------------

if __name__ == "__main__":
    key = jax.random.PRNGKey(0)
    kp, kx, ka = jax.random.split(key, 3)
    raw = init_params(kp)
    folded = fold_params(raw)

    # Batch of graphs per call (review: amortize launch/DMA overhead).
    B = 8
    x = jax.random.normal(kx, (B, N_NODES, 2), dtype=jnp.float32)
    adj = jax.random.uniform(ka, (B, N_NODES, N_NODES), dtype=jnp.float32)

    out = critic_forward(folded, x, adj)
    jax.block_until_ready(out)

    ref = jnp.stack([critic_forward_ref(raw, x[b], adj[b])[0] for b in range(B)])
    assert out.shape == (B, 1) and out.dtype == jnp.float32
    # Loosened tolerance vs the f32 "highest" reference: the kernel deliberately
    # runs its MXU contractions with bf16 inputs (f32 accumulation).
    assert jnp.allclose(out, ref, rtol=5e-2, atol=5e-2), (out, ref)

    # Single-graph path (exactly the PyTorch module's signature / output shape).
    out1 = critic_forward(folded, x[0], adj[0])
    jax.block_until_ready(out1)
    assert out1.shape == (1, 1)
    assert jnp.allclose(out1, ref[0:1], rtol=5e-2, atol=5e-2), (out1, ref[0:1])

    print("KERNEL_OK")
</pallas_src>

<mosaic_0001>
module attributes {stable_mosaic.version = 11 : i64} {
  func.func @_critic_block_kernel(%arg0: i32, %arg1: memref<4x45x2xf32, #tpu.memory_space<vmem>>, %arg2: memref<4x45x45xbf16, #tpu.memory_space<vmem>>, %arg3: memref<8x45x45xbf16, #tpu.memory_space<vmem>>, %arg4: memref<45x24xf32, #tpu.memory_space<vmem>>, %arg5: memref<4x1x1xf32, #tpu.memory_space<vmem>>) attributes {dimension_semantics = [#tpu.dimension_semantics<parallel>], iteration_bounds = array<i64: 2>, scalar_prefetch = 0 : i64, scratch_operands = 0 : i64, tpu.core_type = #tpu.core_type<tc>, window_params = [{transform_indices = @transform_0, window_bounds = array<i64: 4, 45, 2>}, {transform_indices = @transform_1, window_bounds = array<i64: 4, 45, 45>}, {pipeline_mode = #tpu.pipeline_mode<synchronous>, transform_indices = @transform_2, window_bounds = array<i64: 8, 45, 45>}, {pipeline_mode = #tpu.pipeline_mode<synchronous>, transform_indices = @transform_3, window_bounds = array<i64: 45, 24>}, {transform_indices = @transform_4, window_bounds = array<i64: 4, 1, 1>}]} {
    %c0 = arith.constant 0 : index
    %c0_0 = arith.constant 0 : index
    %0 = vector.load %arg4[%c0, %c0_0] : memref<45x24xf32, #tpu.memory_space<vmem>>, vector<45x4xf32>
    %c0_1 = arith.constant 0 : index
    %c4 = arith.constant 4 : index
    %1 = vector.load %arg4[%c0_1, %c4] : memref<45x24xf32, #tpu.memory_space<vmem>>, vector<45x8xf32>
    %c0_2 = arith.constant 0 : index
    %c12 = arith.constant 12 : index
    %2 = vector.load %arg4[%c0_2, %c12] : memref<45x24xf32, #tpu.memory_space<vmem>>, vector<4x8xf32>
    %c0_3 = arith.constant 0 : index
    %c20 = arith.constant 20 : index
    %3 = vector.load %arg4[%c0_3, %c20] : memref<45x24xf32, #tpu.memory_space<vmem>>, vector<2x2xf32>
    %c0_4 = arith.constant 0 : index
    %c22 = arith.constant 22 : index
    %4 = vector.load %arg4[%c0_4, %c22] : memref<45x24xf32, #tpu.memory_space<vmem>>, vector<1x1xf32>
    %c0_5 = arith.constant 0 : index
    %c0_6 = arith.constant 0 : index
    %c0_7 = arith.constant 0 : index
    %5 = vector.load %arg1[%c0_5, %c0_6, %c0_7] : memref<4x45x2xf32, #tpu.memory_space<vmem>>, vector<1x45x2xf32>
    %6 = vector.shape_cast %5 : vector<1x45x2xf32> to vector<45x2xf32>
    %c0_8 = arith.constant 0 : index
    %c0_9 = arith.constant 0 : index
    %c0_10 = arith.constant 0 : index
    %7 = vector.load %arg2[%c0_8, %c0_9, %c0_10] : memref<4x45x45xbf16, #tpu.memory_space<vmem>>, vector<1x45x45xbf16>
    %8 = vector.shape_cast %7 : vector<1x45x45xbf16> to vector<45x45xbf16>
    %9 = vector.extract_strided_slice %6 {offsets = [0, 0], sizes = [45, 1], strides = [1, 1]} : vector<45x2xf32> to vector<45x1xf32>
    %10 = vector.extract_strided_slice %3 {offsets = [0, 0], sizes = [1, 2], strides = [1, 1]} : vector<2x2xf32> to vector<1x2xf32>
    %11 = vector.broadcast %9 : vector<45x1xf32> to vector<45x2xf32>
    %12 = vector.broadcast %10 : vector<1x2xf32> to vector<45x2xf32>
    %13 = arith.mulf %11, %12 : vector<45x2xf32>
    %14 = vector.extract_strided_slice %6 {offsets = [0, 1], sizes = [45, 1], strides = [1, 1]} : vector<45x2xf32> to vector<45x1xf32>
    %15 = vector.extract_strided_slice %3 {offsets = [1, 0], sizes = [1, 2], strides = [1, 1]} : vector<2x2xf32> to vector<1x2xf32>
    %16 = vector.broadcast %14 : vector<45x1xf32> to vector<45x2xf32>
    %17 = vector.broadcast %15 : vector<1x2xf32> to vector<45x2xf32>
    %18 = arith.mulf %16, %17 : vector<45x2xf32>
    %19 = arith.addf %13, %18 : vector<45x2xf32>
    %20 = arith.truncf %19 : vector<45x2xf32> to vector<45x2xbf16>
    %cst = arith.constant dense<0.000000e+00> : vector<45x2xf32>
    %21 = tpu.matmul %8, %20, %cst {dimension_numbers = #tpu.dot_dimension_numbers<[1], [0], [0], [1], [0, 0, 1, 1], [], []>} : vector<45x45xbf16>, vector<45x2xbf16>, vector<45x2xf32> -> vector<45x2xf32>
    %22 = arith.truncf %21 : vector<45x2xf32> to vector<45x2xbf16>
    %23 = vector.extract_strided_slice %22 {offsets = [0, 0], sizes = [45, 1], strides = [1, 1]} : vector<45x2xbf16> to vector<45x1xbf16>
    %24 = vector.extract_strided_slice %22 {offsets = [0, 1], sizes = [45, 1], strides = [1, 1]} : vector<45x2xbf16> to vector<45x1xbf16>
    %c0_11 = arith.constant 0 : index
    %c0_12 = arith.constant 0 : index
    %c0_13 = arith.constant 0 : index
    %25 = vector.load %arg3[%c0_11, %c0_12, %c0_13] : memref<8x45x45xbf16, #tpu.memory_space<vmem>>, vector<1x45x45xbf16>
    %26 = vector.shape_cast %25 : vector<1x45x45xbf16> to vector<45x45xbf16>
    %cst_14 = arith.constant dense<0.000000e+00> : vector<45x1xf32>
    %27 = tpu.matmul %26, %23, %cst_14 {dimension_numbers = #tpu.dot_dimension_numbers<[1], [0], [0], [1], [0, 0, 1, 1], [], []>} : vector<45x45xbf16>, vector<45x1xbf16>, vector<45x1xf32> -> vector<45x1xf32>
    %c4_15 = arith.constant 4 : index
    %c0_16 = arith.constant 0 : index
    %c0_17 = arith.constant 0 : index
    %28 = vector.load %arg3[%c4_15, %c0_16, %c0_17] : memref<8x45x45xbf16, #tpu.memory_space<vmem>>, vector<1x45x45xbf16>
    %29 = vector.shape_cast %28 : vector<1x45x45xbf16> to vector<45x45xbf16>
    %cst_18 = arith.constant dense<0.000000e+00> : vector<45x1xf32>
    %30 = tpu.matmul %29, %24, %cst_18 {dimension_numbers = #tpu.dot_dimension_numbers<[1], [0], [0], [1], [0, 0, 1, 1], [], []>} : vector<45x45xbf16>, vector<45x1xbf16>, vector<45x1xf32> -> vector<45x1xf32>
    %31 = arith.addf %27, %30 : vector<45x1xf32>
    %32 = vector.extract_strided_slice %0 {offsets = [0, 0], sizes = [45, 1], strides = [1, 1]} : vector<45x4xf32> to vector<45x1xf32>
    %33 = arith.addf %31, %32 : vector<45x1xf32>
    %34 = vector.extract_strided_slice %2 {offsets = [0, 0], sizes = [1, 8], strides = [1, 1]} : vector<4x8xf32> to vector<1x8xf32>
    %35 = vector.broadcast %33 : vector<45x1xf32> to vector<45x8xf32>
    %36 = vector.broadcast %34 : vector<1x8xf32> to vector<45x8xf32>
    %37 = arith.mulf %35, %36 : vector<45x8xf32>
    %c1 = arith.constant 1 : index
    %c0_19 = arith.constant 0 : index
    %c0_20 = arith.constant 0 : index
    %38 = vector.load %arg3[%c1, %c0_19, %c0_20] : memref<8x45x45xbf16, #tpu.memory_space<vmem>>, vector<1x45x45xbf16>
    %39 = vector.shape_cast %38 : vector<1x45x45xbf16> to vector<45x45xbf16>
    %cst_21 = arith.constant dense<0.000000e+00> : vector<45x1xf32>
    %40 = tpu.matmul %39, %23, %cst_21 {dimension_numbers = #tpu.dot_dimension_numbers<[1], [0], [0], [1], [0, 0, 1, 1], [], []>} : vector<45x45xbf16>, vector<45x1xbf16>, vector<45x1xf32> -> vector<45x1xf32>
    %c5 = arith.constant 5 : index
    %c0_22 = arith.constant 0 : index
    %c0_23 = arith.constant 0 : index
    %41 = vector.load %arg3[%c5, %c0_22, %c0_23] : memref<8x45x45xbf16, #tpu.memory_space<vmem>>, vector<1x45x45xbf16>
    %42 = vector.shape_cast %41 : vector<1x45x45xbf16> to vector<45x45xbf16>
    %cst_24 = arith.constant dense<0.000000e+00> : vector<45x1xf32>
    %43 = tpu.matmul %42, %24, %cst_24 {dimension_numbers = #tpu.dot_dimension_numbers<[1], [0], [0], [1], [0, 0, 1, 1], [], []>} : vector<45x45xbf16>, vector<45x1xbf16>, vector<45x1xf32> -> vector<45x1xf32>
    %44 = arith.addf %40, %43 : vector<45x1xf32>
    %45 = vector.extract_strided_slice %0 {offsets = [0, 1], sizes = [45, 1], strides = [1, 1]} : vector<45x4xf32> to vector<45x1xf32>
    %46 = arith.addf %44, %45 : vector<45x1xf32>
    %47 = vector.extract_strided_slice %2 {offsets = [1, 0], sizes = [1, 8], strides = [1, 1]} : vector<4x8xf32> to vector<1x8xf32>
    %48 = vector.broadcast %46 : vector<45x1xf32> to vector<45x8xf32>
    %49 = vector.broadcast %47 : vector<1x8xf32> to vector<45x8xf32>
    %50 = arith.mulf %48, %49 : vector<45x8xf32>
    %51 = arith.addf %37, %50 : vector<45x8xf32>
    %c2 = arith.constant 2 : index
    %c0_25 = arith.constant 0 : index
    %c0_26 = arith.constant 0 : index
    %52 = vector.load %arg3[%c2, %c0_25, %c0_26] : memref<8x45x45xbf16, #tpu.memory_space<vmem>>, vector<1x45x45xbf16>
    %53 = vector.shape_cast %52 : vector<1x45x45xbf16> to vector<45x45xbf16>
    %cst_27 = arith.constant dense<0.000000e+00> : vector<45x1xf32>
    %54 = tpu.matmul %53, %23, %cst_27 {dimension_numbers = #tpu.dot_dimension_numbers<[1], [0], [0], [1], [0, 0, 1, 1], [], []>} : vector<45x45xbf16>, vector<45x1xbf16>, vector<45x1xf32> -> vector<45x1xf32>
    %c6 = arith.constant 6 : index
    %c0_28 = arith.constant 0 : index
    %c0_29 = arith.constant 0 : index
    %55 = vector.load %arg3[%c6, %c0_28, %c0_29] : memref<8x45x45xbf16, #tpu.memory_space<vmem>>, vector<1x45x45xbf16>
    %56 = vector.shape_cast %55 : vector<1x45x45xbf16> to vector<45x45xbf16>
    %cst_30 = arith.constant dense<0.000000e+00> : vector<45x1xf32>
    %57 = tpu.matmul %56, %24, %cst_30 {dimension_numbers = #tpu.dot_dimension_numbers<[1], [0], [0], [1], [0, 0, 1, 1], [], []>} : vector<45x45xbf16>, vector<45x1xbf16>, vector<45x1xf32> -> vector<45x1xf32>
    %58 = arith.addf %54, %57 : vector<45x1xf32>
    %59 = vector.extract_strided_slice %0 {offsets = [0, 2], sizes = [45, 1], strides = [1, 1]} : vector<45x4xf32> to vector<45x1xf32>
    %60 = arith.addf %58, %59 : vector<45x1xf32>
    %61 = vector.extract_strided_slice %2 {offsets = [2, 0], sizes = [1, 8], strides = [1, 1]} : vector<4x8xf32> to vector<1x8xf32>
    %62 = vector.broadcast %60 : vector<45x1xf32> to vector<45x8xf32>
    %63 = vector.broadcast %61 : vector<1x8xf32> to vector<45x8xf32>
    %64 = arith.mulf %62, %63 : vector<45x8xf32>
    %65 = arith.addf %51, %64 : vector<45x8xf32>
    %c3 = arith.constant 3 : index
    %c0_31 = arith.constant 0 : index
    %c0_32 = arith.constant 0 : index
    %66 = vector.load %arg3[%c3, %c0_31, %c0_32] : memref<8x45x45xbf16, #tpu.memory_space<vmem>>, vector<1x45x45xbf16>
    %67 = vector.shape_cast %66 : vector<1x45x45xbf16> to vector<45x45xbf16>
    %cst_33 = arith.constant dense<0.000000e+00> : vector<45x1xf32>
    %68 = tpu.matmul %67, %23, %cst_33 {dimension_numbers = #tpu.dot_dimension_numbers<[1], [0], [0], [1], [0, 0, 1, 1], [], []>} : vector<45x45xbf16>, vector<45x1xbf16>, vector<45x1xf32> -> vector<45x1xf32>
    %c7 = arith.constant 7 : index
    %c0_34 = arith.constant 0 : index
    %c0_35 = arith.constant 0 : index
    %69 = vector.load %arg3[%c7, %c0_34, %c0_35] : memref<8x45x45xbf16, #tpu.memory_space<vmem>>, vector<1x45x45xbf16>
    %70 = vector.shape_cast %69 : vector<1x45x45xbf16> to vector<45x45xbf16>
    %cst_36 = arith.constant dense<0.000000e+00> : vector<45x1xf32>
    %71 = tpu.matmul %70, %24, %cst_36 {dimension_numbers = #tpu.dot_dimension_numbers<[1], [0], [0], [1], [0, 0, 1, 1], [], []>} : vector<45x45xbf16>, vector<45x1xbf16>, vector<45x1xf32> -> vector<45x1xf32>
    %72 = arith.addf %68, %71 : vector<45x1xf32>
    %73 = vector.extract_strided_slice %0 {offsets = [0, 3], sizes = [45, 1], strides = [1, 1]} : vector<45x4xf32> to vector<45x1xf32>
    %74 = arith.addf %72, %73 : vector<45x1xf32>
    %75 = vector.extract_strided_slice %2 {offsets = [3, 0], sizes = [1, 8], strides = [1, 1]} : vector<4x8xf32> to vector<1x8xf32>
    %76 = vector.broadcast %74 : vector<45x1xf32> to vector<45x8xf32>
    %77 = vector.broadcast %75 : vector<1x8xf32> to vector<45x8xf32>
    %78 = arith.mulf %76, %77 : vector<45x8xf32>
    %79 = arith.addf %65, %78 : vector<45x8xf32>
    %80 = arith.truncf %79 : vector<45x8xf32> to vector<45x8xbf16>
    %cst_37 = arith.constant dense<0.000000e+00> : vector<45x8xf32>
    %81 = tpu.matmul %8, %80, %cst_37 {dimension_numbers = #tpu.dot_dimension_numbers<[1], [0], [0], [1], [0, 0, 1, 1], [], []>} : vector<45x45xbf16>, vector<45x8xbf16>, vector<45x8xf32> -> vector<45x8xf32>
    %82 = arith.mulf %81, %1 : vector<45x8xf32>
    %83 = vector.shape_cast %82 : vector<45x8xf32> to vector<1x45x8xf32>
    %cst_38 = arith.constant dense<0.000000e+00> : vector<1xf32>
    %84 = vector.multi_reduction <add>, %83, %cst_38 [1, 2] : vector<1x45x8xf32> to vector<1xf32>
    %85 = vector.shape_cast %84 : vector<1xf32> to vector<1x1x1xf32>
    %86 = vector.extract %85[0, 0, 0] : f32 from vector<1x1x1xf32>
    %87 = vector.broadcast %86 : f32 to vector<1x1xf32>
    %88 = arith.addf %87, %4 : vector<1x1xf32>
    %c0_39 = arith.constant 0 : index
    %c0_40 = arith.constant 0 : index
    %c0_41 = arith.constant 0 : index
    %89 = vector.load %arg5[%c0_39, %c0_40, %c0_41] : memref<4x1x1xf32, #tpu.memory_space<vmem>>, vector<1x1x1xf32>
    %90 = vector.shape_cast %89 : vector<1x1x1xf32> to vector<1x1xf32>
    %91 = vector.shape_cast %88 : vector<1x1xf32> to vector<1x1x1xf32>
    tpu.vector_store %arg5[%c0_39, %c0_40, %c0_41], %91 {strides = array<i32>} : memref<4x1x1xf32, #tpu.memory_space<vmem>>, vector<1x1x1xf32>,
    %c1_42 = arith.constant 1 : index
    %c0_43 = arith.constant 0 : index
    %c0_44 = arith.constant 0 : index
    %92 = vector.load %arg1[%c1_42, %c0_43, %c0_44] : memref<4x45x2xf32, #tpu.memory_space<vmem>>, vector<1x45x2xf32>
    %93 = vector.shape_cast %92 : vector<1x45x2xf32> to vector<45x2xf32>
    %c1_45 = arith.constant 1 : index
    %c0_46 = arith.constant 0 : index
    %c0_47 = arith.constant 0 : index
    %94 = vector.load %arg2[%c1_45, %c0_46, %c0_47] : memref<4x45x45xbf16, #tpu.memory_space<vmem>>, vector<1x45x45xbf16>
    %95 = vector.shape_cast %94 : vector<1x45x45xbf16> to vector<45x45xbf16>
    %96 = vector.extract_strided_slice %93 {offsets = [0, 0], sizes = [45, 1], strides = [1, 1]} : vector<45x2xf32> to vector<45x1xf32>
    %97 = vector.extract_strided_slice %3 {offsets = [0, 0], sizes = [1, 2], strides = [1, 1]} : vector<2x2xf32> to vector<1x2xf32>
    %98 = vector.broadcast %96 : vector<45x1xf32> to vector<45x2xf32>
    %99 = vector.broadcast %97 : vector<1x2xf32> to vector<45x2xf32>
    %100 = arith.mulf %98, %99 : vector<45x2xf32>
    %101 = vector.extract_strided_slice %93 {offsets = [0, 1], sizes = [45, 1], strides = [1, 1]} : vector<45x2xf32> to vector<45x1xf32>
    %102 = vector.extract_strided_slice %3 {offsets = [1, 0], sizes = [1, 2], strides = [1, 1]} : vector<2x2xf32> to vector<1x2xf32>
    %103 = vector.broadcast %101 : vector<45x1xf32> to vector<45x2xf32>
    %104 = vector.broadcast %102 : vector<1x2xf32> to vector<45x2xf32>
    %105 = arith.mulf %103, %104 : vector<45x2xf32>
    %106 = arith.addf %100, %105 : vector<45x2xf32>
    %107 = arith.truncf %106 : vector<45x2xf32> to vector<45x2xbf16>
    %cst_48 = arith.constant dense<0.000000e+00> : vector<45x2xf32>
    %108 = tpu.matmul %95, %107, %cst_48 {dimension_numbers = #tpu.dot_dimension_numbers<[1], [0], [0], [1], [0, 0, 1, 1], [], []>} : vector<45x45xbf16>, vector<45x2xbf16>, vector<45x2xf32> -> vector<45x2xf32>
    %109 = arith.truncf %108 : vector<45x2xf32> to vector<45x2xbf16>
    %110 = vector.extract_strided_slice %109 {offsets = [0, 0], sizes = [45, 1], strides = [1, 1]} : vector<45x2xbf16> to vector<45x1xbf16>
    %111 = vector.extract_strided_slice %109 {offsets = [0, 1], sizes = [45, 1], strides = [1, 1]} : vector<45x2xbf16> to vector<45x1xbf16>
    %c0_49 = arith.constant 0 : index
    %c0_50 = arith.constant 0 : index
    %c0_51 = arith.constant 0 : index
    %112 = vector.load %arg3[%c0_49, %c0_50, %c0_51] : memref<8x45x45xbf16, #tpu.memory_space<vmem>>, vector<1x45x45xbf16>
    %113 = vector.shape_cast %112 : vector<1x45x45xbf16> to vector<45x45xbf16>
    %cst_52 = arith.constant dense<0.000000e+00> : vector<45x1xf32>
    %114 = tpu.matmul %113, %110, %cst_52 {dimension_numbers = #tpu.dot_dimension_numbers<[1], [0], [0], [1], [0, 0, 1, 1], [], []>} : vector<45x45xbf16>, vector<45x1xbf16>, vector<45x1xf32> -> vector<45x1xf32>
    %c4_53 = arith.constant 4 : index
    %c0_54 = arith.constant 0 : index
    %c0_55 = arith.constant 0 : index
    %115 = vector.load %arg3[%c4_53, %c0_54, %c0_55] : memref<8x45x45xbf16, #tpu.memory_space<vmem>>, vector<1x45x45xbf16>
    %116 = vector.shape_cast %115 : vector<1x45x45xbf16> to vector<45x45xbf16>
    %cst_56 = arith.constant dense<0.000000e+00> : vector<45x1xf32>
    %117 = tpu.matmul %116, %111, %cst_56 {dimension_numbers = #tpu.dot_dimension_numbers<[1], [0], [0], [1], [0, 0, 1, 1], [], []>} : vector<45x45xbf16>, vector<45x1xbf16>, vector<45x1xf32> -> vector<45x1xf32>
    %118 = arith.addf %114, %117 : vector<45x1xf32>
    %119 = vector.extract_strided_slice %0 {offsets = [0, 0], sizes = [45, 1], strides = [1, 1]} : vector<45x4xf32> to vector<45x1xf32>
    %120 = arith.addf %118, %119 : vector<45x1xf32>
    %121 = vector.extract_strided_slice %2 {offsets = [0, 0], sizes = [1, 8], strides = [1, 1]} : vector<4x8xf32> to vector<1x8xf32>
    %122 = vector.broadcast %120 : vector<45x1xf32> to vector<45x8xf32>
    %123 = vector.broadcast %121 : vector<1x8xf32> to vector<45x8xf32>
    %124 = arith.mulf %122, %123 : vector<45x8xf32>
    %c1_57 = arith.constant 1 : index
    %c0_58 = arith.constant 0 : index
    %c0_59 = arith.constant 0 : index
    %125 = vector.load %arg3[%c1_57, %c0_58, %c0_59] : memref<8x45x45xbf16, #tpu.memory_space<vmem>>, vector<1x45x45xbf16>
    %126 = vector.shape_cast %125 : vector<1x45x45xbf16> to vector<45x45xbf16>
    %cst_60 = arith.constant dense<0.000000e+00> : vector<45x1xf32>
    %127 = tpu.matmul %126, %110, %cst_60 {dimension_numbers = #tpu.dot_dimension_numbers<[1], [0], [0], [1], [0, 0, 1, 1], [], []>} : vector<45x45xbf16>, vector<45x1xbf16>, vector<45x1xf32> -> vector<45x1xf32>
    %c5_61 = arith.constant 5 : index
    %c0_62 = arith.constant 0 : index
    %c0_63 = arith.constant 0 : index
    %128 = vector.load %arg3[%c5_61, %c0_62, %c0_63] : memref<8x45x45xbf16, #tpu.memory_space<vmem>>, vector<1x45x45xbf16>
    %129 = vector.shape_cast %128 : vector<1x45x45xbf16> to vector<45x45xbf16>
    %cst_64 = arith.constant dense<0.000000e+00> : vector<45x1xf32>
    %130 = tpu.matmul %129, %111, %cst_64 {dimension_numbers = #tpu.dot_dimension_numbers<[1], [0], [0], [1], [0, 0, 1, 1], [], []>} : vector<45x45xbf16>, vector<45x1xbf16>, vector<45x1xf32> -> vector<45x1xf32>
    %131 = arith.addf %127, %130 : vector<45x1xf32>
    %132 = vector.extract_strided_slice %0 {offsets = [0, 1], sizes = [45, 1], strides = [1, 1]} : vector<45x4xf32> to vector<45x1xf32>
    %133 = arith.addf %131, %132 : vector<45x1xf32>
    %134 = vector.extract_strided_slice %2 {offsets = [1, 0], sizes = [1, 8], strides = [1, 1]} : vector<4x8xf32> to vector<1x8xf32>
    %135 = vector.broadcast %133 : vector<45x1xf32> to vector<45x8xf32>
    %136 = vector.broadcast %134 : vector<1x8xf32> to vector<45x8xf32>
    %137 = arith.mulf %135, %136 : vector<45x8xf32>
    %138 = arith.addf %124, %137 : vector<45x8xf32>
    %c2_65 = arith.constant 2 : index
    %c0_66 = arith.constant 0 : index
    %c0_67 = arith.constant 0 : index
    %139 = vector.load %arg3[%c2_65, %c0_66, %c0_67] : memref<8x45x45xbf16, #tpu.memory_space<vmem>>, vector<1x45x45xbf16>
    %140 = vector.shape_cast %139 : vector<1x45x45xbf16> to vector<45x45xbf16>
    %cst_68 = arith.constant dense<0.000000e+00> : vector<45x1xf32>
    %141 = tpu.matmul %140, %110, %cst_68 {dimension_numbers = #tpu.dot_dimension_numbers<[1], [0], [0], [1], [0, 0, 1, 1], [], []>} : vector<45x45xbf16>, vector<45x1xbf16>, vector<45x1xf32> -> vector<45x1xf32>
    %c6_69 = arith.constant 6 : index
    %c0_70 = arith.constant 0 : index
    %c0_71 = arith.constant 0 : index
    %142 = vector.load %arg3[%c6_69, %c0_70, %c0_71] : memref<8x45x45xbf16, #tpu.memory_space<vmem>>, vector<1x45x45xbf16>
    %143 = vector.shape_cast %142 : vector<1x45x45xbf16> to vector<45x45xbf16>
    %cst_72 = arith.constant dense<0.000000e+00> : vector<45x1xf32>
    %144 = tpu.matmul %143, %111, %cst_72 {dimension_numbers = #tpu.dot_dimension_numbers<[1], [0], [0], [1], [0, 0, 1, 1], [], []>} : vector<45x45xbf16>, vector<45x1xbf16>, vector<45x1xf32> -> vector<45x1xf32>
    %145 = arith.addf %141, %144 : vector<45x1xf32>
    %146 = vector.extract_strided_slice %0 {offsets = [0, 2], sizes = [45, 1], strides = [1, 1]} : vector<45x4xf32> to vector<45x1xf32>
    %147 = arith.addf %145, %146 : vector<45x1xf32>
    %148 = vector.extract_strided_slice %2 {offsets = [2, 0], sizes = [1, 8], strides = [1, 1]} : vector<4x8xf32> to vector<1x8xf32>
    %149 = vector.broadcast %147 : vector<45x1xf32> to vector<45x8xf32>
    %150 = vector.broadcast %148 : vector<1x8xf32> to vector<45x8xf32>
    %151 = arith.mulf %149, %150 : vector<45x8xf32>
    %152 = arith.addf %138, %151 : vector<45x8xf32>
    %c3_73 = arith.constant 3 : index
    %c0_74 = arith.constant 0 : index
    %c0_75 = arith.constant 0 : index
    %153 = vector.load %arg3[%c3_73, %c0_74, %c0_75] : memref<8x45x45xbf16, #tpu.memory_space<vmem>>, vector<1x45x45xbf16>
    %154 = vector.shape_cast %153 : vector<1x45x45xbf16> to vector<45x45xbf16>
    %cst_76 = arith.constant dense<0.000000e+00> : vector<45x1xf32>
    %155 = tpu.matmul %154, %110, %cst_76 {dimension_numbers = #tpu.dot_dimension_numbers<[1], [0], [0], [1], [0, 0, 1, 1], [], []>} : vector<45x45xbf16>, vector<45x1xbf16>, vector<45x1xf32> -> vector<45x1xf32>
    %c7_77 = arith.constant 7 : index
    %c0_78 = arith.constant 0 : index
    %c0_79 = arith.constant 0 : index
    %156 = vector.load %arg3[%c7_77, %c0_78, %c0_79] : memref<8x45x45xbf16, #tpu.memory_space<vmem>>, vector<1x45x45xbf16>
    %157 = vector.shape_cast %156 : vector<1x45x45xbf16> to vector<45x45xbf16>
    %cst_80 = arith.constant dense<0.000000e+00> : vector<45x1xf32>
    %158 = tpu.matmul %157, %111, %cst_80 {dimension_numbers = #tpu.dot_dimension_numbers<[1], [0], [0], [1], [0, 0, 1, 1], [], []>} : vector<45x45xbf16>, vector<45x1xbf16>, vector<45x1xf32> -> vector<45x1xf32>
    %159 = arith.addf %155, %158 : vector<45x1xf32>
    %160 = vector.extract_strided_slice %0 {offsets = [0, 3], sizes = [45, 1], strides = [1, 1]} : vector<45x4xf32> to vector<45x1xf32>
    %161 = arith.addf %159, %160 : vector<45x1xf32>
    %162 = vector.extract_strided_slice %2 {offsets = [3, 0], sizes = [1, 8], strides = [1, 1]} : vector<4x8xf32> to vector<1x8xf32>
    %163 = vector.broadcast %161 : vector<45x1xf32> to vector<45x8xf32>
    %164 = vector.broadcast %162 : vector<1x8xf32> to vector<45x8xf32>
    %165 = arith.mulf %163, %164 : vector<45x8xf32>
    %166 = arith.addf %152, %165 : vector<45x8xf32>
    %167 = arith.truncf %166 : vector<45x8xf32> to vector<45x8xbf16>
    %cst_81 = arith.constant dense<0.000000e+00> : vector<45x8xf32>
    %168 = tpu.matmul %95, %167, %cst_81 {dimension_numbers = #tpu.dot_dimension_numbers<[1], [0], [0], [1], [0, 0, 1, 1], [], []>} : vector<45x45xbf16>, vector<45x8xbf16>, vector<45x8xf32> -> vector<45x8xf32>
    %169 = arith.mulf %168, %1 : vector<45x8xf32>
    %170 = vector.shape_cast %169 : vector<45x8xf32> to vector<1x45x8xf32>
    %cst_82 = arith.constant dense<0.000000e+00> : vector<1xf32>
    %171 = vector.multi_reduction <add>, %170, %cst_82 [1, 2] : vector<1x45x8xf32> to vector<1xf32>
    %172 = vector.shape_cast %171 : vector<1xf32> to vector<1x1x1xf32>
    %173 = vector.extract %172[0, 0, 0] : f32 from vector<1x1x1xf32>
    %174 = vector.broadcast %173 : f32 to vector<1x1xf32>
    %175 = arith.addf %174, %4 : vector<1x1xf32>
    %c1_83 = arith.constant 1 : index
    %c0_84 = arith.constant 0 : index
    %c0_85 = arith.constant 0 : index
    %176 = vector.load %arg5[%c1_83, %c0_84, %c0_85] : memref<4x1x1xf32, #tpu.memory_space<vmem>>, vector<1x1x1xf32>
    %177 = vector.shape_cast %176 : vector<1x1x1xf32> to vector<1x1xf32>
    %178 = vector.shape_cast %175 : vector<1x1xf32> to vector<1x1x1xf32>
    tpu.vector_store %arg5[%c1_83, %c0_84, %c0_85], %178 {strides = array<i32>} : memref<4x1x1xf32, #tpu.memory_space<vmem>>, vector<1x1x1xf32>,
    %c2_86 = arith.constant 2 : index
    %c0_87 = arith.constant 0 : index
    %c0_88 = arith.constant 0 : index
    %179 = vector.load %arg1[%c2_86, %c0_87, %c0_88] : memref<4x45x2xf32, #tpu.memory_space<vmem>>, vector<1x45x2xf32>
    %180 = vector.shape_cast %179 : vector<1x45x2xf32> to vector<45x2xf32>
    %c2_89 = arith.constant 2 : index
    %c0_90 = arith.constant 0 : index
    %c0_91 = arith.constant 0 : index
    %181 = vector.load %arg2[%c2_89, %c0_90, %c0_91] : memref<4x45x45xbf16, #tpu.memory_space<vmem>>, vector<1x45x45xbf16>
    %182 = vector.shape_cast %181 : vector<1x45x45xbf16> to vector<45x45xbf16>
    %183 = vector.extract_strided_slice %180 {offsets = [0, 0], sizes = [45, 1], strides = [1, 1]} : vector<45x2xf32> to vector<45x1xf32>
    %184 = vector.extract_strided_slice %3 {offsets = [0, 0], sizes = [1, 2], strides = [1, 1]} : vector<2x2xf32> to vector<1x2xf32>
    %185 = vector.broadcast %183 : vector<45x1xf32> to vector<45x2xf32>
    %186 = vector.broadcast %184 : vector<1x2xf32> to vector<45x2xf32>
    %187 = arith.mulf %185, %186 : vector<45x2xf32>
    %188 = vector.extract_strided_slice %180 {offsets = [0, 1], sizes = [45, 1], strides = [1, 1]} : vector<45x2xf32> to vector<45x1xf32>
    %189 = vector.extract_strided_slice %3 {offsets = [1, 0], sizes = [1, 2], strides = [1, 1]} : vector<2x2xf32> to vector<1x2xf32>
    %190 = vector.broadcast %188 : vector<45x1xf32> to vector<45x2xf32>
    %191 = vector.broadcast %189 : vector<1x2xf32> to vector<45x2xf32>
    %192 = arith.mulf %190, %191 : vector<45x2xf32>
    %193 = arith.addf %187, %192 : vector<45x2xf32>
    %194 = arith.truncf %193 : vector<45x2xf32> to vector<45x2xbf16>
    %cst_92 = arith.constant dense<0.000000e+00> : vector<45x2xf32>
    %195 = tpu.matmul %182, %194, %cst_92 {dimension_numbers = #tpu.dot_dimension_numbers<[1], [0], [0], [1], [0, 0, 1, 1], [], []>} : vector<45x45xbf16>, vector<45x2xbf16>, vector<45x2xf32> -> vector<45x2xf32>
    %196 = arith.truncf %195 : vector<45x2xf32> to vector<45x2xbf16>
    %197 = vector.extract_strided_slice %196 {offsets = [0, 0], sizes = [45, 1], strides = [1, 1]} : vector<45x2xbf16> to vector<45x1xbf16>
    %198 = vector.extract_strided_slice %196 {offsets = [0, 1], sizes = [45, 1], strides = [1, 1]} : vector<45x2xbf16> to vector<45x1xbf16>
    %c0_93 = arith.constant 0 : index
    %c0_94 = arith.constant 0 : index
    %c0_95 = arith.constant 0 : index
    %199 = vector.load %arg3[%c0_93, %c0_94, %c0_95] : memref<8x45x45xbf16, #tpu.memory_space<vmem>>, vector<1x45x45xbf16>
    %200 = vector.shape_cast %199 : vector<1x45x45xbf16> to vector<45x45xbf16>
    %cst_96 = arith.constant dense<0.000000e+00> : vector<45x1xf32>
    %201 = tpu.matmul %200, %197, %cst_96 {dimension_numbers = #tpu.dot_dimension_numbers<[1], [0], [0], [1], [0, 0, 1, 1], [], []>} : vector<45x45xbf16>, vector<45x1xbf16>, vector<45x1xf32> -> vector<45x1xf32>
    %c4_97 = arith.constant 4 : index
    %c0_98 = arith.constant 0 : index
    %c0_99 = arith.constant 0 : index
    %202 = vector.load %arg3[%c4_97, %c0_98, %c0_99] : memref<8x45x45xbf16, #tpu.memory_space<vmem>>, vector<1x45x45xbf16>
    %203 = vector.shape_cast %202 : vector<1x45x45xbf16> to vector<45x45xbf16>
    %cst_100 = arith.constant dense<0.000000e+00> : vector<45x1xf32>
    %204 = tpu.matmul %203, %198, %cst_100 {dimension_numbers = #tpu.dot_dimension_numbers<[1], [0], [0], [1], [0, 0, 1, 1], [], []>} : vector<45x45xbf16>, vector<45x1xbf16>, vector<45x1xf32> -> vector<45x1xf32>
    %205 = arith.addf %201, %204 : vector<45x1xf32>
    %206 = vector.extract_strided_slice %0 {offsets = [0, 0], sizes = [45, 1], strides = [1, 1]} : vector<45x4xf32> to vector<45x1xf32>
    %207 = arith.addf %205, %206 : vector<45x1xf32>
    %208 = vector.extract_strided_slice %2 {offsets = [0, 0], sizes = [1, 8], strides = [1, 1]} : vector<4x8xf32> to vector<1x8xf32>
    %209 = vector.broadcast %207 : vector<45x1xf32> to vector<45x8xf32>
    %210 = vector.broadcast %208 : vector<1x8xf32> to vector<45x8xf32>
    %211 = arith.mulf %209, %210 : vector<45x8xf32>
    %c1_101 = arith.constant 1 : index
    %c0_102 = arith.constant 0 : index
    %c0_103 = arith.constant 0 : index
    %212 = vector.load %arg3[%c1_101, %c0_102, %c0_103] : memref<8x45x45xbf16, #tpu.memory_space<vmem>>, vector<1x45x45xbf16>
    %213 = vector.shape_cast %212 : vector<1x45x45xbf16> to vector<45x45xbf16>
    %cst_104 = arith.constant dense<0.000000e+00> : vector<45x1xf32>
    %214 = tpu.matmul %213, %197, %cst_104 {dimension_numbers = #tpu.dot_dimension_numbers<[1], [0], [0], [1], [0, 0, 1, 1], [], []>} : vector<45x45xbf16>, vector<45x1xbf16>, vector<45x1xf32> -> vector<45x1xf32>
    %c5_105 = arith.constant 5 : index
    %c0_106 = arith.constant 0 : index
    %c0_107 = arith.constant 0 : index
    %215 = vector.load %arg3[%c5_105, %c0_106, %c0_107] : memref<8x45x45xbf16, #tpu.memory_space<vmem>>, vector<1x45x45xbf16>
    %216 = vector.shape_cast %215 : vector<1x45x45xbf16> to vector<45x45xbf16>
    %cst_108 = arith.constant dense<0.000000e+00> : vector<45x1xf32>
    %217 = tpu.matmul %216, %198, %cst_108 {dimension_numbers = #tpu.dot_dimension_numbers<[1], [0], [0], [1], [0, 0, 1, 1], [], []>} : vector<45x45xbf16>, vector<45x1xbf16>, vector<45x1xf32> -> vector<45x1xf32>
    %218 = arith.addf %214, %217 : vector<45x1xf32>
    %219 = vector.extract_strided_slice %0 {offsets = [0, 1], sizes = [45, 1], strides = [1, 1]} : vector<45x4xf32> to vector<45x1xf32>
    %220 = arith.addf %218, %219 : vector<45x1xf32>
    %221 = vector.extract_strided_slice %2 {offsets = [1, 0], sizes = [1, 8], strides = [1, 1]} : vector<4x8xf32> to vector<1x8xf32>
    %222 = vector.broadcast %220 : vector<45x1xf32> to vector<45x8xf32>
    %223 = vector.broadcast %221 : vector<1x8xf32> to vector<45x8xf32>
    %224 = arith.mulf %222, %223 : vector<45x8xf32>
    %225 = arith.addf %211, %224 : vector<45x8xf32>
    %c2_109 = arith.constant 2 : index
    %c0_110 = arith.constant 0 : index
    %c0_111 = arith.constant 0 : index
    %226 = vector.load %arg3[%c2_109, %c0_110, %c0_111] : memref<8x45x45xbf16, #tpu.memory_space<vmem>>, vector<1x45x45xbf16>
    %227 = vector.shape_cast %226 : vector<1x45x45xbf16> to vector<45x45xbf16>
    %cst_112 = arith.constant dense<0.000000e+00> : vector<45x1xf32>
    %228 = tpu.matmul %227, %197, %cst_112 {dimension_numbers = #tpu.dot_dimension_numbers<[1], [0], [0], [1], [0, 0, 1, 1], [], []>} : vector<45x45xbf16>, vector<45x1xbf16>, vector<45x1xf32> -> vector<45x1xf32>
    %c6_113 = arith.constant 6 : index
    %c0_114 = arith.constant 0 : index
    %c0_115 = arith.constant 0 : index
    %229 = vector.load %arg3[%c6_113, %c0_114, %c0_115] : memref<8x45x45xbf16, #tpu.memory_space<vmem>>, vector<1x45x45xbf16>
    %230 = vector.shape_cast %229 : vector<1x45x45xbf16> to vector<45x45xbf16>
    %cst_116 = arith.constant dense<0.000000e+00> : vector<45x1xf32>
    %231 = tpu.matmul %230, %198, %cst_116 {dimension_numbers = #tpu.dot_dimension_numbers<[1], [0], [0], [1], [0, 0, 1, 1], [], []>} : vector<45x45xbf16>, vector<45x1xbf16>, vector<45x1xf32> -> vector<45x1xf32>
    %232 = arith.addf %228, %231 : vector<45x1xf32>
    %233 = vector.extract_strided_slice %0 {offsets = [0, 2], sizes = [45, 1], strides = [1, 1]} : vector<45x4xf32> to vector<45x1xf32>
    %234 = arith.addf %232, %233 : vector<45x1xf32>
    %235 = vector.extract_strided_slice %2 {offsets = [2, 0], sizes = [1, 8], strides = [1, 1]} : vector<4x8xf32> to vector<1x8xf32>
    %236 = vector.broadcast %234 : vector<45x1xf32> to vector<45x8xf32>
    %237 = vector.broadcast %235 : vector<1x8xf32> to vector<45x8xf32>
    %238 = arith.mulf %236, %237 : vector<45x8xf32>
    %239 = arith.addf %225, %238 : vector<45x8xf32>
    %c3_117 = arith.constant 3 : index
    %c0_118 = arith.constant 0 : index
    %c0_119 = arith.constant 0 : index
    %240 = vector.load %arg3[%c3_117, %c0_118, %c0_119] : memref<8x45x45xbf16, #tpu.memory_space<vmem>>, vector<1x45x45xbf16>
    %241 = vector.shape_cast %240 : vector<1x45x45xbf16> to vector<45x45xbf16>
    %cst_120 = arith.constant dense<0.000000e+00> : vector<45x1xf32>
    %242 = tpu.matmul %241, %197, %cst_120 {dimension_numbers = #tpu.dot_dimension_numbers<[1], [0], [0], [1], [0, 0, 1, 1], [], []>} : vector<45x45xbf16>, vector<45x1xbf16>, vector<45x1xf32> -> vector<45x1xf32>
    %c7_121 = arith.constant 7 : index
    %c0_122 = arith.constant 0 : index
    %c0_123 = arith.constant 0 : index
    %243 = vector.load %arg3[%c7_121, %c0_122, %c0_123] : memref<8x45x45xbf16, #tpu.memory_space<vmem>>, vector<1x45x45xbf16>
    %244 = vector.shape_cast %243 : vector<1x45x45xbf16> to vector<45x45xbf16>
    %cst_124 = arith.constant dense<0.000000e+00> : vector<45x1xf32>
    %245 = tpu.matmul %244, %198, %cst_124 {dimension_numbers = #tpu.dot_dimension_numbers<[1], [0], [0], [1], [0, 0, 1, 1], [], []>} : vector<45x45xbf16>, vector<45x1xbf16>, vector<45x1xf32> -> vector<45x1xf32>
    %246 = arith.addf %242, %245 : vector<45x1xf32>
    %247 = vector.extract_strided_slice %0 {offsets = [0, 3], sizes = [45, 1], strides = [1, 1]} : vector<45x4xf32> to vector<45x1xf32>
    %248 = arith.addf %246, %247 : vector<45x1xf32>
    %249 = vector.extract_strided_slice %2 {offsets = [3, 0], sizes = [1, 8], strides = [1, 1]} : vector<4x8xf32> to vector<1x8xf32>
    %250 = vector.broadcast %248 : vector<45x1xf32> to vector<45x8xf32>
    %251 = vector.broadcast %249 : vector<1x8xf32> to vector<45x8xf32>
    %252 = arith.mulf %250, %251 : vector<45x8xf32>
    %253 = arith.addf %239, %252 : vector<45x8xf32>
    %254 = arith.truncf %253 : vector<45x8xf32> to vector<45x8xbf16>
    %cst_125 = arith.constant dense<0.000000e+00> : vector<45x8xf32>
    %255 = tpu.matmul %182, %254, %cst_125 {dimension_numbers = #tpu.dot_dimension_numbers<[1], [0], [0], [1], [0, 0, 1, 1], [], []>} : vector<45x45xbf16>, vector<45x8xbf16>, vector<45x8xf32> -> vector<45x8xf32>
    %256 = arith.mulf %255, %1 : vector<45x8xf32>
    %257 = vector.shape_cast %256 : vector<45x8xf32> to vector<1x45x8xf32>
    %cst_126 = arith.constant dense<0.000000e+00> : vector<1xf32>
    %258 = vector.multi_reduction <add>, %257, %cst_126 [1, 2] : vector<1x45x8xf32> to vector<1xf32>
    %259 = vector.shape_cast %258 : vector<1xf32> to vector<1x1x1xf32>
    %260 = vector.extract %259[0, 0, 0] : f32 from vector<1x1x1xf32>
    %261 = vector.broadcast %260 : f32 to vector<1x1xf32>
    %262 = arith.addf %261, %4 : vector<1x1xf32>
    %c2_127 = arith.constant 2 : index
    %c0_128 = arith.constant 0 : index
    %c0_129 = arith.constant 0 : index
    %263 = vector.load %arg5[%c2_127, %c0_128, %c0_129] : memref<4x1x1xf32, #tpu.memory_space<vmem>>, vector<1x1x1xf32>
    %264 = vector.shape_cast %263 : vector<1x1x1xf32> to vector<1x1xf32>
    %265 = vector.shape_cast %262 : vector<1x1xf32> to vector<1x1x1xf32>
    tpu.vector_store %arg5[%c2_127, %c0_128, %c0_129], %265 {strides = array<i32>} : memref<4x1x1xf32, #tpu.memory_space<vmem>>, vector<1x1x1xf32>,
    %c3_130 = arith.constant 3 : index
    %c0_131 = arith.constant 0 : index
    %c0_132 = arith.constant 0 : index
    %266 = vector.load %arg1[%c3_130, %c0_131, %c0_132] : memref<4x45x2xf32, #tpu.memory_space<vmem>>, vector<1x45x2xf32>
    %267 = vector.shape_cast %266 : vector<1x45x2xf32> to vector<45x2xf32>
    %c3_133 = arith.constant 3 : index
    %c0_134 = arith.constant 0 : index
    %c0_135 = arith.constant 0 : index
    %268 = vector.load %arg2[%c3_133, %c0_134, %c0_135] : memref<4x45x45xbf16, #tpu.memory_space<vmem>>, vector<1x45x45xbf16>
    %269 = vector.shape_cast %268 : vector<1x45x45xbf16> to vector<45x45xbf16>
    %270 = vector.extract_strided_slice %267 {offsets = [0, 0], sizes = [45, 1], strides = [1, 1]} : vector<45x2xf32> to vector<45x1xf32>
    %271 = vector.extract_strided_slice %3 {offsets = [0, 0], sizes = [1, 2], strides = [1, 1]} : vector<2x2xf32> to vector<1x2xf32>
    %272 = vector.broadcast %270 : vector<45x1xf32> to vector<45x2xf32>
    %273 = vector.broadcast %271 : vector<1x2xf32> to vector<45x2xf32>
    %274 = arith.mulf %272, %273 : vector<45x2xf32>
    %275 = vector.extract_strided_slice %267 {offsets = [0, 1], sizes = [45, 1], strides = [1, 1]} : vector<45x2xf32> to vector<45x1xf32>
    %276 = vector.extract_strided_slice %3 {offsets = [1, 0], sizes = [1, 2], strides = [1, 1]} : vector<2x2xf32> to vector<1x2xf32>
    %277 = vector.broadcast %275 : vector<45x1xf32> to vector<45x2xf32>
    %278 = vector.broadcast %276 : vector<1x2xf32> to vector<45x2xf32>
    %279 = arith.mulf %277, %278 : vector<45x2xf32>
    %280 = arith.addf %274, %279 : vector<45x2xf32>
    %281 = arith.truncf %280 : vector<45x2xf32> to vector<45x2xbf16>
    %cst_136 = arith.constant dense<0.000000e+00> : vector<45x2xf32>
    %282 = tpu.matmul %269, %281, %cst_136 {dimension_numbers = #tpu.dot_dimension_numbers<[1], [0], [0], [1], [0, 0, 1, 1], [], []>} : vector<45x45xbf16>, vector<45x2xbf16>, vector<45x2xf32> -> vector<45x2xf32>
    %283 = arith.truncf %282 : vector<45x2xf32> to vector<45x2xbf16>
    %284 = vector.extract_strided_slice %283 {offsets = [0, 0], sizes = [45, 1], strides = [1, 1]} : vector<45x2xbf16> to vector<45x1xbf16>
    %285 = vector.extract_strided_slice %283 {offsets = [0, 1], sizes = [45, 1], strides = [1, 1]} : vector<45x2xbf16> to vector<45x1xbf16>
    %c0_137 = arith.constant 0 : index
    %c0_138 = arith.constant 0 : index
    %c0_139 = arith.constant 0 : index
    %286 = vector.load %arg3[%c0_137, %c0_138, %c0_139] : memref<8x45x45xbf16, #tpu.memory_space<vmem>>, vector<1x45x45xbf16>
    %287 = vector.shape_cast %286 : vector<1x45x45xbf16> to vector<45x45xbf16>
    %cst_140 = arith.constant dense<0.000000e+00> : vector<45x1xf32>
    %288 = tpu.matmul %287, %284, %cst_140 {dimension_numbers = #tpu.dot_dimension_numbers<[1], [0], [0], [1], [0, 0, 1, 1], [], []>} : vector<45x45xbf16>, vector<45x1xbf16>, vector<45x1xf32> -> vector<45x1xf32>
    %c4_141 = arith.constant 4 : index
    %c0_142 = arith.constant 0 : index
    %c0_143 = arith.constant 0 : index
    %289 = vector.load %arg3[%c4_141, %c0_142, %c0_143] : memref<8x45x45xbf16, #tpu.memory_space<vmem>>, vector<1x45x45xbf16>
    %290 = vector.shape_cast %289 : vector<1x45x45xbf16> to vector<45x45xbf16>
    %cst_144 = arith.constant dense<0.000000e+00> : vector<45x1xf32>
    %291 = tpu.matmul %290, %285, %cst_144 {dimension_numbers = #tpu.dot_dimension_numbers<[1], [0], [0], [1], [0, 0, 1, 1], [], []>} : vector<45x45xbf16>, vector<45x1xbf16>, vector<45x1xf32> -> vector<45x1xf32>
    %292 = arith.addf %288, %291 : vector<45x1xf32>
    %293 = vector.extract_strided_slice %0 {offsets = [0, 0], sizes = [45, 1], strides = [1, 1]} : vector<45x4xf32> to vector<45x1xf32>
    %294 = arith.addf %292, %293 : vector<45x1xf32>
    %295 = vector.extract_strided_slice %2 {offsets = [0, 0], sizes = [1, 8], strides = [1, 1]} : vector<4x8xf32> to vector<1x8xf32>
    %296 = vector.broadcast %294 : vector<45x1xf32> to vector<45x8xf32>
    %297 = vector.broadcast %295 : vector<1x8xf32> to vector<45x8xf32>
    %298 = arith.mulf %296, %297 : vector<45x8xf32>
    %c1_145 = arith.constant 1 : index
    %c0_146 = arith.constant 0 : index
    %c0_147 = arith.constant 0 : index
    %299 = vector.load %arg3[%c1_145, %c0_146, %c0_147] : memref<8x45x45xbf16, #tpu.memory_space<vmem>>, vector<1x45x45xbf16>
    %300 = vector.shape_cast %299 : vector<1x45x45xbf16> to vector<45x45xbf16>
    %cst_148 = arith.constant dense<0.000000e+00> : vector<45x1xf32>
    %301 = tpu.matmul %300, %284, %cst_148 {dimension_numbers = #tpu.dot_dimension_numbers<[1], [0], [0], [1], [0, 0, 1, 1], [], []>} : vector<45x45xbf16>, vector<45x1xbf16>, vector<45x1xf32> -> vector<45x1xf32>
    %c5_149 = arith.constant 5 : index
    %c0_150 = arith.constant 0 : index
    %c0_151 = arith.constant 0 : index
    %302 = vector.load %arg3[%c5_149, %c0_150, %c0_151] : memref<8x45x45xbf16, #tpu.memory_space<vmem>>, vector<1x45x45xbf16>
    %303 = vector.shape_cast %302 : vector<1x45x45xbf16> to vector<45x45xbf16>
    %cst_152 = arith.constant dense<0.000000e+00> : vector<45x1xf32>
    %304 = tpu.matmul %303, %285, %cst_152 {dimension_numbers = #tpu.dot_dimension_numbers<[1], [0], [0], [1], [0, 0, 1, 1], [], []>} : vector<45x45xbf16>, vector<45x1xbf16>, vector<45x1xf32> -> vector<45x1xf32>
    %305 = arith.addf %301, %304 : vector<45x1xf32>
    %306 = vector.extract_strided_slice %0 {offsets = [0, 1], sizes = [45, 1], strides = [1, 1]} : vector<45x4xf32> to vector<45x1xf32>
    %307 = arith.addf %305, %306 : vector<45x1xf32>
    %308 = vector.extract_strided_slice %2 {offsets = [1, 0], sizes = [1, 8], strides = [1, 1]} : vector<4x8xf32> to vector<1x8xf32>
    %309 = vector.broadcast %307 : vector<45x1xf32> to vector<45x8xf32>
    %310 = vector.broadcast %308 : vector<1x8xf32> to vector<45x8xf32>
    %311 = arith.mulf %309, %310 : vector<45x8xf32>
    %312 = arith.addf %298, %311 : vector<45x8xf32>
    %c2_153 = arith.constant 2 : index
    %c0_154 = arith.constant 0 : index
    %c0_155 = arith.constant 0 : index
    %313 = vector.load %arg3[%c2_153, %c0_154, %c0_155] : memref<8x45x45xbf16, #tpu.memory_space<vmem>>, vector<1x45x45xbf16>
    %314 = vector.shape_cast %313 : vector<1x45x45xbf16> to vector<45x45xbf16>
    %cst_156 = arith.constant dense<0.000000e+00> : vector<45x1xf32>
    %315 = tpu.matmul %314, %284, %cst_156 {dimension_numbers = #tpu.dot_dimension_numbers<[1], [0], [0], [1], [0, 0, 1, 1], [], []>} : vector<45x45xbf16>, vector<45x1xbf16>, vector<45x1xf32> -> vector<45x1xf32>
    %c6_157 = arith.constant 6 : index
    %c0_158 = arith.constant 0 : index
    %c0_159 = arith.constant 0 : index
    %316 = vector.load %arg3[%c6_157, %c0_158, %c0_159] : memref<8x45x45xbf16, #tpu.memory_space<vmem>>, vector<1x45x45xbf16>
    %317 = vector.shape_cast %316 : vector<1x45x45xbf16> to vector<45x45xbf16>
    %cst_160 = arith.constant dense<0.000000e+00> : vector<45x1xf32>
    %318 = tpu.matmul %317, %285, %cst_160 {dimension_numbers = #tpu.dot_dimension_numbers<[1], [0], [0], [1], [0, 0, 1, 1], [], []>} : vector<45x45xbf16>, vector<45x1xbf16>, vector<45x1xf32> -> vector<45x1xf32>
    %319 = arith.addf %315, %318 : vector<45x1xf32>
    %320 = vector.extract_strided_slice %0 {offsets = [0, 2], sizes = [45, 1], strides = [1, 1]} : vector<45x4xf32> to vector<45x1xf32>
    %321 = arith.addf %319, %320 : vector<45x1xf32>
    %322 = vector.extract_strided_slice %2 {offsets = [2, 0], sizes = [1, 8], strides = [1, 1]} : vector<4x8xf32> to vector<1x8xf32>
    %323 = vector.broadcast %321 : vector<45x1xf32> to vector<45x8xf32>
    %324 = vector.broadcast %322 : vector<1x8xf32> to vector<45x8xf32>
    %325 = arith.mulf %323, %324 : vector<45x8xf32>
    %326 = arith.addf %312, %325 : vector<45x8xf32>
    %c3_161 = arith.constant 3 : index
    %c0_162 = arith.constant 0 : index
    %c0_163 = arith.constant 0 : index
    %327 = vector.load %arg3[%c3_161, %c0_162, %c0_163] : memref<8x45x45xbf16, #tpu.memory_space<vmem>>, vector<1x45x45xbf16>
    %328 = vector.shape_cast %327 : vector<1x45x45xbf16> to vector<45x45xbf16>
    %cst_164 = arith.constant dense<0.000000e+00> : vector<45x1xf32>
    %329 = tpu.matmul %328, %284, %cst_164 {dimension_numbers = #tpu.dot_dimension_numbers<[1], [0], [0], [1], [0, 0, 1, 1], [], []>} : vector<45x45xbf16>, vector<45x1xbf16>, vector<45x1xf32> -> vector<45x1xf32>
    %c7_165 = arith.constant 7 : index
    %c0_166 = arith.constant 0 : index
    %c0_167 = arith.constant 0 : index
    %330 = vector.load %arg3[%c7_165, %c0_166, %c0_167] : memref<8x45x45xbf16, #tpu.memory_space<vmem>>, vector<1x45x45xbf16>
    %331 = vector.shape_cast %330 : vector<1x45x45xbf16> to vector<45x45xbf16>
    %cst_168 = arith.constant dense<0.000000e+00> : vector<45x1xf32>
    %332 = tpu.matmul %331, %285, %cst_168 {dimension_numbers = #tpu.dot_dimension_numbers<[1], [0], [0], [1], [0, 0, 1, 1], [], []>} : vector<45x45xbf16>, vector<45x1xbf16>, vector<45x1xf32> -> vector<45x1xf32>
    %333 = arith.addf %329, %332 : vector<45x1xf32>
    %334 = vector.extract_strided_slice %0 {offsets = [0, 3], sizes = [45, 1], strides = [1, 1]} : vector<45x4xf32> to vector<45x1xf32>
    %335 = arith.addf %333, %334 : vector<45x1xf32>
    %336 = vector.extract_strided_slice %2 {offsets = [3, 0], sizes = [1, 8], strides = [1, 1]} : vector<4x8xf32> to vector<1x8xf32>
    %337 = vector.broadcast %335 : vector<45x1xf32> to vector<45x8xf32>
    %338 = vector.broadcast %336 : vector<1x8xf32> to vector<45x8xf32>
    %339 = arith.mulf %337, %338 : vector<45x8xf32>
    %340 = arith.addf %326, %339 : vector<45x8xf32>
    %341 = arith.truncf %340 : vector<45x8xf32> to vector<45x8xbf16>
    %cst_169 = arith.constant dense<0.000000e+00> : vector<45x8xf32>
    %342 = tpu.matmul %269, %341, %cst_169 {dimension_numbers = #tpu.dot_dimension_numbers<[1], [0], [0], [1], [0, 0, 1, 1], [], []>} : vector<45x45xbf16>, vector<45x8xbf16>, vector<45x8xf32> -> vector<45x8xf32>
    %343 = arith.mulf %342, %1 : vector<45x8xf32>
    %344 = vector.shape_cast %343 : vector<45x8xf32> to vector<1x45x8xf32>
    %cst_170 = arith.constant dense<0.000000e+00> : vector<1xf32>
    %345 = vector.multi_reduction <add>, %344, %cst_170 [1, 2] : vector<1x45x8xf32> to vector<1xf32>
    %346 = vector.shape_cast %345 : vector<1xf32> to vector<1x1x1xf32>
    %347 = vector.extract %346[0, 0, 0] : f32 from vector<1x1x1xf32>
    %348 = vector.broadcast %347 : f32 to vector<1x1xf32>
    %349 = arith.addf %348, %4 : vector<1x1xf32>
    %c3_171 = arith.constant 3 : index
    %c0_172 = arith.constant 0 : index
    %c0_173 = arith.constant 0 : index
    %350 = vector.load %arg5[%c3_171, %c0_172, %c0_173] : memref<4x1x1xf32, #tpu.memory_space<vmem>>, vector<1x1x1xf32>
    %351 = vector.shape_cast %350 : vector<1x1x1xf32> to vector<1x1xf32>
    %352 = vector.shape_cast %349 : vector<1x1xf32> to vector<1x1x1xf32>
    tpu.vector_store %arg5[%c3_171, %c0_172, %c0_173], %352 {strides = array<i32>} : memref<4x1x1xf32, #tpu.memory_space<vmem>>, vector<1x1x1xf32>,
    return
  }
  func.func @transform_0(%arg0: i32) -> (i32, i32, i32) {
    %c0_i32 = arith.constant 0 : i32
    %c0_i32_0 = arith.constant 0 : i32
    %c0_i32_1 = arith.constant 0 : i32
    return %arg0, %c0_i32, %c0_i32_0 : i32, i32, i32
  }
  func.func @transform_1(%arg0: i32) -> (i32, i32, i32) {
    %c0_i32 = arith.constant 0 : i32
    %c0_i32_0 = arith.constant 0 : i32
    %c0_i32_1 = arith.constant 0 : i32
    return %arg0, %c0_i32, %c0_i32_0 : i32, i32, i32
  }
  func.func @transform_2(%arg0: i32) -> (i32, i32, i32) {
    %c0_i32 = arith.constant 0 : i32
    %c0_i32_0 = arith.constant 0 : i32
    %c0_i32_1 = arith.constant 0 : i32
    %c0_i32_2 = arith.constant 0 : i32
    return %c0_i32, %c0_i32_0, %c0_i32_1 : i32, i32, i32
  }
  func.func @transform_3(%arg0: i32) -> (i32, i32) {
    %c0_i32 = arith.constant 0 : i32
    %c0_i32_0 = arith.constant 0 : i32
    %c0_i32_1 = arith.constant 0 : i32
    return %c0_i32, %c0_i32_0 : i32, i32
  }
  func.func @transform_4(%arg0: i32) -> (i32, i32, i32) {
    %c0_i32 = arith.constant 0 : i32
    %c0_i32_0 = arith.constant 0 : i32
    %c0_i32_1 = arith.constant 0 : i32
    return %arg0, %c0_i32, %c0_i32_0 : i32, i32, i32
  }
}

</mosaic_0001>

<bundles_post_ra>
// kernel: critic_forward.1
= control target key start
LH: loop header
LB: loop body
LE: loop exit
PB: predicated region body
PF: predicated region fallthrough
CT: control target
= control target key end

     0   :  { %s6840_s15 = smov 0   ;;  %s8802_s0 = inlined_call_operand.vmem [shape: f32[8,45,2], index: 0, kind: input, shape index: {}]   ;;  %s8803_s1 = inlined_call_operand.vmem [shape: bf16[8,45,45], index: 1, kind: input, shape index: {}]   ;;  %s8804_s2 = inlined_call_operand.vmem [shape: bf16[8,45,45], index: 2, kind: input, shape index: {}]   ;;  %s8805_s3 = inlined_call_operand.vmem [shape: f32[45,24], index: 3, kind: input, shape index: {}]   ;;  %s8806_s4 = inlined_call_operand.vmem [shape: f32[8,1,1], index: 4, kind: output, shape index: {}]  }
   0x1 LB: > { %s5189_s16 = sadd.s32 4294967295, %s6801_s15   ;;  %p5193_p0 = scmp.ge.s32.totalorder %s6801_s15, 1  ;;  %s6801_s15 = sphi %s6840_s15, %s14_s15  }
   0x2   : > { %p176_p1 = scmp.lt.s32.totalorder %s6801_s15, 3 }
   0x4   : > { %p177_p2 = pnand %p5193_p0, %p176_p1 }
   0x6   : > { %180 = sbr.rel (%p177_p2) target bundleno = 3525 (0xdc5), region = 36 }
   0xd   : > { %s5194_s17 = sshll.u32 %s5189_s16, 2  ;;  %v8811_v0 = vmov 1   ;;  %v8807_v1 = vmov 0   ;;  %v8809_v8 = vmov 0.0   ;;  %v279_v9 = vlaneseq  ;;  %v235_v15 = vld [vmem:[%s8805_s3] sm:$0x3] }
   0xe   : > { %6627 = vset.pattern.permute.xlu1 %v8811_v0  ;;  %6626 = vset.pattern.permute.xlu0 %v8807_v1  ;;  %p209_p3 = scmp.lt.s32.totalorder %s5194_s17, 7  ;;  %s6806_s24 = smov 108   ;;  %vm6807_vm0 = vmmov 0   ;;  %vm368_vm1 = vcmask 1045504   ;;  %vm369_vm2 = vcmask 1046528   ;;  %v6808_v51 = vmov 65535  }
   0xf   : > { %5876 = vmatprep.subr.bf16.mxu0 %v8809_v8  ;;  %5894 = vmatprep.subr.bf16.mxu1 %v8809_v8  ;;  %v6874_v10 = vshrl.u32 %v279_v9, 7  ;;  %v370_v52 = vsel %vm368_vm1, 4294967295, %v6808_v51  ;;  %vm358_vm3 = vcmask 367616   ;;  %s6809_s29 = smov 127   ;;  %s6810_s30 = smov 126   ;;  %vm1515_vm4 = vcmask 64512  }
  0x10   : > { %s8863_s17 = smov (!%p209_p3, %s5194_s17), 7  ;;  %5882 = vmatprep.mubr.msk.bf16.mxu0 %vm6807_vm0, %v8809_v8  ;;  %5900 = vmatprep.mubr.msk.bf16.mxu1 %vm6807_vm0, %v8809_v8  ;;  %v6916_v53 = vsel %vm369_vm2, %v370_v52, 0  ;;  %s6811_s11 = smov 125   ;;  %vm1525_vm5 = vcmask 61440   ;;  %vm1543_vm6 = vcmask 0  }
  0x11   : > { %s6596_s18 = smul.u32 48, %s8863_s17  ;;  %v315_v12 = vsub.s32 1, %v6874_v10  ;;  %v281_v13 = vsub.s32 0, %v6874_v10  ;;  %s6812_s14 = smov 116  }
  0x12   : > { %s6597_s25 = smul.u32 24, %s8863_s17  ;;  %s6813_s13 = smov 124  }
  0x13   : > { %s6856_s21 = scalar_lea.vmem %s8802_s0, %s6596_s18  ;;  %v6883_v17 = vrot.slane %v235_v15, %v315_v12  ;;  %v6887_v18 = vrot.slane %v235_v15, %v281_v13  ;;  %s225_s23 = scalar_lea.vmem %s8806_s4, %s8863_s17 }
  0x14   : > { %v237_v2 = vld [vmem:[%s6856_s21] sm:$0xff]  ;;  %v238_v3 = vld [vmem:[%s6856_s21 + $0x8] sm:$0xff]  ;;  %v239_v4 = vld [vmem:[%s6856_s21 + $0x10] sm:$0xff]  ;;  %s6903_s28 = scalar_lea.vmem %s8803_s1, %s6597_s25 }
  0x15   : > { %290 = vperm.xlu1 %6627, %v237_v2   ;;  %251 = vperm.xlu0 %6626, %v237_v2   ;;  %v240_v5 = vld [vmem:[%s6856_s21 + $0x18] sm:$0xff]  ;;  %v241_v6 = vld [vmem:[%s6856_s21 + $0x20] sm:$0xff]  ;;  %v242_v7 = vld [vmem:[%s6856_s21 + $0x28] sm:$0x1f] }
  0x16   : > { %v6663_v56 = vld [vmem:[%s6903_s28] sm:$0xff]   ;;  %v6664_v57 = vld [vmem:[%s6903_s28 + $0x8] sm:$0xff]   ;;  %v6665_v58 = vld [vmem:[%s6903_s28 + $0x10] sm:$0x7f]  }
  0x19   : > { %294 = vperm.xlu1 %6627, %v238_v3   ;;  %6629 = vset.pattern.permute.xlu0 %v8811_v0 }
  0x1a   : > { %298 = vperm.xlu0 %6629, %v239_v4  }
  0x1d   : > { %6628 = vset.pattern.permute.xlu1 %v8807_v1 }
  0x1e   : > { %266 = vperm.xlu1 %6628, %v240_v5   ;;  %6630 = vset.pattern.permute.xlu0 %v8807_v1 }
  0x1f   : > { %256 = vperm.xlu0 %6630, %v238_v3  }
  0x22   : > { %6631 = vset.pattern.permute.xlu1 %v8811_v0 }
  0x23   : > { %302 = vperm.xlu1 %6631, %v240_v5   ;;  %261 = vperm.xlu0 %6630, %v239_v4  }
  0x27   : > { %6632 = vset.pattern.permute.xlu1 %v8807_v1  ;;  %276 = vperm.xlu0 %6630, %v242_v7  }
  0x28   : > { %271 = vperm.xlu1 %6632, %v241_v6  }
  0x2b   : > { %6635 = vset.pattern.permute.xlu0 %v8811_v0 }
  0x2c   : > { %6633 = vset.pattern.permute.xlu1 %v8811_v0 }
  0x2d   : > { %306 = vperm.xlu1 %6633, %v241_v6  }
  0x31   : > { %310 = vperm.xlu1 %6633, %v242_v7   ;;  %v5298_v7 = vld [vmem:[%s6856_s21 + $0x30] sm:$0xff] }
  0x35   : > { %6634 = vset.pattern.permute.xlu1 %v8807_v1 }
  0x94   : > { %v291_v11 = vpop.permute.xlu1 %290  ;;  %v252_v14 = vpop.permute.xlu0 %251 }
  0x95   : > { %v317_v20 = vmul.f32 %v6883_v17, %v291_v11  ;;  %v283_v21 = vmul.f32 %v6887_v18, %v252_v14 }
  0x97   : > { %v323_v26 = vadd.f32 %v317_v20, %v283_v21  ;;  %v5299_v20 = vld [vmem:[%s6856_s21 + $0x38] sm:$0xff]  ;;  %v6666_v21 = vld [vmem:[%s8804_s2] sm:$0xff]  }
  0x98   : > { %v295_v16 = vpop.permute.xlu1 %294 }
  0x99   : > { %v299_v19 = vpop.permute.xlu0 %298  ;;  %v318_v24 = vmul.f32 %v6883_v17, %v295_v16 }
  0x9a   : > { %v319_v27 = vmul.f32 %v6883_v17, %v299_v19 }
  0x9d   : > { %v267_v22 = vpop.permute.xlu1 %266 }
  0x9e   : > { %v257_v23 = vpop.permute.xlu0 %256  ;;  %v286_v31 = vmul.f32 %v6887_v18, %v267_v22  ;;  %v5301_v22 = vld [vmem:[%s6856_s21 + $0x48] sm:$0xff] }
  0x9f   : > { %v284_v25 = vmul.f32 %v6887_v18, %v257_v23  ;;  %v5302_v23 = vld [vmem:[%s6856_s21 + $0x50] sm:$0xff] }
  0xa1   : > { %v324_v28 = vadd.f32 %v318_v24, %v284_v25  ;;  %v6667_v24 = vld [vmem:[%s8804_s2 + $0x8] sm:$0xff]   ;;  %v5300_v25 = vld [vmem:[%s6856_s21 + $0x40] sm:$0xff] }
  0xa2   : > { %v303_v29 = vpop.permute.xlu1 %302  ;;  %v262_v30 = vpop.permute.xlu0 %261 }
  0xa3   : > { %v320_v32 = vmul.f32 %v6883_v17, %v303_v29  ;;  %v285_v33 = vmul.f32 %v6887_v18, %v262_v30  ;;  %v329_v34 = vpack.c.bf16 %v324_v28, %v323_v26  ;;  %v6668_v26 = vld [vmem:[%s8804_s2 + $0x10] sm:$0x7f]   ;;  %v6669_v28 = vld [vmem:[%s8804_s2 + $0x18] sm:$0xff]   ;;  %v6670_v29 = vld [vmem:[%s8804_s2 + $0x20] sm:$0xff]  }
  0xa4   : > { %v6671_v30 = vld [vmem:[%s8804_s2 + $0x28] sm:$0x7f]  }
  0xa5   : > { %v326_v35 = vadd.f32 %v320_v32, %v286_v31  ;;  %v325_v36 = vadd.f32 %v319_v27, %v285_v33  ;;  %350 = vrot.lane.b32.xlu0 %v329_v34, %s6806_s24  ;;  %v5303_v27 = vld [vmem:[%s6856_s21 + $0x58] sm:$0x1f]  ;;  %v6672_v31 = vld [vmem:[%s8804_s2 + $0x30] sm:$0xff]   ;;  %v6682_v33 = vld [vmem:[%s8804_s2 + $0x40] sm:$0x7f]  }
  0xa6   : > { %v277_v40 = vpop.permute.xlu0 %276  ;;  %v6680_v32 = vld [vmem:[%s8804_s2 + $0x38] sm:$0xff]   ;;  %v6684_v34 = vld [vmem:[%s8804_s2 + $0x48] sm:$0xff]  }
  0xa7   : > { %v272_v37 = vpop.permute.xlu1 %271  ;;  %v330_v38 = vpack.c.bf16 %v326_v35, %v325_v36  ;;  %v288_v44 = vmul.f32 %v6887_v18, %v277_v40  ;;  %v6686_v35 = vld [vmem:[%s8804_s2 + $0x50] sm:$0xff]   ;;  %v6688_v36 = vld [vmem:[%s8804_s2 + $0x58] sm:$0x7f]  }
  0xa8   : > { %v287_v43 = vmul.f32 %v6887_v18, %v272_v37 }
  0xa9   : > { %352 = vrot.lane.b32.xlu1 %v330_v38, %s6806_s24 }
  0xac   : > { %v307_v39 = vpop.permute.xlu1 %306 }
  0xad   : > { %v321_v41 = vmul.f32 %v6883_v17, %v307_v39 }
  0xaf   : > { %v327_v46 = vadd.f32 %v321_v41, %v287_v43  ;;  %v6673_v41 = vld [vmem:[%s8804_s2 + $0x60] sm:$0xff]  }
  0xb0   : > { %v311_v42 = vpop.permute.xlu1 %310 }
  0xb1   : > { %v322_v45 = vmul.f32 %v6883_v17, %v311_v42  ;;  %v6674_v42 = vld [vmem:[%s8804_s2 + $0x68] sm:$0xff]  }
  0xb3   : > { %v328_v47 = vadd.f32 %v322_v45, %v288_v44  ;;  %v6675_v45 = vld [vmem:[%s8804_s2 + $0x70] sm:$0x7f]  }
  0xb5   : > { %v331_v48 = vpack.c.bf16 %v328_v47, %v327_v46 }
  0xb7   : > { %354 = vrot.lane.b32.xlu0 %v331_v48, %s6806_s24 }
 0x117   : > { %v351_v49 = vpop.permute.xlu0 %350 }
 0x118   : > { %5877 = vmatpush3.bf16.msra.mxu0 %v351_v49 }
 0x119   : > { %5878 = vmatprep.subr.bf16.mxu0 %v8809_v8 }
 0x11b   : > { %v353_v50 = vpop.permute.xlu1 %352 }
 0x11c   : > { %5879 = vmatpush3.bf16.msra.mxu0 %v353_v50 }
 0x11d   : > { %5880 = vmatprep.subr.bf16.mxu0 %v8809_v8 }
 0x129   : > { %v355_v54 = vpop.permute.xlu0 %354 }
 0x12a   : > { %v373_v55 = vand.u32 %v6916_v53, %v355_v54 }
 0x12c   : > { %5881 = vmatpush3.bf16.msra.mxu0 %v373_v55  ;;  %v6676_v55 = vld [vmem:[%s8804_s2 + $0x78] sm:$0xff]  }
 0x12d   : > { %5912 = vmatprep.subr.bf16.mxu0 %v8809_v8 }
 0x12f   : > { %5883 = vmatmul.mubr.msk.bf16.vlgmr.msra.gmra.mrb[0].mxu0 %vm358_vm3, %v6663_v56 }
 0x130   : > { %5886 = vmatprep.mubr.msk.bf16.mxu0 %vm6807_vm0, %v8809_v8 }
 0x137   : > { %5887 = vmatmul.mubr.msk.bf16.gmra.mrb[4].mxu0 %vm358_vm3, %v6664_v57 }
 0x138   : > { %5890 = vmatprep.mubr.msk.bf16.mxu0 %vm6807_vm0, %v8809_v8 }
 0x13f   : > { %5891 = vmatmul.mubr.msk.bf16.gmra.mrb[8].mxu0 %vm358_vm3, %v6665_v58 }
 0x140   : > { %5918 = vmatprep.mubr.msk.bf16.mxu0 %vm6807_vm0, %v8809_v8 }
 0x202   : > { %v409_v59 = vpop.f32.mrb[0].mxu0 }
 0x203   : > { %v5884_v60 = vpop.f32.mrb[1].mxu0 }
 0x204   : > { %v412_v61 = vpop.f32.mrb[2].mxu0 }
 0x205   : > { %v6932_v62 = vpack.c.bf16 %v412_v61, %v409_v59  ;;  %v5885_v63 = vpop.f32.mrb[3].mxu0 }
 0x207   : > { %466 = vrot.lane.b32.xlu1 %v6932_v62, %s6809_s29  ;;  %5913 = vmatpush3.bf16.msra.mxu0 %v6932_v62 }
 0x208   : > { %5914 = vmatprep.subr.bf16.mxu0 %v8809_v8 }
 0x20a   : > { %v417_v2 = vpop.f32.mrb[4].mxu0 }
 0x20b   : > { %v5888_v3 = vpop.f32.mrb[5].mxu0 }
 0x20c   : > { %v420_v4 = vpop.f32.mrb[6].mxu0 }
 0x20d   : > { %v6938_v5 = vpack.c.bf16 %v420_v4, %v417_v2  ;;  %v5889_v6 = vpop.f32.mrb[7].mxu0 }
 0x20f   : > { %468 = vrot.lane.b32.xlu0 %v6938_v5, %s6809_s29  ;;  %5915 = vmatpush3.bf16.msra.mxu0 %v6938_v5 }
 0x210   : > { %5916 = vmatprep.subr.bf16.mxu0 %v8809_v8 }
 0x212   : > { %v425_v9 = vpop.f32.mrb[8].mxu0 }
 0x213   : > { %v5892_v11 = vpop.f32.mrb[9].mxu0  ;;  %1596 = vperm.xlu0 %6635, %v5298_v7  }
 0x214   : > { %v428_v14 = vpop.f32.mrb[10].mxu0 }
 0x215   : > { %v434_v15 = vpack.c.bf16 %v428_v14, %v425_v9  ;;  %v5893_v16 = vpop.f32.mrb[11].mxu0  ;;  %v6678_v14 = vld [vmem:[%s8804_s2 + $0x88] sm:$0x7f]  }
 0x217   : > { %v6946_v19 = vand.u32 %v434_v15, %v6916_v53  ;;  %470 = vrot.lane.b32.xlu1 %v434_v15, %s6809_s29  ;;  %6636 = vset.pattern.permute.xlu0 %v8807_v1 }
 0x218   : > { %1561 = vperm.xlu0 %6636, %v5298_v7  }
 0x219   : > { %5917 = vmatpush3.bf16.msra.mxu0 %v6946_v19 }
 0x21a   : > { %5948 = vmatprep.subr.bf16.mxu0 %v8809_v8 }
 0x21b   : > { %1566 = vperm.xlu1 %6634, %v5299_v20  }
 0x21c   : > { %5919 = vmatmul.mubr.msk.bf16.vlgmr.msra.gmra.mrb[12].mxu0 %vm358_vm3, %v6666_v21  ;;  %1576 = vperm.xlu0 %6636, %v5301_v22  }
 0x21d   : > { %5949 = vmatpush3.bf16.msra.mxu0 %v6932_v62  ;;  %5922 = vmatprep.mubr.msk.bf16.mxu0 %vm6807_vm0, %v8809_v8 }
 0x21e   : > { %5950 = vmatprep.subr.bf16.mxu0 %v8809_v8 }
 0x21f   : > { %6637 = vset.pattern.permute.xlu1 %v8811_v0 }
 0x220   : > { %1600 = vperm.xlu1 %6637, %v5299_v20   ;;  %1581 = vperm.xlu0 %6636, %v5302_v23  }
 0x221   : > { %5951 = vmatpush3.bf16.msra.mxu0 %v6938_v5 }
 0x222   : > { %5952 = vmatprep.subr.bf16.mxu0 %v8809_v8 }
 0x224   : > { %6638 = vset.pattern.permute.xlu1 %v8807_v1  ;;  %5923 = vmatmul.mubr.msk.bf16.gmra.mrb[16].mxu0 %vm358_vm3, %v6667_v24 }
 0x225   : > { %1571 = vperm.xlu1 %6638, %v5300_v25   ;;  %5953 = vmatpush3.bf16.msra.mxu0 %v6946_v19 }
 0x226   : > { %5926 = vmatprep.mubr.msk.bf16.mxu0 %vm6807_vm0, %v8809_v8  ;;  %5984 = vmatprep.subr.bf16.mxu0 %v8809_v8 }
 0x227   : > { %6641 = vset.pattern.permute.xlu0 %v8811_v0 }
 0x228   : > { %1612 = vperm.xlu0 %6641, %v5302_v23  }
 0x229   : > { %6639 = vset.pattern.permute.xlu1 %v8811_v0 }
 0x22a   : > { %1604 = vperm.xlu1 %6639, %v5300_v25   ;;  %v6679_v25 = vld [vmem:[%s8804_s2 + $0x90] sm:$0xff]  }
 0x22c   : > { %5927 = vmatmul.mubr.msk.bf16.gmra.mrb[20].mxu0 %vm358_vm3, %v6668_v26  ;;  %6643 = vset.pattern.permute.xlu0 %v8807_v1 }
 0x22d   : > { %5954 = vmatprep.mubr.msk.bf16.mxu0 %vm6807_vm0, %v8809_v8 }
 0x22e   : > { %1608 = vperm.xlu1 %6639, %v5301_v22  }
 0x232   : > { %6640 = vset.pattern.permute.xlu1 %v8807_v1 }
 0x233   : > { %1586 = vperm.xlu1 %6640, %v5303_v27  }
 0x234   : > { %5955 = vmatmul.mubr.msk.bf16.vlgmr.msra.gmra.mrb[24].mxu0 %vm358_vm3, %v6669_v28  ;;  %v7152_v28 = vld [vmem:[%s8805_s3 + $0x8] sm:$0xff] }
 0x235   : > { %5985 = vmatpush3.bf16.msra.mxu0 %v6932_v62  ;;  %5958 = vmatprep.mubr.msk.bf16.mxu0 %vm6807_vm0, %v8809_v8 }
 0x236   : > { %5986 = vmatprep.subr.bf16.mxu0 %v8809_v8 }
 0x237   : > { %6642 = vset.pattern.permute.xlu1 %v8811_v0 }
 0x238   : > { %1616 = vperm.xlu1 %6642, %v5303_v27   ;;  %v7146_v27 = vld [vmem:[%s8805_s3 + $0x10] sm:$0xff] }
 0x239   : > { %5987 = vmatpush3.bf16.msra.mxu0 %v6938_v5 }
 0x23a   : > { %5988 = vmatprep.subr.bf16.mxu0 %v8809_v8 }
 0x23c   : > { %5959 = vmatmul.mubr.msk.bf16.gmra.mrb[28].mxu0 %vm358_vm3, %v6670_v29  ;;  %6644 = vset.pattern.permute.xlu1 %v8807_v1  ;;  %v6681_v29 = vld [vmem:[%s8804_s2 + $0x98] sm:$0xff]  }
 0x23d   : > { %5989 = vmatpush3.bf16.msra.mxu0 %v6946_v19  ;;  %5962 = vmatprep.mubr.msk.bf16.mxu0 %vm6807_vm0, %v8809_v8 }
 0x23e   : > { %6020 = vmatprep.subr.bf16.mxu0 %v8809_v8 }
 0x244   : > { %5963 = vmatmul.mubr.msk.bf16.gmra.mrb[32].mxu0 %vm358_vm3, %v6671_v30  ;;  %v7173_v30 = vld [vmem:[%s8805_s3 + $0x20] sm:$0xff] }
 0x245   : > { %5990 = vmatprep.mubr.msk.bf16.mxu0 %vm6807_vm0, %v8809_v8 }
 0x24c   : > { %5991 = vmatmul.mubr.msk.bf16.vlgmr.msra.gmra.mrb[36].mxu0 %vm358_vm3, %v6672_v31  ;;  %v7179_v31 = vld [vmem:[%s8805_s3 + $0x18] sm:$0xff] }
 0x24d   : > { %6021 = vmatpush3.bf16.msra.mxu0 %v6932_v62  ;;  %5994 = vmatprep.mubr.msk.bf16.mxu0 %vm6807_vm0, %v8809_v8  ;;  %v6677_v62 = vld [vmem:[%s8804_s2 + $0x80] sm:$0xff]  }
 0x24e   : > { %6022 = vmatprep.subr.bf16.mxu0 %v8809_v8 }
 0x251   : > { %6023 = vmatpush3.bf16.msra.mxu0 %v6938_v5 }
 0x252   : > { %6024 = vmatprep.subr.bf16.mxu0 %v8809_v8 }
 0x254   : > { %5995 = vmatmul.mubr.msk.bf16.gmra.mrb[40].mxu0 %vm358_vm3, %v6680_v32  ;;  %v6683_v32 = vld [vmem:[%s8804_s2 + $0xa0] sm:$0x7f]  }
 0x255   : > { %6025 = vmatpush3.bf16.msra.mxu0 %v6946_v19  ;;  %5998 = vmatprep.mubr.msk.bf16.mxu0 %vm6807_vm0, %v8809_v8  ;;  %v7128_v19 = vld [vmem:[%s8805_s3] sm:$0xff] }
 0x256   : > { %6056 = vmatprep.subr.bf16.mxu0 %v8809_v8 }
 0x25c   : > { %5999 = vmatmul.mubr.msk.bf16.gmra.mrb[44].mxu0 %vm358_vm3, %v6682_v33  ;;  %v7199_v33 = vld [vmem:[%s8805_s3 + $0x28] sm:$0x1f] }
 0x25d   : > { %6026 = vmatprep.mubr.msk.bf16.mxu0 %vm6807_vm0, %v8809_v8 }
 0x264   : > { %6027 = vmatmul.mubr.msk.bf16.vlgmr.msra.gmra.mrb[48].mxu0 %vm358_vm3, %v6684_v34  ;;  %v6685_v34 = vld [vmem:[%s8804_s2 + $0xa8] sm:$0xff]  }
 0x265   : > { %6030 = vmatprep.mubr.msk.bf16.mxu0 %vm6807_vm0, %v8809_v8 }
 0x26c   : > { %6031 = vmatmul.mubr.msk.bf16.gmra.mrb[52].mxu0 %vm358_vm3, %v6686_v35  ;;  %v6687_v35 = vld [vmem:[%s8804_s2 + $0xb0] sm:$0xff]  }
 0x26d   : > { %6034 = vmatprep.mubr.msk.bf16.mxu0 %vm6807_vm0, %v8809_v8 }
 0x274   : > { %6035 = vmatmul.mubr.msk.bf16.gmra.mrb[56].mxu0 %vm358_vm3, %v6688_v36  ;;  %v6689_v36 = vld [vmem:[%s8804_s2 + $0xb8] sm:$0x7f]  }
 0x275   : > { %6062 = vmatprep.mubr.msk.bf16.mxu0 %vm6807_vm0, %v8809_v8 }
 0x279   : > { %v7055_v37 = vpop.permute.xlu1 %466 }
 0x27a   : > { %5895 = vmatpush3.bf16.msra.mxu1 %v7055_v37 }
 0x27b   : > { %5896 = vmatprep.subr.bf16.mxu1 %v8809_v8 }
 0x281   : > { %v7059_v38 = vpop.permute.xlu0 %468 }
 0x282   : > { %5897 = vmatpush3.bf16.msra.mxu1 %v7059_v38 }
 0x283   : > { %5898 = vmatprep.subr.bf16.mxu1 %v8809_v8 }
 0x289   : > { %v471_v39 = vpop.permute.xlu1 %470 }
 0x28a   : > { %v7064_v40 = vand.u32 %v471_v39, %v6916_v53 }
 0x28c   : > { %5899 = vmatpush3.bf16.msra.mxu1 %v7064_v40 }
 0x28d   : > { %5930 = vmatprep.subr.bf16.mxu1 %v8809_v8 }
 0x28f   : > { %5901 = vmatmul.mubr.msk.bf16.vlgmr.msra.gmra.mrb[0].mxu1 %vm358_vm3, %v6673_v41 }
 0x290   : > { %5931 = vmatpush3.bf16.msra.mxu1 %v7055_v37  ;;  %5904 = vmatprep.mubr.msk.bf16.mxu1 %vm6807_vm0, %v8809_v8 }
 0x291   : > { %5932 = vmatprep.subr.bf16.mxu1 %v8809_v8 }
 0x292   : > { %v1597_v43 = vpop.permute.xlu0 %1596 }
 0x293   : > { %v1619_v47 = vmul.f32 %v1597_v43, %v6883_v17 }
 0x294   : > { %5933 = vmatpush3.bf16.msra.mxu1 %v7059_v38 }
 0x295   : > { %5934 = vmatprep.subr.bf16.mxu1 %v8809_v8 }
 0x297   : > { %5905 = vmatmul.mubr.msk.bf16.gmra.mrb[4].mxu1 %vm358_vm3, %v6674_v42  ;;  %v1562_v46 = vpop.permute.xlu0 %1561 }
 0x298   : > { %5935 = vmatpush3.bf16.msra.mxu1 %v7064_v40  ;;  %5908 = vmatprep.mubr.msk.bf16.mxu1 %vm6807_vm0, %v8809_v8  ;;  %v1589_v48 = vmul.f32 %v1562_v46, %v6887_v18 }
 0x299   : > { %5966 = vmatprep.subr.bf16.mxu1 %v8809_v8 }
 0x29a   : > { %v1567_v44 = vpop.permute.xlu1 %1566  ;;  %v1625_v52 = vadd.f32 %v1619_v47, %v1589_v48 }
 0x29b   : > { %v1590_v49 = vmul.f32 %v1567_v44, %v6887_v18  ;;  %v1577_v58 = vpop.permute.xlu0 %1576 }
 0x29c   : > { %v1592_v2 = vmul.f32 %v1577_v58, %v6887_v18 }
 0x29f   : > { %5909 = vmatmul.mubr.msk.bf16.gmra.mrb[8].mxu1 %vm358_vm3, %v6675_v45  ;;  %v1601_v50 = vpop.permute.xlu1 %1600  ;;  %v1582_v63 = vpop.permute.xlu0 %1581 }
 0x2a0   : > { %v1620_v51 = vmul.f32 %v1601_v50, %v6883_v17  ;;  %5936 = vmatprep.mubr.msk.bf16.mxu1 %vm6807_vm0, %v8809_v8  ;;  %v1593_v15 = vmul.f32 %v1582_v63, %v6887_v18 }
 0x2a2   : > { %v1626_v54 = vadd.f32 %v1620_v51, %v1590_v49 }
 0x2a4   : > { %v1572_v56 = vpop.permute.xlu1 %1571  ;;  %v1631_v57 = vpack.c.bf16 %v1626_v54, %v1625_v52 }
 0x2a5   : > { %v1591_v60 = vmul.f32 %v1572_v56, %v6887_v18 }
 0x2a6   : > { %1652 = vrot.lane.b32.xlu1 %v1631_v57, %s6806_s24 }
 0x2a7   : > { %5937 = vmatmul.mubr.msk.bf16.vlgmr.msra.gmra.mrb[12].mxu1 %vm358_vm3, %v6676_v55  ;;  %v1613_v7 = vpop.permute.xlu0 %1612 }
 0x2a8   : > { %5967 = vmatpush3.bf16.msra.mxu1 %v7055_v37  ;;  %5940 = vmatprep.mubr.msk.bf16.mxu1 %vm6807_vm0, %v8809_v8  ;;  %v1623_v16 = vmul.f32 %v1613_v7, %v6883_v17 }
 0x2a9   : > { %5968 = vmatprep.subr.bf16.mxu1 %v8809_v8  ;;  %v1605_v59 = vpop.permute.xlu1 %1604 }
 0x2aa   : > { %v1621_v61 = vmul.f32 %v1605_v59, %v6883_v17  ;;  %v1629_v22 = vadd.f32 %v1623_v16, %v1593_v15 }
 0x2ac   : > { %5969 = vmatpush3.bf16.msra.mxu1 %v7059_v38  ;;  %v1627_v4 = vadd.f32 %v1621_v61, %v1591_v60 }
 0x2ad   : > { %5970 = vmatprep.subr.bf16.mxu1 %v8809_v8  ;;  %v1609_v3 = vpop.permute.xlu1 %1608 }
 0x2ae   : > { %v1622_v5 = vmul.f32 %v1609_v3, %v6883_v17 }
 0x2af   : > { %5941 = vmatmul.mubr.msk.bf16.gmra.mrb[16].mxu1 %vm358_vm3, %v6677_v62 }
 0x2b0   : > { %5971 = vmatpush3.bf16.msra.mxu1 %v7064_v40  ;;  %v1628_v6 = vadd.f32 %v1622_v5, %v1592_v2  ;;  %5944 = vmatprep.mubr.msk.bf16.mxu1 %vm6807_vm0, %v8809_v8 }
 0x2b1   : > { %6002 = vmatprep.subr.bf16.mxu1 %v8809_v8 }
 0x2b2   : > { %v1587_v9 = vpop.permute.xlu1 %1586  ;;  %v1632_v11 = vpack.c.bf16 %v1628_v6, %v1627_v4 }
 0x2b3   : > { %v1594_v20 = vmul.f32 %v1587_v9, %v6887_v18 }
 0x2b4   : > { %1654 = vrot.lane.b32.xlu0 %v1632_v11, %s6806_s24 }
 0x2b7   : > { %5945 = vmatmul.mubr.msk.bf16.gmra.mrb[20].mxu1 %vm358_vm3, %v6678_v14  ;;  %v1617_v21 = vpop.permute.xlu1 %1616 }
 0x2b8   : > { %v1624_v23 = vmul.f32 %v1617_v21, %v6883_v17  ;;  %5972 = vmatprep.mubr.msk.bf16.mxu1 %vm6807_vm0, %v8809_v8  ;;  %855 = vrot.lane.b32.xlu0 %v7128_v19, %s6809_s29 }
 0x2ba   : > { %v1630_v24 = vadd.f32 %v1624_v23, %v1594_v20 }
 0x2bc   : > { %v1633_v26 = vpack.c.bf16 %v1630_v24, %v1629_v22  ;;  %1101 = vrot.lane.b32.xlu0 %v7128_v19, %s6810_s30  ;;  %v6690_v22 = vld [vmem:[%s6903_s28 + $0x18] sm:$0xff]  }
 0x2be   : > { %1656 = vrot.lane.b32.xlu1 %v1633_v26, %s6806_s24 }
 0x2bf   : > { %5973 = vmatmul.mubr.msk.bf16.vlgmr.msra.gmra.mrb[24].mxu1 %vm358_vm3, %v6679_v25 }
 0x2c0   : > { %6003 = vmatpush3.bf16.msra.mxu1 %v7055_v37  ;;  %5976 = vmatprep.mubr.msk.bf16.mxu1 %vm6807_vm0, %v8809_v8 }
 0x2c1   : > { %6004 = vmatprep.subr.bf16.mxu1 %v8809_v8  ;;  %859 = vrot.lane.b32.xlu0 %v7146_v27, %s6809_s29 }
 0x2c2   : > { %857 = vrot.lane.b32.xlu1 %v7152_v28, %s6809_s29 }
 0x2c4   : > { %6005 = vmatpush3.bf16.msra.mxu1 %v7059_v38 }
 0x2c5   : > { %6006 = vmatprep.subr.bf16.mxu1 %v8809_v8  ;;  %1347 = vrot.lane.b32.xlu0 %v7128_v19, %s6811_s11 }
 0x2c6   : > { %1103 = vrot.lane.b32.xlu1 %v7152_v28, %s6810_s30 }
 0x2c7   : > { %5977 = vmatmul.mubr.msk.bf16.gmra.mrb[28].mxu1 %vm358_vm3, %v6681_v29  ;;  %v6691_v29 = vld [vmem:[%s6903_s28 + $0x20] sm:$0xff]  }
 0x2c8   : > { %6007 = vmatpush3.bf16.msra.mxu1 %v7064_v40  ;;  %5980 = vmatprep.mubr.msk.bf16.mxu1 %vm6807_vm0, %v8809_v8 }
 0x2c9   : > { %863 = vrot.lane.b32.xlu0 %v7173_v30, %s6809_s29  ;;  %6038 = vmatprep.subr.bf16.mxu1 %v8809_v8 }
 0x2ca   : > { %861 = vrot.lane.b32.xlu1 %v7179_v31, %s6809_s29 }
 0x2cd   : > { %1105 = vrot.lane.b32.xlu0 %v7146_v27, %s6810_s30 }
 0x2ce   : > { %1349 = vrot.lane.b32.xlu1 %v7152_v28, %s6811_s11 }
 0x2cf   : > { %5981 = vmatmul.mubr.msk.bf16.gmra.mrb[32].mxu1 %vm358_vm3, %v6683_v32 }
 0x2d0   : > { %6008 = vmatprep.mubr.msk.bf16.mxu1 %vm6807_vm0, %v8809_v8 }
 0x2d1   : > { %1109 = vrot.lane.b32.xlu0 %v7173_v30, %s6810_s30 }
 0x2d2   : > { %865 = vrot.lane.b32.xlu1 %v7199_v33, %s6809_s29 }
 0x2d5   : > { %1351 = vrot.lane.b32.xlu0 %v7146_v27, %s6811_s11 }
 0x2d6   : > { %1107 = vrot.lane.b32.xlu1 %v7179_v31, %s6810_s30 }
 0x2d7   : > { %6009 = vmatmul.mubr.msk.bf16.vlgmr.msra.gmra.mrb[36].mxu1 %vm358_vm3, %v6685_v34 }
 0x2d8   : > { %6012 = vmatprep.mubr.msk.bf16.mxu1 %vm6807_vm0, %v8809_v8 }
 0x2d9   : > { %1355 = vrot.lane.b32.xlu0 %v7173_v30, %s6811_s11 }
 0x2da   : > { %1111 = vrot.lane.b32.xlu1 %v7199_v33, %s6810_s30 }
 0x2de   : > { %1353 = vrot.lane.b32.xlu1 %v7179_v31, %s6811_s11 }
 0x2df   : > { %6013 = vmatmul.mubr.msk.bf16.gmra.mrb[40].mxu1 %vm358_vm3, %v6687_v35 }
 0x2e0   : > { %6016 = vmatprep.mubr.msk.bf16.mxu1 %vm6807_vm0, %v8809_v8 }
 0x2e2   : > { %1357 = vrot.lane.b32.xlu1 %v7199_v33, %s6811_s11 }
 0x2e7   : > { %6017 = vmatmul.mubr.msk.bf16.gmra.mrb[44].mxu1 %vm358_vm3, %v6689_v36 }
 0x2e8   : > { %6044 = vmatprep.mubr.msk.bf16.mxu1 %vm6807_vm0, %v8809_v8 }
 0x2ef   : > { %v7233_v37 = vpop.f32.mrb[12].mxu0 }
 0x2f0   : > { %v5920_v38 = vpop.f32.mrb[13].mxu0 }
 0x2f1   : > { %v7235_v39 = vpop.f32.mrb[14].mxu0  ;;  %v6692_v38 = vld [vmem:[%s6903_s28 + $0x28] sm:$0x7f]  }
 0x2f2   : > { %v5921_v40 = vpop.f32.mrb[15].mxu0 }
 0x2f7   : > { %v7237_v41 = vpop.f32.mrb[16].mxu0 }
 0x2f8   : > { %v5924_v42 = vpop.f32.mrb[17].mxu0 }
 0x2f9   : > { %v7239_v43 = vpop.f32.mrb[18].mxu0 }
 0x2fa   : > { %v5925_v44 = vpop.f32.mrb[19].mxu0 }
 0x2ff   : > { %v7241_v45 = vpop.f32.mrb[20].mxu0 }
 0x300   : > { %v5928_v46 = vpop.f32.mrb[21].mxu0 }
 0x301   : > { %v7243_v47 = vpop.f32.mrb[22].mxu0 }
 0x302   : > { %v5929_v48 = vpop.f32.mrb[23].mxu0 }
 0x307   : > { %v7245_v49 = vpop.f32.mrb[24].mxu0 }
 0x308   : > { %v5956_v50 = vpop.f32.mrb[25].mxu0 }
 0x309   : > { %v7247_v51 = vpop.f32.mrb[26].mxu0 }
 0x30a   : > { %v5957_v52 = vpop.f32.mrb[27].mxu0 }
 0x30f   : > { %v7249_v54 = vpop.f32.mrb[28].mxu0 }
 0x310   : > { %v5960_v55 = vpop.f32.mrb[29].mxu0 }
 0x311   : > { %v7251_v56 = vpop.f32.mrb[30].mxu0 }
 0x312   : > { %v5961_v57 = vpop.f32.mrb[31].mxu0 }
 0x317   : > { %v7253_v58 = vpop.f32.mrb[32].mxu0 }
 0x318   : > { %v1653_v59 = vpop.permute.xlu1 %1652  ;;  %v5964_v60 = vpop.f32.mrb[33].mxu0 }
 0x319   : > { %6057 = vmatpush3.bf16.msra.mxu0 %v1653_v59  ;;  %v7255_v61 = vpop.f32.mrb[34].mxu0 }
 0x31a   : > { %6058 = vmatprep.subr.bf16.mxu0 %v8809_v8  ;;  %v5965_v62 = vpop.f32.mrb[35].mxu0 }
 0x31f   : > { %v7258_v63 = vpop.f32.mrb[36].mxu0 }
 0x320   : > { %v5992_v2 = vpop.f32.mrb[37].mxu0 }
 0x321   : > { %v7260_v3 = vpop.f32.mrb[38].mxu0 }
 0x322   : > { %v5993_v4 = vpop.f32.mrb[39].mxu0 }
 0x326   : > { %v1655_v5 = vpop.permute.xlu0 %1654 }
 0x327   : > { %6059 = vmatpush3.bf16.msra.mxu0 %v1655_v5  ;;  %v7262_v6 = vpop.f32.mrb[40].mxu0 }
 0x328   : > { %6060 = vmatprep.subr.bf16.mxu0 %v8809_v8  ;;  %v5996_v7 = vpop.f32.mrb[41].mxu0 }
 0x329   : > { %v7265_v9 = vpop.f32.mrb[42].mxu0 }
 0x32a   : > { %v5997_v11 = vpop.f32.mrb[43].mxu0 }
 0x32f   : > { %v7267_v14 = vpop.f32.mrb[44].mxu0 }
 0x330   : > { %v1657_v15 = vpop.permute.xlu1 %1656  ;;  %v6000_v16 = vpop.f32.mrb[45].mxu0 }
 0x331   : > { %v1670_v20 = vand.u32 %v1657_v15, %v6916_v53  ;;  %v7270_v21 = vpop.f32.mrb[46].mxu0 }
 0x332   : > { %v6001_v23 = vpop.f32.mrb[47].mxu0 }
 0x333   : > { %6061 = vmatpush3.bf16.msra.mxu0 %v1670_v20 }
 0x334   : > { %6092 = vmatprep.subr.bf16.mxu0 %v8809_v8 }
 0x336   : > { %6063 = vmatmul.mubr.msk.bf16.vlgmr.msra.gmra.mrb[60].mxu0 %vm358_vm3, %v6690_v22 }
 0x337   : > { %6066 = vmatprep.mubr.msk.bf16.mxu0 %vm6807_vm0, %v8809_v8  ;;  %v7277_v24 = vpop.f32.mrb[48].mxu0 }
 0x338   : > { %v6028_v25 = vpop.f32.mrb[49].mxu0 }
 0x339   : > { %v7279_v26 = vpop.f32.mrb[50].mxu0  ;;  %v7308_v25 = vpop.permute.xlu1 %857 }
 0x33a   : > { %v6029_v32 = vpop.f32.mrb[51].mxu0 }
 0x33e   : > { %6067 = vmatmul.mubr.msk.bf16.gmra.mrb[64].mxu0 %vm358_vm3, %v6691_v29 }
 0x33f   : > { %6070 = vmatprep.mubr.msk.bf16.mxu0 %vm6807_vm0, %v8809_v8  ;;  %v7285_v34 = vpop.f32.mrb[52].mxu0 }
 0x340   : > { %v6032_v35 = vpop.f32.mrb[53].mxu0 }
 0x341   : > { %v7287_v36 = vpop.f32.mrb[54].mxu0  ;;  %v7315_v35 = vpop.permute.xlu1 %1103 }
 0x342   : > { %v6033_v40 = vpop.f32.mrb[55].mxu0 }
 0x346   : > { %6071 = vmatmul.mubr.msk.bf16.gmra.mrb[68].mxu0 %vm358_vm3, %v6692_v38 }
 0x347   : > { %v7291_v42 = vpop.f32.mrb[56].mxu0  ;;  %6098 = vmatprep.mubr.msk.bf16.mxu0 %vm6807_vm0, %v8809_v8 }
 0x348   : > { %v6036_v44 = vpop.f32.mrb[57].mxu0 }
 0x349   : > { %v7295_v46 = vpop.f32.mrb[58].mxu0 }
 0x34a   : > { %v6037_v48 = vpop.f32.mrb[59].mxu0 }
 0x362   : > { %v520_v50 = vpop.f32.mrb[0].mxu1 }
 0x363   : > { %v605_v52 = vadd.f32 %v7233_v37, %v520_v50  ;;  %v5902_v55 = vpop.f32.mrb[1].mxu1  ;;  %v7323_v50 = vpop.permute.xlu1 %861 }
 0x364   : > { %v523_v57 = vpop.f32.mrb[2].mxu1 }
 0x365   : > { %v627_v59 = vadd.f32 %v605_v52, %v7128_v19  ;;  %v608_v60 = vadd.f32 %v7235_v39, %v523_v57  ;;  %v5903_v62 = vpop.f32.mrb[3].mxu1  ;;  %v7305_v39 = vpop.permute.xlu0 %855 }
 0x367   : > { %v628_v2 = vadd.f32 %v608_v60, %v7152_v28  ;;  %635 = vperm.xlu0 %6643, %v627_v59  }
 0x369   : > { %640 = vperm.xlu1 %6644, %v628_v2   ;;  %v7330_v2 = vpop.permute.xlu1 %1349 }
 0x36a   : > { %v528_v4 = vpop.f32.mrb[4].mxu1 }
 0x36b   : > { %v613_v5 = vadd.f32 %v7237_v41, %v528_v4  ;;  %v5906_v7 = vpop.f32.mrb[5].mxu1 }
 0x36c   : > { %v531_v11 = vpop.f32.mrb[6].mxu1 }
 0x36d   : > { %v629_v15 = vadd.f32 %v613_v5, %v7146_v27  ;;  %v616_v37 = vadd.f32 %v7239_v43, %v531_v11  ;;  %v5907_v16 = vpop.f32.mrb[7].mxu1 }
 0x36f   : > { %v630_v20 = vadd.f32 %v616_v37, %v7179_v31  ;;  %645 = vperm.xlu1 %6644, %v629_v15   ;;  %v7313_v31 = vpop.permute.xlu0 %1101  ;;  %v7336_v37 = vpop.permute.xlu1 %865 }
 0x371   : > { %650 = vperm.xlu0 %6643, %v630_v20  }
 0x372   : > { %v536_v19 = vpop.f32.mrb[8].mxu1 }
 0x373   : > { %v621_v28 = vadd.f32 %v7241_v45, %v536_v19  ;;  %v5910_v22 = vpop.f32.mrb[9].mxu1 }
 0x374   : > { %v539_v23 = vpop.f32.mrb[10].mxu1 }
 0x375   : > { %v631_v41 = vadd.f32 %v621_v28, %v7173_v30  ;;  %v624_v27 = vadd.f32 %v7243_v47, %v539_v23  ;;  %v5911_v29 = vpop.f32.mrb[11].mxu1  ;;  %v7320_v47 = vpop.permute.xlu0 %859 }
 0x377   : > { %v632_v43 = vadd.f32 %v624_v27, %v7199_v33  ;;  %655 = vperm.xlu1 %6644, %v631_v41  }
 0x379   : > { %660 = vperm.xlu0 %6643, %v632_v43   ;;  %v7326_v59 = vpop.permute.xlu0 %1347 }
 0x37a   : > { %v745_v32 = vpop.f32.mrb[12].mxu1 }
 0x37b   : > { %v827_v45 = vadd.f32 %v7245_v49, %v745_v32  ;;  %v5938_v38 = vpop.f32.mrb[13].mxu1 }
 0x37c   : > { %v748_v40 = vpop.f32.mrb[14].mxu1 }
 0x37d   : > { %v830_v44 = vadd.f32 %v7247_v51, %v748_v40  ;;  %v5939_v48 = vpop.f32.mrb[15].mxu1  ;;  %v873_v30 = vadd.f32 %v7305_v39, %v827_v45  ;;  %v7333_v7 = vpop.permute.xlu0 %863 }
 0x37f   : > { %881 = vperm.xlu1 %6644, %v873_v30   ;;  %v874_v33 = vadd.f32 %v7308_v25, %v830_v44  ;;  %v7348_v44 = vpop.permute.xlu1 %1107 }
 0x381   : > { %886 = vperm.xlu0 %6643, %v874_v33   ;;  %v7345_v32 = vpop.permute.xlu0 %1105 }
 0x382   : > { %v753_v52 = vpop.f32.mrb[16].mxu1 }
 0x383   : > { %v835_v55 = vadd.f32 %v7249_v54, %v753_v52  ;;  %v5942_v57 = vpop.f32.mrb[17].mxu1 }
 0x384   : > { %v756_v49 = vpop.f32.mrb[18].mxu1 }
 0x385   : > { %v838_v51 = vadd.f32 %v7251_v56, %v756_v49  ;;  %v5943_v60 = vpop.f32.mrb[19].mxu1  ;;  %v875_v62 = vadd.f32 %v7320_v47, %v835_v55  ;;  %v7353_v52 = vpop.permute.xlu0 %1109 }
 0x386   : > { %v7356_v49 = vpop.permute.xlu1 %1111 }
 0x387   : > { %891 = vperm.xlu1 %6644, %v875_v62   ;;  %v876_v4 = vadd.f32 %v7323_v50, %v838_v51 }
 0x389   : > { %896 = vperm.xlu0 %6643, %v876_v4  }
 0x38a   : > { %v761_v5 = vpop.f32.mrb[20].mxu1 }
 0x38b   : > { %v843_v54 = vadd.f32 %v7253_v58, %v761_v5  ;;  %v5946_v11 = vpop.f32.mrb[21].mxu1 }
 0x38c   : > { %v764_v15 = vpop.f32.mrb[22].mxu1 }
 0x38d   : > { %v846_v56 = vadd.f32 %v7255_v61, %v764_v15  ;;  %v5947_v16 = vpop.f32.mrb[23].mxu1  ;;  %v877_v20 = vadd.f32 %v7333_v7, %v843_v54 }
 0x38f   : > { %901 = vperm.xlu1 %6644, %v877_v20   ;;  %v878_v19 = vadd.f32 %v7336_v37, %v846_v56  ;;  %v7365_v20 = vpop.permute.xlu0 %1351 }
 0x391   : > { %906 = vperm.xlu0 %6643, %v878_v19  }
 0x392   : > { %v997_v28 = vpop.f32.mrb[24].mxu1 }
 0x393   : > { %v1079_v22 = vadd.f32 %v7258_v63, %v997_v28  ;;  %v5974_v23 = vpop.f32.mrb[25].mxu1 }
 0x394   : > { %v1000_v41 = vpop.f32.mrb[26].mxu1  ;;  %v7368_v23 = vpop.permute.xlu1 %1353 }
 0x395   : > { %v1119_v58 = vadd.f32 %v7313_v31, %v1079_v22  ;;  %v1082_v27 = vadd.f32 %v7260_v3, %v1000_v41  ;;  %v5975_v29 = vpop.f32.mrb[27].mxu1 }
 0x396   : > { %v7373_v29 = vpop.permute.xlu0 %1355 }
 0x397   : > { %v1120_v43 = vadd.f32 %v7315_v35, %v1082_v27  ;;  %1127 = vperm.xlu1 %6644, %v1119_v58  }
 0x399   : > { %1132 = vperm.xlu0 %6643, %v1120_v43  }
 0x39a   : > { %v1005_v61 = vpop.f32.mrb[28].mxu1 }
 0x39b   : > { %v1087_v45 = vadd.f32 %v7262_v6, %v1005_v61  ;;  %v5978_v38 = vpop.f32.mrb[29].mxu1 }
 0x39c   : > { %v1008_v40 = vpop.f32.mrb[30].mxu1 }
 0x39d   : > { %v1090_v63 = vadd.f32 %v7265_v9, %v1008_v40  ;;  %v5979_v48 = vpop.f32.mrb[31].mxu1  ;;  %v1121_v30 = vadd.f32 %v7345_v32, %v1087_v45  ;;  %v7376_v45 = vpop.permute.xlu1 %1357 }
 0x39e   : > { %8821 = vst [vmem:[#allocation2_spill] sm:$0xff] %v7376_v45 }
 0x39f   : > { %1137 = vperm.xlu1 %6644, %v1121_v30   ;;  %v1122_v3 = vadd.f32 %v7348_v44, %v1090_v63 }
 0x3a1   : > { %1142 = vperm.xlu0 %6643, %v1122_v3  }
 0x3a2   : > { %v1013_v33 = vpop.f32.mrb[32].mxu1 }
 0x3a3   : > { %v1095_v55 = vadd.f32 %v7267_v14, %v1013_v33  ;;  %v5982_v57 = vpop.f32.mrb[33].mxu1 }
 0x3a4   : > { %v1016_v6 = vpop.f32.mrb[34].mxu1 }
 0x3a5   : > { %v1098_v51 = vadd.f32 %v7270_v21, %v1016_v6  ;;  %v5983_v60 = vpop.f32.mrb[35].mxu1  ;;  %v1123_v9 = vadd.f32 %v7353_v52, %v1095_v55 }
 0x3a7   : > { %1147 = vperm.xlu1 %6644, %v1123_v9   ;;  %v1124_v62 = vadd.f32 %v7356_v49, %v1098_v51 }
 0x3a9   : > { %1152 = vperm.xlu0 %6643, %v1124_v62  }
 0x3aa   : > { %v1243_v4 = vpop.f32.mrb[36].mxu1 }
 0x3ab   : > { %v1325_v5 = vadd.f32 %v7277_v24, %v1243_v4  ;;  %v6010_v54 = vpop.f32.mrb[37].mxu1 }
 0x3ac   : > { %v1246_v11 = vpop.f32.mrb[38].mxu1 }
 0x3ad   : > { %v1365_v14 = vadd.f32 %v7326_v59, %v1325_v5  ;;  %v1328_v15 = vadd.f32 %v7279_v26, %v1246_v11  ;;  %v6011_v56 = vpop.f32.mrb[39].mxu1 }
 0x3af   : > { %v1366_v16 = vadd.f32 %v7330_v2, %v1328_v15  ;;  %1373 = vperm.xlu1 %6644, %v1365_v14  }
 0x3b1   : > { %1378 = vperm.xlu0 %6643, %v1366_v16  }
 0x3b2   : > { %v1251_v21 = vpop.f32.mrb[40].mxu1 }
 0x3b3   : > { %v1333_v19 = vadd.f32 %v7285_v34, %v1251_v21  ;;  %v6014_v28 = vpop.f32.mrb[41].mxu1 }
 0x3b4   : > { %v1254_v22 = vpop.f32.mrb[42].mxu1 }
 0x3b5   : > { %v1336_v24 = vadd.f32 %v7287_v36, %v1254_v22  ;;  %v6015_v41 = vpop.f32.mrb[43].mxu1  ;;  %v1367_v58 = vadd.f32 %v7365_v20, %v1333_v19 }
 0x3b7   : > { %1383 = vperm.xlu1 %6644, %v1367_v58   ;;  %v1368_v26 = vadd.f32 %v7368_v23, %v1336_v24  ;;  %v6693_v58 = vld [vmem:[%s8804_s2] sm:$0xff]  }
 0x3b9   : > { %1388 = vperm.xlu0 %6643, %v1368_v26  }
 0x3ba   : > { %v1259_v27 = vpop.f32.mrb[44].mxu1 }
 0x3bb   : > { %v1341_v43 = vadd.f32 %v7291_v42, %v1259_v27  ;;  %v6018_v61 = vpop.f32.mrb[45].mxu1 }
 0x3bc   : > { %v1262_v34 = vpop.f32.mrb[46].mxu1  ;;  %v1157_v61 = vsub.s32 2, %v6874_v10 }
 0x3bd   : > { %v1344_v38 = vadd.f32 %v7295_v46, %v1262_v34  ;;  %v6019_v40 = vpop.f32.mrb[47].mxu1  ;;  %v1369_v36 = vadd.f32 %v7373_v29, %v1341_v43  ;;  %v234_v34 = vld [vmem:[%s8805_s3] sm:$0xf] }
 0x3be   : > { %v7423_v40 = vrot.slane %v234_v34, %v315_v12 }
 0x3bf   : > { %1393 = vperm.xlu1 %6644, %v1369_v36   ;;  %v1370_v63 = vadd.f32 %v7376_v45, %v1344_v38  ;;  %v6694_v36 = vld [vmem:[%s8804_s2 + $0x8] sm:$0xff]  }
 0x3c1   : > { %1398 = vperm.xlu0 %6643, %v1370_v63   ;;  %v1403_v63 = vsub.s32 3, %v6874_v10 }
 0x3e6   : > { %v636_v55 = vpop.permute.xlu0 %635 }
 0x3e8   : > { %v641_v30 = vpop.permute.xlu1 %640 }
 0x3ee   : > { %v7383_v6 = vpop.permute.xlu1 %645 }
 0x3f0   : > { %v7387_v46 = vpop.permute.xlu0 %650 }
 0x3f6   : > { %v7389_v60 = vpop.permute.xlu1 %655 }
 0x3f8   : > { %v7391_v4 = vpop.permute.xlu0 %660 }
 0x3fe   : > { %v882_v11 = vpop.permute.xlu1 %881 }
 0x3ff   : > { %v913_v12 = vmul.f32 %v7423_v40, %v882_v11 }
 0x400   : > { %v887_v14 = vpop.permute.xlu0 %886 }
 0x406   : > { %v892_v56 = vpop.permute.xlu1 %891 }
 0x408   : > { %v897_v19 = vpop.permute.xlu0 %896 }
 0x409   : > { %v1706_v48 = vpop.f32.mrb[60].mxu0 }
 0x40a   : > { %v6064_v3 = vpop.f32.mrb[61].mxu0 }
 0x40b   : > { %v1709_v33 = vpop.f32.mrb[62].mxu0  ;;  %v7432_v3 = vrot.slane %v234_v34, %v281_v13 }
 0x40c   : > { %v7381_v57 = vpack.c.bf16 %v1709_v33, %v1706_v48  ;;  %v6065_v42 = vpop.f32.mrb[63].mxu0  ;;  %v7434_v33 = vrot.slane %v234_v34, %v1157_v61 }
 0x40d   : > { %8822 = vst [vmem:[#allocation3_spill] sm:$0xff] %v7432_v3  ;;  %v667_v10 = vmul.f32 %v7432_v3, %v636_v55  ;;  %v668_v13 = vmul.f32 %v7432_v3, %v641_v30 }
 0x40e   : > { %6093 = vmatpush3.bf16.msra.mxu0 %v7381_v57  ;;  %v7399_v24 = vpop.permute.xlu1 %901  ;;  %8823 = vst [vmem:[#allocation4_spill] sm:$0xff] %v7434_v33 }
 0x40f   : > { %6094 = vmatprep.subr.bf16.mxu0 %v8809_v8 }
 0x410   : > { %v7408_v26 = vpop.permute.xlu0 %906 }
 0x411   : > { %v1714_v51 = vpop.f32.mrb[64].mxu0 }
 0x412   : > { %v6068_v9 = vpop.f32.mrb[65].mxu0 }
 0x413   : > { %v1717_v62 = vpop.f32.mrb[66].mxu0  ;;  %v7440_v9 = vrot.slane %v234_v34, %v1403_v63  ;;  %v669_v63 = vmul.f32 %v7432_v3, %v7383_v6  ;;  %v6696_v6 = vld [vmem:[%s8804_s2 + $0x18] sm:$0xff]  }
 0x414   : > { %v7393_v5 = vpack.c.bf16 %v1717_v62, %v1714_v51  ;;  %v6069_v54 = vpop.f32.mrb[67].mxu0  ;;  %v914_v51 = vmul.f32 %v7423_v40, %v887_v14 }
 0x415   : > { %8824 = vst [vmem:[#allocation5_spill] sm:$0xff] %v7440_v9 }
 0x416   : > { %6095 = vmatpush3.bf16.msra.mxu0 %v7393_v5  ;;  %v1128_v27 = vpop.permute.xlu1 %1127 }
 0x417   : > { %6096 = vmatprep.subr.bf16.mxu0 %v8809_v8  ;;  %v1159_v54 = vmul.f32 %v7434_v33, %v1128_v27  ;;  %v915_v27 = vmul.f32 %v7423_v40, %v892_v56 }
 0x418   : > { %v1133_v43 = vpop.permute.xlu0 %1132 }
 0x419   : > { %v1722_v15 = vpop.f32.mrb[68].mxu0  ;;  %v1160_v11 = vmul.f32 %v7434_v33, %v1133_v43  ;;  %v916_v43 = vmul.f32 %v7423_v40, %v897_v19  ;;  %v921_v19 = vadd.f32 %v915_v27, %v669_v63 }
 0x41a   : > { %v6072_v16 = vpop.f32.mrb[69].mxu0 }
 0x41b   : > { %v1725_v21 = vpop.f32.mrb[70].mxu0  ;;  %v920_v16 = vadd.f32 %v914_v51, %v668_v13 }
 0x41c   : > { %v7397_v28 = vpack.c.bf16 %v1725_v21, %v1722_v15  ;;  %v6073_v22 = vpop.f32.mrb[71].mxu0  ;;  %v919_v15 = vadd.f32 %v913_v12, %v667_v10  ;;  %v670_v12 = vmul.f32 %v7432_v3, %v7387_v46 }
 0x41d   : > { %v6695_v22 = vld [vmem:[%s8804_s2 + $0x10] sm:$0x7f]   ;;  %v1166_v55 = vadd.f32 %v1160_v11, %v920_v16  ;;  %v918_v16 = vmul.f32 %v7423_v40, %v7408_v26 }
 0x41e   : > { %v7403_v41 = vand.u32 %v7397_v28, %v6916_v53  ;;  %v1138_v38 = vpop.permute.xlu1 %1137  ;;  %v1165_v61 = vadd.f32 %v1159_v54, %v919_v15  ;;  %v922_v54 = vadd.f32 %v916_v43, %v670_v12 }
 0x41f   : > { %v1161_v51 = vmul.f32 %v7434_v33, %v1138_v38 }
 0x420   : > { %6097 = vmatpush3.bf16.msra.mxu0 %v7403_v41  ;;  %v1143_v48 = vpop.permute.xlu0 %1142 }
 0x421   : > { %6128 = vmatprep.subr.bf16.mxu0 %v8809_v8  ;;  %v1162_v10 = vmul.f32 %v7434_v33, %v1143_v48  ;;  %v1167_v15 = vadd.f32 %v1161_v51, %v921_v19  ;;  %v917_v48 = vmul.f32 %v7423_v40, %v7399_v24  ;;  %v5414_v19 = vld [vmem:[%s6856_s21 + $0x80] sm:$0xff] }
 0x423   : > { %6099 = vmatmul.mubr.msk.bf16.vlgmr.msra.gmra.mrb[72].mxu0 %vm358_vm3, %v6693_v58  ;;  %v1168_v46 = vadd.f32 %v1162_v10, %v922_v54  ;;  %v5411_v10 = vld [vmem:[%s6856_s21 + $0x68] sm:$0xff]  ;;  %v5412_v54 = vld [vmem:[%s6856_s21 + $0x70] sm:$0xff] }
 0x424   : > { %6102 = vmatprep.mubr.msk.bf16.mxu0 %vm6807_vm0, %v8809_v8  ;;  %6129 = vmatpush3.bf16.msra.mxu0 %v7381_v57 }
 0x425   : > { %6130 = vmatprep.subr.bf16.mxu0 %v8809_v8 }
 0x426   : > { %v1148_v42 = vpop.permute.xlu1 %1147 }
 0x427   : > { %v1163_v24 = vmul.f32 %v7434_v33, %v1148_v42 }
 0x428   : > { %6131 = vmatpush3.bf16.msra.mxu0 %v7393_v5  ;;  %v1153_v62 = vpop.permute.xlu0 %1152 }
 0x429   : > { %6132 = vmatprep.subr.bf16.mxu0 %v8809_v8 }
 0x42b   : > { %6103 = vmatmul.mubr.msk.bf16.gmra.mrb[76].mxu0 %vm358_vm3, %v6694_v36 }
 0x42c   : > { %6106 = vmatprep.mubr.msk.bf16.mxu0 %vm6807_vm0, %v8809_v8  ;;  %6133 = vmatpush3.bf16.msra.mxu0 %v7403_v41 }
 0x42d   : > { %6164 = vmatprep.subr.bf16.mxu0 %v8809_v8 }
 0x42e   : > { %v1374_v14 = vpop.permute.xlu1 %1373 }
 0x42f   : > { %v1405_v21 = vmul.f32 %v7440_v9, %v1374_v14 }
 0x430   : > { %v1379_v58 = vpop.permute.xlu0 %1378 }
 0x431   : > { %v1406_v30 = vmul.f32 %v7440_v9, %v1379_v58  ;;  %v1411_v34 = vadd.f32 %v1405_v21, %v1165_v61  ;;  %v671_v58 = vmul.f32 %v7432_v3, %v7389_v60  ;;  %v672_v61 = vmul.f32 %v7432_v3, %v7391_v4 }
 0x433   : > { %v1412_v36 = vadd.f32 %v1406_v30, %v1166_v55  ;;  %6107 = vmatmul.mubr.msk.bf16.gmra.mrb[80].mxu0 %vm358_vm3, %v6695_v22  ;;  %v1164_v55 = vmul.f32 %v7434_v33, %v1153_v62  ;;  %v923_v27 = vadd.f32 %v917_v48, %v671_v58  ;;  %v924_v43 = vadd.f32 %v918_v16, %v672_v61 }
 0x434   : > { %6134 = vmatprep.mubr.msk.bf16.mxu0 %vm6807_vm0, %v8809_v8 }
 0x435   : > { %v1417_v56 = vpack.c.bf16 %v1412_v36, %v1411_v34  ;;  %v6697_v34 = vld [vmem:[%s8804_s2 + $0x20] sm:$0xff]   ;;  %v1169_v4 = vadd.f32 %v1163_v24, %v923_v27  ;;  %v1170_v42 = vadd.f32 %v1164_v55, %v924_v43  ;;  %v6772_v55 = vld [vmem:[%s6903_s28 + $0x8] sm:$0xff]   ;;  %v6773_v43 = vld [vmem:[%s6903_s28 + $0x10] sm:$0x7f]  }
 0x436   : > { %v1384_v13 = vpop.permute.xlu1 %1383 }
 0x437   : > { %v1407_v11 = vmul.f32 %v7440_v9, %v1384_v13  ;;  %1423 = vrot.lane.b32.xlu1 %v1417_v56, %s6812_s14  ;;  %v6698_v56 = vld [vmem:[%s8804_s2 + $0x28] sm:$0x7f]   ;;  %v5410_v13 = vld [vmem:[%s6856_s21 + $0x60] sm:$0xff] }
 0x438   : > { %v1389_v14 = vpop.permute.xlu0 %1388 }
 0x439   : > { %v1408_v38 = vmul.f32 %v7440_v9, %v1389_v14  ;;  %v1413_v21 = vadd.f32 %v1407_v11, %v1167_v15  ;;  %v5413_v11 = vld [vmem:[%s6856_s21 + $0x78] sm:$0xff]  ;;  %v6713_v14 = vld [vmem:[%s8804_s2 + $0x50] sm:$0xff]  }
 0x43b   : > { %v1414_v22 = vadd.f32 %v1408_v38, %v1168_v46  ;;  %6135 = vmatmul.mubr.msk.bf16.vlgmr.msra.gmra.mrb[84].mxu0 %vm358_vm3, %v6696_v6  ;;  %v6711_v6 = vld [vmem:[%s8804_s2 + $0x48] sm:$0xff]   ;;  %v6715_v46 = vld [vmem:[%s8804_s2 + $0x58] sm:$0x7f]  }
 0x43c   : > { %6138 = vmatprep.mubr.msk.bf16.mxu0 %vm6807_vm0, %v8809_v8  ;;  %6165 = vmatpush3.bf16.msra.mxu0 %v7381_v57 }
 0x43d   : > { %v1418_v26 = vpack.c.bf16 %v1414_v22, %v1413_v21  ;;  %6166 = vmatprep.subr.bf16.mxu0 %v8809_v8  ;;  %v6771_v22 = vld [vmem:[%s6903_s28] sm:$0xff]  }
 0x43e   : > { %v1394_v30 = vpop.permute.xlu1 %1393 }
 0x43f   : > { %v1409_v60 = vmul.f32 %v7440_v9, %v1394_v30  ;;  %1425 = vrot.lane.b32.xlu0 %v1418_v26, %s6812_s14 }
 0x440   : > { %v1399_v36 = vpop.permute.xlu0 %1398  ;;  %6167 = vmatpush3.bf16.msra.mxu0 %v7393_v5 }
 0x441   : > { %v1410_v62 = vmul.f32 %v7440_v9, %v1399_v36  ;;  %6168 = vmatprep.subr.bf16.mxu0 %v8809_v8  ;;  %v1415_v63 = vadd.f32 %v1409_v60, %v1169_v4 }
 0x443   : > { %v1416_v12 = vadd.f32 %v1410_v62, %v1170_v42  ;;  %1762 = vrot.lane.b32.xlu0 %v7381_v57, %s6809_s29  ;;  %6139 = vmatmul.mubr.msk.bf16.gmra.mrb[88].mxu0 %vm358_vm3, %v6697_v34  ;;  %v6700_v34 = vld [vmem:[%s8804_s2 + $0x60] sm:$0xff]  }
 0x444   : > { %6142 = vmatprep.mubr.msk.bf16.mxu0 %vm6807_vm0, %v8809_v8  ;;  %6169 = vmatpush3.bf16.msra.mxu0 %v7403_v41 }
 0x445   : > { %v1419_v51 = vpack.c.bf16 %v1416_v12, %v1415_v63  ;;  %6200 = vmatprep.subr.bf16.mxu0 %v8809_v8 }
 0x447   : > { %1427 = vrot.lane.b32.xlu1 %v1419_v51, %s6812_s14  ;;  %1766 = vrot.lane.b32.xlu0 %v7397_v28, %s6809_s29  ;;  %v6699_v28 = vld [vmem:[%s8804_s2 + $0x30] sm:$0xff]  }
 0x44b   : > { %1764 = vrot.lane.b32.xlu1 %v7393_v5, %s6809_s29  ;;  %2760 = vperm.xlu0 %6643, %v5411_v10  }
 0x44c   : > { %6143 = vmatmul.mubr.msk.bf16.gmra.mrb[92].mxu0 %vm358_vm3, %v6698_v56 }
 0x44d   : > { %6170 = vmatprep.mubr.msk.bf16.mxu0 %vm6807_vm0, %v8809_v8 }
 0x44f   : > { %2755 = vperm.xlu1 %6644, %v5410_v13   ;;  %2775 = vperm.xlu0 %6643, %v5414_v19  }
 0x453   : > { %6645 = vset.pattern.permute.xlu1 %v8811_v0  ;;  %6648 = vset.pattern.permute.xlu0 %v8811_v0 }
 0x454   : > { %6171 = vmatmul.mubr.msk.bf16.vlgmr.msra.gmra.mrb[96].mxu0 %vm358_vm3, %v6699_v28  ;;  %2790 = vperm.xlu1 %6645, %v5410_v13   ;;  %v6701_v13 = vld [vmem:[%s8804_s2 + $0x68] sm:$0xff]  }
 0x455   : > { %6201 = vmatpush3.bf16.msra.mxu0 %v7381_v57  ;;  %2794 = vperm.xlu0 %6648, %v5411_v10   ;;  %v5415_v57 = vld [vmem:[%s6856_s21 + $0x88] sm:$0x1f] }
 0x456   : > { %6202 = vmatprep.subr.bf16.mxu0 %v8809_v8  ;;  %6174 = vmatprep.mubr.msk.bf16.mxu0 %vm6807_vm0, %v8809_v8 }
 0x458   : > { %6646 = vset.pattern.permute.xlu1 %v8807_v1 }
 0x459   : > { %6203 = vmatpush3.bf16.msra.mxu0 %v7393_v5  ;;  %2765 = vperm.xlu1 %6646, %v5412_v54   ;;  %v6707_v5 = vld [vmem:[%s8804_s2 + $0x38] sm:$0xff]  }
 0x45a   : > { %6204 = vmatprep.subr.bf16.mxu0 %v8809_v8  ;;  %2798 = vperm.xlu0 %6648, %v5412_v54  }
 0x45c   : > { %6175 = vmatmul.mubr.msk.bf16.gmra.mrb[100].mxu0 %vm358_vm3, %v6707_v5 }
 0x45d   : > { %2770 = vperm.xlu1 %6646, %v5413_v11   ;;  %6205 = vmatpush3.bf16.msra.mxu0 %v7403_v41  ;;  %v6709_v41 = vld [vmem:[%s8804_s2 + $0x40] sm:$0x7f]  }
 0x45e   : > { %2810 = vperm.xlu0 %6648, %v5415_v57   ;;  %6236 = vmatprep.subr.bf16.mxu0 %v8809_v8 }
 0x45f   : > { %6178 = vmatprep.mubr.msk.bf16.mxu0 %vm6807_vm0, %v8809_v8 }
 0x461   : > { %6647 = vset.pattern.permute.xlu1 %v8811_v0 }
 0x462   : > { %2802 = vperm.xlu1 %6647, %v5413_v11   ;;  %6652 = vset.pattern.permute.xlu0 %v8807_v1 }
 0x464   : > { %6179 = vmatmul.mubr.msk.bf16.gmra.mrb[104].mxu0 %vm358_vm3, %v6709_v41 }
 0x465   : > { %6206 = vmatprep.mubr.msk.bf16.mxu0 %vm6807_vm0, %v8809_v8 }
 0x466   : > { %6649 = vset.pattern.permute.xlu1 %v8807_v1 }
 0x467   : > { %2780 = vperm.xlu1 %6649, %v5415_v57  }
 0x46b   : > { %6650 = vset.pattern.permute.xlu1 %v8811_v0 }
 0x46c   : > { %2806 = vperm.xlu1 %6650, %v5414_v19   ;;  %6207 = vmatmul.mubr.msk.bf16.vlgmr.msra.gmra.mrb[108].mxu0 %vm358_vm3, %v6711_v6 }
 0x46d   : > { %6210 = vmatprep.mubr.msk.bf16.mxu0 %vm6807_vm0, %v8809_v8 }
 0x470   : > { %6651 = vset.pattern.permute.xlu1 %v8807_v1 }
 0x474   : > { %6211 = vmatmul.mubr.msk.bf16.gmra.mrb[112].mxu0 %vm358_vm3, %v6713_v14  ;;  %v6702_v14 = vld [vmem:[%s8804_s2 + $0x70] sm:$0x7f]  }
 0x475   : > { %6214 = vmatprep.mubr.msk.bf16.mxu0 %vm6807_vm0, %v8809_v8 }
 0x47c   : > { %6215 = vmatmul.mubr.msk.bf16.gmra.mrb[116].mxu0 %vm358_vm3, %v6715_v46 }
 0x47d   : > { %6242 = vmatprep.mubr.msk.bf16.mxu0 %vm6807_vm0, %v8809_v8 }
 0x4a9   : > { %v1424_v15 = vpop.permute.xlu1 %1423 }
 0x4aa   : > { %6039 = vmatpush3.bf16.msra.mxu1 %v1424_v15 }
 0x4ab   : > { %6040 = vmatprep.subr.bf16.mxu1 %v8809_v8 }
 0x4b1   : > { %v1426_v38 = vpop.permute.xlu0 %1425 }
 0x4b2   : > { %6041 = vmatpush3.bf16.msra.mxu1 %v1426_v38 }
 0x4b3   : > { %6042 = vmatprep.subr.bf16.mxu1 %v8809_v8 }
 0x4b5   : > { %v7573_v21 = vpop.permute.xlu0 %1762 }
 0x4b9   : > { %v1428_v48 = vpop.permute.xlu1 %1427  ;;  %v1767_v61 = vpop.permute.xlu0 %1766 }
 0x4ba   : > { %v1432_v16 = vand.u32 %v1428_v48, %v6916_v53  ;;  %v7584_v24 = vand.u32 %v1767_v61, %v6916_v53 }
 0x4bc   : > { %6043 = vmatpush3.bf16.msra.mxu1 %v1432_v16 }
 0x4bd   : > { %6074 = vmatprep.subr.bf16.mxu1 %v8809_v8  ;;  %v7581_v58 = vpop.permute.xlu1 %1764 }
 0x4bf   : > { %6045 = vmatmul.mubr.msk.bf16.vlgmr.msra.gmra.mrb[48].mxu1 %vm358_vm3, %v6771_v22 }
 0x4c0   : > { %6075 = vmatpush3.bf16.msra.mxu1 %v7573_v21  ;;  %6048 = vmatprep.mubr.msk.bf16.mxu1 %vm6807_vm0, %v8809_v8 }
 0x4c1   : > { %6076 = vmatprep.subr.bf16.mxu1 %v8809_v8 }
 0x4c4   : > { %6077 = vmatpush3.bf16.msra.mxu1 %v7581_v58 }
 0x4c5   : > { %6078 = vmatprep.subr.bf16.mxu1 %v8809_v8 }
 0x4c7   : > { %6049 = vmatmul.mubr.msk.bf16.gmra.mrb[52].mxu1 %vm358_vm3, %v6772_v55  ;;  %v6703_v55 = vld [vmem:[%s8804_s2 + $0x78] sm:$0xff]  }
 0x4c8   : > { %6052 = vmatprep.mubr.msk.bf16.mxu1 %vm6807_vm0, %v8809_v8  ;;  %6079 = vmatpush3.bf16.msra.mxu1 %v7584_v24 }
 0x4c9   : > { %6110 = vmatprep.subr.bf16.mxu1 %v8809_v8 }
 0x4ca   : > { %v2761_v26 = vpop.permute.xlu0 %2760 }
 0x4cb   : > { %v2784_v62 = vmul.f32 %v2761_v26, %v6887_v18 }
 0x4ce   : > { %v2756_v30 = vpop.permute.xlu1 %2755  ;;  %v2776_v27 = vpop.permute.xlu0 %2775 }
 0x4cf   : > { %6053 = vmatmul.mubr.msk.bf16.gmra.mrb[56].mxu1 %vm358_vm3, %v6773_v43  ;;  %v2783_v36 = vmul.f32 %v2756_v30, %v6887_v18  ;;  %v2787_v26 = vmul.f32 %v2776_v27, %v6887_v18  ;;  %v6704_v27 = vld [vmem:[%s8804_s2 + $0x80] sm:$0xff]  }
 0x4d0   : > { %6080 = vmatprep.mubr.msk.bf16.mxu1 %vm6807_vm0, %v8809_v8 }
 0x4d3   : > { %v2791_v60 = vpop.permute.xlu1 %2790 }
 0x4d4   : > { %v2813_v4 = vmul.f32 %v2791_v60, %v6883_v17  ;;  %v2795_v42 = vpop.permute.xlu0 %2794 }
 0x4d5   : > { %v2814_v63 = vmul.f32 %v2795_v42, %v6883_v17  ;;  %v6708_v42 = vld [vmem:[%s8804_s2 + $0x98] sm:$0xff]  }
 0x4d6   : > { %v2819_v12 = vadd.f32 %v2813_v4, %v2783_v36  ;;  %v6705_v36 = vld [vmem:[%s8804_s2 + $0x88] sm:$0x7f]   ;;  %v6706_v4 = vld [vmem:[%s8804_s2 + $0x90] sm:$0xff]  }
 0x4d7   : > { %v2820_v51 = vadd.f32 %v2814_v63, %v2784_v62  ;;  %6081 = vmatmul.mubr.msk.bf16.vlgmr.msra.gmra.mrb[60].mxu1 %vm358_vm3, %v6700_v34 }
 0x4d8   : > { %6111 = vmatpush3.bf16.msra.mxu1 %v7573_v21  ;;  %v2766_v10 = vpop.permute.xlu1 %2765  ;;  %6084 = vmatprep.mubr.msk.bf16.mxu1 %vm6807_vm0, %v8809_v8 }
 0x4d9   : > { %v2825_v56 = vpack.c.bf16 %v2820_v51, %v2819_v12  ;;  %6112 = vmatprep.subr.bf16.mxu1 %v8809_v8  ;;  %v2799_v28 = vpop.permute.xlu0 %2798  ;;  %v2785_v54 = vmul.f32 %v2766_v10, %v6887_v18  ;;  %v6716_v10 = vld [vmem:[%s8804_s2 + $0xb8] sm:$0x7f]  }
 0x4da   : > { %v2815_v11 = vmul.f32 %v2799_v28, %v6883_v17 }
 0x4db   : > { %2846 = vrot.lane.b32.xlu1 %v2825_v56, %s6806_s24 }
 0x4dc   : > { %6113 = vmatpush3.bf16.msra.mxu1 %v7581_v58  ;;  %v2771_v19 = vpop.permute.xlu1 %2770  ;;  %v2821_v6 = vadd.f32 %v2815_v11, %v2785_v54 }
 0x4dd   : > { %6114 = vmatprep.subr.bf16.mxu1 %v8809_v8  ;;  %v2786_v57 = vmul.f32 %v2771_v19, %v6887_v18  ;;  %v2811_v46 = vpop.permute.xlu0 %2810 }
 0x4de   : > { %v2818_v22 = vmul.f32 %v2811_v46, %v6883_v17 }
 0x4df   : > { %6085 = vmatmul.mubr.msk.bf16.gmra.mrb[64].mxu1 %vm358_vm3, %v6701_v13 }
 0x4e0   : > { %6115 = vmatpush3.bf16.msra.mxu1 %v7584_v24  ;;  %6088 = vmatprep.mubr.msk.bf16.mxu1 %vm6807_vm0, %v8809_v8 }
 0x4e1   : > { %v2803_v5 = vpop.permute.xlu1 %2802  ;;  %6146 = vmatprep.subr.bf16.mxu1 %v8809_v8 }
 0x4e2   : > { %v2816_v41 = vmul.f32 %v2803_v5, %v6883_v17 }
 0x4e4   : > { %v2822_v15 = vadd.f32 %v2816_v41, %v2786_v57 }
 0x4e6   : > { %v2781_v38 = vpop.permute.xlu1 %2780  ;;  %v2826_v48 = vpack.c.bf16 %v2822_v15, %v2821_v6 }
 0x4e7   : > { %6089 = vmatmul.mubr.msk.bf16.gmra.mrb[68].mxu1 %vm358_vm3, %v6702_v14  ;;  %v2788_v16 = vmul.f32 %v2781_v38, %v6887_v18 }
 0x4e8   : > { %6116 = vmatprep.mubr.msk.bf16.mxu1 %vm6807_vm0, %v8809_v8  ;;  %2848 = vrot.lane.b32.xlu1 %v2826_v48, %s6806_s24 }
 0x4e9   : > { %v2824_v43 = vadd.f32 %v2818_v22, %v2788_v16 }
 0x4eb   : > { %v2807_v61 = vpop.permute.xlu1 %2806 }
 0x4ec   : > { %v2817_v30 = vmul.f32 %v2807_v61, %v6883_v17 }
 0x4ee   : > { %v2823_v60 = vadd.f32 %v2817_v30, %v2787_v26 }
 0x4ef   : > { %6117 = vmatmul.mubr.msk.bf16.vlgmr.msra.gmra.mrb[72].mxu1 %vm358_vm3, %v6703_v55 }
 0x4f0   : > { %6147 = vmatpush3.bf16.msra.mxu1 %v7573_v21  ;;  %v2827_v34 = vpack.c.bf16 %v2824_v43, %v2823_v60  ;;  %6120 = vmatprep.mubr.msk.bf16.mxu1 %vm6807_vm0, %v8809_v8 }
 0x4f1   : > { %6148 = vmatprep.subr.bf16.mxu1 %v8809_v8 }
 0x4f2   : > { %2850 = vrot.lane.b32.xlu0 %v2827_v34, %s6806_s24 }
 0x4f4   : > { %6149 = vmatpush3.bf16.msra.mxu1 %v7581_v58 }
 0x4f5   : > { %6150 = vmatprep.subr.bf16.mxu1 %v8809_v8 }
 0x4f6   : > { %v7694_v62 = vpop.f32.mrb[72].mxu0 }
 0x4f7   : > { %6121 = vmatmul.mubr.msk.bf16.gmra.mrb[76].mxu1 %vm358_vm3, %v6704_v27  ;;  %v6100_v63 = vpop.f32.mrb[73].mxu0 }
 0x4f8   : > { %6151 = vmatpush3.bf16.msra.mxu1 %v7584_v24  ;;  %6124 = vmatprep.mubr.msk.bf16.mxu1 %vm6807_vm0, %v8809_v8  ;;  %v7697_v12 = vpop.f32.mrb[74].mxu0 }
 0x4f9   : > { %6182 = vmatprep.subr.bf16.mxu1 %v8809_v8  ;;  %v6101_v51 = vpop.f32.mrb[75].mxu0 }
 0x4fa   : > { %v6717_v51 = vld [vmem:[%s6903_s28 + $0x30] sm:$0xff]  }
 0x4fe   : > { %v7705_v56 = vpop.f32.mrb[76].mxu0 }
 0x4ff   : > { %6125 = vmatmul.mubr.msk.bf16.gmra.mrb[80].mxu1 %vm358_vm3, %v6705_v36  ;;  %v6104_v13 = vpop.f32.mrb[77].mxu0 }
 0x500   : > { %6152 = vmatprep.mubr.msk.bf16.mxu1 %vm6807_vm0, %v8809_v8  ;;  %v7709_v19 = vpop.f32.mrb[78].mxu0 }
 0x501   : > { %v6105_v28 = vpop.f32.mrb[79].mxu0 }
 0x506   : > { %v7711_v54 = vpop.f32.mrb[80].mxu0 }
 0x507   : > { %6153 = vmatmul.mubr.msk.bf16.vlgmr.msra.gmra.mrb[84].mxu1 %vm358_vm3, %v6706_v4  ;;  %v6108_v11 = vpop.f32.mrb[81].mxu0 }
 0x508   : > { %6183 = vmatpush3.bf16.msra.mxu1 %v7573_v21  ;;  %6156 = vmatprep.mubr.msk.bf16.mxu1 %vm6807_vm0, %v8809_v8  ;;  %v6710_v21 = vld [vmem:[%s8804_s2 + $0xa0] sm:$0x7f]   ;;  %v7713_v57 = vpop.f32.mrb[82].mxu0 }
 0x509   : > { %6184 = vmatprep.subr.bf16.mxu1 %v8809_v8  ;;  %v6109_v5 = vpop.f32.mrb[83].mxu0 }
 0x50a   : > { %v6718_v5 = vld [vmem:[%s6903_s28 + $0x38] sm:$0xff]  }
 0x50c   : > { %6185 = vmatpush3.bf16.msra.mxu1 %v7581_v58  ;;  %v6712_v58 = vld [vmem:[%s8804_s2 + $0xa8] sm:$0xff]  }
 0x50d   : > { %6186 = vmatprep.subr.bf16.mxu1 %v8809_v8 }
 0x50e   : > { %v7715_v41 = vpop.f32.mrb[84].mxu0 }
 0x50f   : > { %6157 = vmatmul.mubr.msk.bf16.gmra.mrb[88].mxu1 %vm358_vm3, %v6708_v42  ;;  %v6136_v6 = vpop.f32.mrb[85].mxu0 }
 0x510   : > { %6187 = vmatpush3.bf16.msra.mxu1 %v7584_v24  ;;  %6160 = vmatprep.mubr.msk.bf16.mxu1 %vm6807_vm0, %v8809_v8  ;;  %v6714_v24 = vld [vmem:[%s8804_s2 + $0xb0] sm:$0xff]   ;;  %v7717_v14 = vpop.f32.mrb[86].mxu0 }
 0x511   : > { %6218 = vmatprep.subr.bf16.mxu1 %v8809_v8  ;;  %v6137_v15 = vpop.f32.mrb[87].mxu0 }
 0x516   : > { %v7719_v46 = vpop.f32.mrb[88].mxu0 }
 0x517   : > { %6161 = vmatmul.mubr.msk.bf16.gmra.mrb[92].mxu1 %vm358_vm3, %v6710_v21  ;;  %v6140_v38 = vpop.f32.mrb[89].mxu0 }
 0x518   : > { %6188 = vmatprep.mubr.msk.bf16.mxu1 %vm6807_vm0, %v8809_v8  ;;  %v7721_v48 = vpop.f32.mrb[90].mxu0 }
 0x519   : > { %v6141_v16 = vpop.f32.mrb[91].mxu0 }
 0x51f   : > { %6189 = vmatmul.mubr.msk.bf16.vlgmr.msra.gmra.mrb[96].mxu1 %vm358_vm3, %v6712_v58  ;;  %v7724_v61 = vpop.f32.mrb[92].mxu0 }
 0x520   : > { %6192 = vmatprep.mubr.msk.bf16.mxu1 %vm6807_vm0, %v8809_v8  ;;  %v6144_v55 = vpop.f32.mrb[93].mxu0 }
 0x521   : > { %v7726_v26 = vpop.f32.mrb[94].mxu0 }
 0x522   : > { %v6145_v30 = vpop.f32.mrb[95].mxu0 }
 0x527   : > { %6193 = vmatmul.mubr.msk.bf16.gmra.mrb[100].mxu1 %vm358_vm3, %v6714_v24  ;;  %v7728_v43 = vpop.f32.mrb[96].mxu0 }
 0x528   : > { %6196 = vmatprep.mubr.msk.bf16.mxu1 %vm6807_vm0, %v8809_v8  ;;  %v6172_v60 = vpop.f32.mrb[97].mxu0 }
 0x529   : > { %v7730_v34 = vpop.f32.mrb[98].mxu0 }
 0x52a   : > { %v6173_v36 = vpop.f32.mrb[99].mxu0 }
 0x52f   : > { %6197 = vmatmul.mubr.msk.bf16.gmra.mrb[104].mxu1 %vm358_vm3, %v6716_v10  ;;  %v7733_v4 = vpop.f32.mrb[100].mxu0 }
 0x530   : > { %6224 = vmatprep.mubr.msk.bf16.mxu1 %vm6807_vm0, %v8809_v8  ;;  %v6176_v42 = vpop.f32.mrb[101].mxu0 }
 0x531   : > { %v7735_v21 = vpop.f32.mrb[102].mxu0 }
 0x532   : > { %v6177_v24 = vpop.f32.mrb[103].mxu0 }
 0x537   : > { %v7740_v10 = vpop.f32.mrb[104].mxu0 }
 0x538   : > { %v6180_v13 = vpop.f32.mrb[105].mxu0 }
 0x539   : > { %v7745_v28 = vpop.f32.mrb[106].mxu0 }
 0x53a   : > { %v6181_v11 = vpop.f32.mrb[107].mxu0 }
 0x53f   : > { %v7748_v6 = vpop.f32.mrb[108].mxu0 }
 0x540   : > { %v6208_v15 = vpop.f32.mrb[109].mxu0 }
 0x541   : > { %v7753_v38 = vpop.f32.mrb[110].mxu0 }
 0x542   : > { %v6209_v16 = vpop.f32.mrb[111].mxu0 }
 0x547   : > { %v7756_v55 = vpop.f32.mrb[112].mxu0 }
 0x548   : > { %v6212_v30 = vpop.f32.mrb[113].mxu0 }
 0x549   : > { %v7759_v60 = vpop.f32.mrb[114].mxu0 }
 0x54d   : > { %v2847_v22 = vpop.permute.xlu1 %2846 }
 0x54e   : > { %6237 = vmatpush3.bf16.msra.mxu0 %v2847_v22  ;;  %v6719_v22 = vld [vmem:[%s6903_s28 + $0x40] sm:$0x7f]  }
 0x54f   : > { %6238 = vmatprep.subr.bf16.mxu0 %v8809_v8 }
 0x55a   : > { %v2849_v27 = vpop.permute.xlu1 %2848 }
 0x55b   : > { %6239 = vmatpush3.bf16.msra.mxu0 %v2849_v27  ;;  %v6213_v27 = vpop.f32.mrb[115].mxu0 }
 0x55c   : > { %6240 = vmatprep.subr.bf16.mxu0 %v8809_v8  ;;  %v7763_v36 = vpop.f32.mrb[116].mxu0 }
 0x55d   : > { %v6216_v42 = vpop.f32.mrb[117].mxu0 }
 0x564   : > { %v2851_v58 = vpop.permute.xlu0 %2850 }
 0x565   : > { %v2864_v63 = vand.u32 %v2851_v58, %v6916_v53  ;;  %v7765_v58 = vpop.f32.mrb[118].mxu0 }
 0x566   : > { %v6217_v24 = vpop.f32.mrb[119].mxu0 }
 0x567   : > { %6241 = vmatpush3.bf16.msra.mxu0 %v2864_v63 }
 0x568   : > { %6272 = vmatprep.subr.bf16.mxu0 %v8809_v8 }
 0x56a   : > { %6243 = vmatmul.mubr.msk.bf16.vlgmr.msra.gmra.mrb[120].mxu0 %vm358_vm3, %v6717_v51 }
 0x56b   : > { %6246 = vmatprep.mubr.msk.bf16.mxu0 %vm6807_vm0, %v8809_v8 }
 0x572   : > { %6247 = vmatmul.mubr.msk.bf16.gmra.mrb[124].mxu0 %vm358_vm3, %v6718_v5 }
 0x573   : > { %6250 = vmatprep.mubr.msk.bf16.mxu0 %vm6807_vm0, %v8809_v8 }
 0x57a   : > { %6251 = vmatmul.mubr.msk.bf16.gmra.mrb[128].mxu0 %vm358_vm3, %v6719_v22 }
 0x57b   : > { %6278 = vmatprep.mubr.msk.bf16.mxu0 %vm6807_vm0, %v8809_v8 }
 0x592   : > { %v7767_v63 = vpop.f32.mrb[48].mxu1 }
 0x593   : > { %8825 = vst [vmem:[#allocation6_spill] sm:$0xff] %v7767_v63  ;;  %v6046_v51 = vpop.f32.mrb[49].mxu1 }
 0x594   : > { %v7769_v13 = vpop.f32.mrb[50].mxu1 }
 0x595   : > { %8826 = vst [vmem:[#allocation7_spill] sm:$0xff] %v7769_v13  ;;  %v6047_v11 = vpop.f32.mrb[51].mxu1 }
 0x596   : > { %v7783_v11 = vld [vmem:[%s8805_s3] sm:$0xff] }
 0x59a   : > { %v7771_v5 = vpop.f32.mrb[52].mxu1 }
 0x59b   : > { %8827 = vst [vmem:[#allocation8_spill] sm:$0xff] %v7771_v5  ;;  %v6050_v15 = vpop.f32.mrb[53].mxu1 }
 0x59c   : > { %v7773_v16 = vpop.f32.mrb[54].mxu1 }
 0x59d   : > { %8828 = vst [vmem:[#allocation9_spill] sm:$0xff] %v7773_v16  ;;  %v6051_v22 = vpop.f32.mrb[55].mxu1 }
 0x5a2   : > { %v7775_v30 = vpop.f32.mrb[56].mxu1 }
 0x5a3   : > { %8829 = vst [vmem:[#allocation10_spill] sm:$0xff] %v7775_v30  ;;  %v6054_v27 = vpop.f32.mrb[57].mxu1 }
 0x5a4   : > { %v7777_v1 = vpop.f32.mrb[58].mxu1  ;;  %v7790_v27 = vld [vmem:[%s8805_s3 + $0x8] sm:$0xff] }
 0x5a5   : > { %8830 = vst [vmem:[#allocation11_spill] sm:$0xff] %v7777_v1  ;;  %v6055_v42 = vpop.f32.mrb[59].mxu1 }
 0x5aa   : > { %v1816_v8 = vpop.f32.mrb[60].mxu1 }
 0x5ab   : > { %v1901_v24 = vadd.f32 %v7694_v62, %v1816_v8  ;;  %v6082_v0 = vpop.f32.mrb[61].mxu1 }
 0x5ac   : > { %v1819_v51 = vpop.f32.mrb[62].mxu1 }
 0x5ad   : > { %v1923_v15 = vadd.f32 %v7783_v11, %v1901_v24  ;;  %v1904_v22 = vadd.f32 %v7697_v12, %v1819_v51  ;;  %v6083_v16 = vpop.f32.mrb[63].mxu1  ;;  %v7797_v24 = vld [vmem:[%s8805_s3 + $0x10] sm:$0xff] }
 0x5af   : > { %v1924_v42 = vadd.f32 %v7790_v27, %v1904_v22  ;;  %1931 = vperm.xlu1 %6651, %v1923_v15   ;;  %v7804_v15 = vld [vmem:[%s8805_s3 + $0x18] sm:$0xff] }
 0x5b1   : > { %1936 = vperm.xlu0 %6652, %v1924_v42  }
 0x5b2   : > { %v1824_v0 = vpop.f32.mrb[64].mxu1 }
 0x5b3   : > { %v1909_v8 = vadd.f32 %v7705_v56, %v1824_v0  ;;  %v6086_v62 = vpop.f32.mrb[65].mxu1 }
 0x5b4   : > { %v1827_v1 = vpop.f32.mrb[66].mxu1 }
 0x5b5   : > { %v1925_v12 = vadd.f32 %v7797_v24, %v1909_v8  ;;  %v1912_v16 = vadd.f32 %v7709_v19, %v1827_v1  ;;  %v6087_v51 = vpop.f32.mrb[67].mxu1  ;;  %v7811_v8 = vld [vmem:[%s8805_s3 + $0x20] sm:$0xff] }
 0x5b7   : > { %v1926_v22 = vadd.f32 %v7804_v15, %v1912_v16  ;;  %1941 = vperm.xlu0 %6652, %v1925_v12   ;;  %v7818_v12 = vld [vmem:[%s8805_s3 + $0x28] sm:$0x1f] }
 0x5b9   : > { %1946 = vperm.xlu1 %6651, %v1926_v22  }
 0x5ba   : > { %v1832_v56 = vpop.f32.mrb[68].mxu1 }
 0x5bb   : > { %v1917_v42 = vadd.f32 %v7711_v54, %v1832_v56  ;;  %v6090_v0 = vpop.f32.mrb[69].mxu1 }
 0x5bc   : > { %v1835_v62 = vpop.f32.mrb[70].mxu1 }
 0x5bd   : > { %v1927_v1 = vadd.f32 %v7811_v8, %v1917_v42  ;;  %v1920_v19 = vadd.f32 %v7713_v57, %v1835_v62  ;;  %v6091_v51 = vpop.f32.mrb[71].mxu1 }
 0x5bf   : > { %v1928_v16 = vadd.f32 %v7818_v12, %v1920_v19  ;;  %1951 = vperm.xlu0 %6652, %v1927_v1  }
 0x5c1   : > { %1956 = vperm.xlu1 %6651, %v1928_v16  }
 0x5c2   : > { %v2035_v54 = vpop.f32.mrb[72].mxu1 }
 0x5c3   : > { %v2117_v22 = vadd.f32 %v7715_v41, %v2035_v54  ;;  %v6118_v56 = vpop.f32.mrb[73].mxu1 }
 0x5c4   : > { %v2038_v0 = vpop.f32.mrb[74].mxu1 }
 0x5c5   : > { %v2139_v30 = vadd.f32 %v2117_v22, %v7305_v39  ;;  %v2120_v42 = vadd.f32 %v7717_v14, %v2038_v0  ;;  %v6119_v57 = vpop.f32.mrb[75].mxu1 }
 0x5c7   : > { %2147 = vperm.xlu1 %6651, %v2139_v30   ;;  %v2140_v62 = vadd.f32 %v2120_v42, %v7308_v25 }
 0x5ca   : > { %v2043_v51 = vpop.f32.mrb[76].mxu1 }
 0x5cb   : > { %v2125_v13 = vadd.f32 %v7719_v46, %v2043_v51  ;;  %v6122_v5 = vpop.f32.mrb[77].mxu1  ;;  %2152 = vperm.xlu1 %6651, %v2140_v62  }
 0x5cc   : > { %v2046_v1 = vpop.f32.mrb[78].mxu1 }
 0x5cd   : > { %v2141_v19 = vadd.f32 %v2125_v13, %v7320_v47  ;;  %v2128_v41 = vadd.f32 %v7721_v48, %v2046_v1  ;;  %v6123_v16 = vpop.f32.mrb[79].mxu1 }
 0x5cf   : > { %v2142_v54 = vadd.f32 %v2128_v41, %v7323_v50  ;;  %2157 = vperm.xlu0 %6652, %v2141_v19  }
 0x5d1   : > { %2162 = vperm.xlu1 %6651, %v2142_v54  }
 0x5d2   : > { %v2051_v14 = vpop.f32.mrb[80].mxu1 }
 0x5d3   : > { %v2133_v30 = vadd.f32 %v7724_v61, %v2051_v14  ;;  %v6126_v22 = vpop.f32.mrb[81].mxu1 }
 0x5d4   : > { %v2054_v56 = vpop.f32.mrb[82].mxu1 }
 0x5d5   : > { %v2143_v0 = vadd.f32 %v2133_v30, %v7333_v7  ;;  %v2136_v46 = vadd.f32 %v7726_v26, %v2054_v56  ;;  %v6127_v5 = vpop.f32.mrb[83].mxu1 }
 0x5d7   : > { %v2144_v42 = vadd.f32 %v2136_v46, %v7336_v37  ;;  %2167 = vperm.xlu0 %6652, %v2143_v0  }
 0x5d9   : > { %2172 = vperm.xlu1 %6651, %v2144_v42  }
 0x5da   : > { %v2257_v48 = vpop.f32.mrb[84].mxu1 }
 0x5db   : > { %v2339_v13 = vadd.f32 %v7728_v43, %v2257_v48  ;;  %v6154_v57 = vpop.f32.mrb[85].mxu1 }
 0x5dc   : > { %v2260_v62 = vpop.f32.mrb[86].mxu1 }
 0x5dd   : > { %v2361_v51 = vadd.f32 %v2339_v13, %v7313_v31  ;;  %v2342_v61 = vadd.f32 %v7730_v34, %v2260_v62  ;;  %v6155_v1 = vpop.f32.mrb[87].mxu1 }
 0x5df   : > { %v2362_v19 = vadd.f32 %v2342_v61, %v7315_v35  ;;  %2369 = vperm.xlu0 %6652, %v2361_v51  }
 0x5e1   : > { %2374 = vperm.xlu1 %6651, %v2362_v19  }
 0x5e2   : > { %v2265_v26 = vpop.f32.mrb[88].mxu1 }
 0x5e3   : > { %v2347_v41 = vadd.f32 %v7733_v4, %v2265_v26  ;;  %v6158_v16 = vpop.f32.mrb[89].mxu1 }
 0x5e4   : > { %v2268_v54 = vpop.f32.mrb[90].mxu1 }
 0x5e5   : > { %v2363_v14 = vadd.f32 %v2347_v41, %v7345_v32  ;;  %v2350_v43 = vadd.f32 %v7735_v21, %v2268_v54  ;;  %v6159_v30 = vpop.f32.mrb[91].mxu1 }
 0x5e7   : > { %v2364_v22 = vadd.f32 %v2350_v43, %v7348_v44  ;;  %2379 = vperm.xlu0 %6652, %v2363_v14  }
 0x5e9   : > { %2384 = vperm.xlu1 %6651, %v2364_v22  }
 0x5ea   : > { %v2273_v34 = vpop.f32.mrb[92].mxu1 }
 0x5eb   : > { %v2355_v56 = vadd.f32 %v7740_v10, %v2273_v34  ;;  %v6162_v0 = vpop.f32.mrb[93].mxu1 }
 0x5ec   : > { %v2276_v46 = vpop.f32.mrb[94].mxu1 }
 0x5ed   : > { %v2365_v5 = vadd.f32 %v2355_v56, %v7353_v52  ;;  %v2358_v4 = vadd.f32 %v7745_v28, %v2276_v46  ;;  %v6163_v42 = vpop.f32.mrb[95].mxu1 }
 0x5ef   : > { %v2366_v48 = vadd.f32 %v2358_v4, %v7356_v49  ;;  %2389 = vperm.xlu0 %6652, %v2365_v5  }
 0x5f1   : > { %2394 = vperm.xlu1 %6651, %v2366_v48  }
 0x5f2   : > { %v2479_v21 = vpop.f32.mrb[96].mxu1 }
 0x5f3   : > { %v2561_v13 = vadd.f32 %v7748_v6, %v2479_v21  ;;  %v6190_v57 = vpop.f32.mrb[97].mxu1 }
 0x5f4   : > { %v2482_v62 = vpop.f32.mrb[98].mxu1 }
 0x5f5   : > { %v2583_v51 = vadd.f32 %v2561_v13, %v7326_v59  ;;  %v2564_v10 = vadd.f32 %v7753_v38, %v2482_v62  ;;  %v6191_v61 = vpop.f32.mrb[99].mxu1 }
 0x5f7   : > { %v2584_v1 = vadd.f32 %v2564_v10, %v7330_v2  ;;  %2591 = vperm.xlu0 %6652, %v2583_v51  }
 0x5f9   : > { %2596 = vperm.xlu1 %6651, %v2584_v1  }
 0x5fa   : > { %v2487_v28 = vpop.f32.mrb[100].mxu1 }
 0x5fb   : > { %v2569_v19 = vadd.f32 %v7756_v55, %v2487_v28  ;;  %v6194_v26 = vpop.f32.mrb[101].mxu1 }
 0x5fc   : > { %v2490_v41 = vpop.f32.mrb[102].mxu1 }
 0x5fd   : > { %v2585_v16 = vadd.f32 %v2569_v19, %v7365_v20  ;;  %v2572_v6 = vadd.f32 %v7759_v60, %v2490_v41  ;;  %v6195_v54 = vpop.f32.mrb[103].mxu1  ;;  %v8831_v60 = vmov 1  }
 0x5ff   : > { %v2586_v14 = vadd.f32 %v2572_v6, %v7368_v23  ;;  %2601 = vperm.xlu0 %6652, %v2585_v16   ;;  %v6720_v16 = vld [vmem:[%s8804_s2] sm:$0xff]  }
 0x601   : > { %2606 = vperm.xlu1 %6651, %v2586_v14  }
 0x602   : > { %v2495_v38 = vpop.f32.mrb[104].mxu1 }
 0x603   : > { %v2577_v43 = vadd.f32 %v7763_v36, %v2495_v38  ;;  %v6198_v30 = vpop.f32.mrb[105].mxu1  ;;  %v8832_v36 = vmov 0.0  }
 0x604   : > { %v2498_v22 = vpop.f32.mrb[106].mxu1 }
 0x605   : > { %v2587_v34 = vadd.f32 %v2577_v43, %v7373_v29  ;;  %v2580_v55 = vadd.f32 %v7765_v58, %v2498_v22  ;;  %v6199_v56 = vpop.f32.mrb[107].mxu1  ;;  %v6721_v43 = vld [vmem:[%s8804_s2 + $0x8] sm:$0xff]  }
 0x607   : > { %v2588_v0 = vadd.f32 %v2580_v55, %v7376_v45  ;;  %2611 = vperm.xlu0 %6652, %v2587_v34   ;;  %v6722_v55 = vld [vmem:[%s8804_s2 + $0x10] sm:$0x7f]  }
 0x609   : > { %2616 = vperm.xlu1 %6651, %v2588_v0  }
 0x60b   : > { %6653 = vset.pattern.permute.xlu0 %v8831_v60 }
 0x62e   : > { %v1932_v10 = vpop.permute.xlu1 %1931 }
 0x630   : > { %v1937_v6 = vpop.permute.xlu0 %1936 }
 0x636   : > { %v1942_v14 = vpop.permute.xlu0 %1941 }
 0x638   : > { %v7868_v26 = vpop.permute.xlu1 %1946 }
 0x63d   : > { %v2900_v46 = vpop.f32.mrb[120].mxu0 }
 0x63e   : > { %v6244_v5 = vpop.f32.mrb[121].mxu0  ;;  %v7891_v30 = vpop.permute.xlu0 %1951 }
 0x63f   : > { %v2903_v4 = vpop.f32.mrb[122].mxu0 }
 0x640   : > { %v7858_v42 = vpack.c.bf16 %v2903_v4, %v2900_v46  ;;  %v6245_v48 = vpop.f32.mrb[123].mxu0  ;;  %v7879_v54 = vpop.permute.xlu1 %1956  ;;  %v6723_v4 = vld [vmem:[%s8804_s2 + $0x18] sm:$0xff]  }
 0x642   : > { %6273 = vmatpush3.bf16.msra.mxu0 %v7858_v42 }
 0x643   : > { %6274 = vmatprep.subr.bf16.mxu0 %v8832_v36 }
 0x645   : > { %v2908_v21 = vpop.f32.mrb[124].mxu0 }
 0x646   : > { %v6248_v13 = vpop.f32.mrb[125].mxu0  ;;  %v2148_v38 = vpop.permute.xlu1 %2147 }
 0x647   : > { %v2911_v58 = vpop.f32.mrb[126].mxu0 }
 0x648   : > { %v7862_v57 = vpack.c.bf16 %v2911_v58, %v2908_v21  ;;  %v6249_v62 = vpop.f32.mrb[127].mxu0 }
 0x649   : > { %v2175_v62 = vmul.f32 %v2148_v38, %v7423_v40 }
 0x64a   : > { %6275 = vmatpush3.bf16.msra.mxu0 %v7862_v57  ;;  %v2153_v22 = vpop.permute.xlu1 %2152 }
 0x64b   : > { %6276 = vmatprep.subr.bf16.mxu0 %v8832_v36 }
 0x64d   : > { %v2916_v51 = vpop.f32.mrb[128].mxu0 }
 0x64e   : > { %v6252_v61 = vpop.f32.mrb[129].mxu0  ;;  %v2158_v34 = vpop.permute.xlu0 %2157 }
 0x64f   : > { %v2919_v1 = vpop.f32.mrb[130].mxu0  ;;  %v6724_v61 = vld [vmem:[%s8804_s2 + $0x20] sm:$0xff]  }
 0x650   : > { %v7866_v28 = vpack.c.bf16 %v2919_v1, %v2916_v51  ;;  %v6253_v19 = vpop.f32.mrb[131].mxu0  ;;  %v2163_v56 = vpop.permute.xlu1 %2162  ;;  %v2176_v51 = vmul.f32 %v2153_v22, %v7423_v40 }
 0x651   : > { %v1959_v19 = vmul.f32 %v1932_v10, %v7432_v3 }
 0x652   : > { %v7872_v41 = vand.u32 %v7866_v28, %v6916_v53 }
 0x654   : > { %6277 = vmatpush3.bf16.msra.mxu0 %v7872_v41 }
 0x655   : > { %6308 = vmatprep.subr.bf16.mxu0 %v8832_v36 }
 0x656   : > { %v2168_v0 = vpop.permute.xlu0 %2167 }
 0x657   : > { %6279 = vmatmul.mubr.msk.bf16.vlgmr.msra.gmra.mrb[132].mxu0 %vm358_vm3, %v6720_v16  ;;  %v1960_v16 = vmul.f32 %v1937_v6, %v7432_v3 }
 0x658   : > { %6282 = vmatprep.mubr.msk.bf16.mxu0 %vm6807_vm0, %v8832_v36  ;;  %6309 = vmatpush3.bf16.msra.mxu0 %v7858_v42  ;;  %v2173_v46 = vpop.permute.xlu1 %2172 }
 0x659   : > { %6310 = vmatprep.subr.bf16.mxu0 %v8832_v36  ;;  %v2182_v22 = vadd.f32 %v2176_v51, %v1960_v16  ;;  %v1961_v16 = vmul.f32 %v1942_v14, %v7432_v3 }
 0x65c   : > { %6311 = vmatpush3.bf16.msra.mxu0 %v7862_v57 }
 0x65d   : > { %6312 = vmatprep.subr.bf16.mxu0 %v8832_v36 }
 0x65e   : > { %v2370_v5 = vpop.permute.xlu0 %2369 }
 0x65f   : > { %6283 = vmatmul.mubr.msk.bf16.gmra.mrb[136].mxu0 %vm358_vm3, %v6721_v43  ;;  %v2397_v43 = vmul.f32 %v2370_v5, %v7434_v33 }
 0x660   : > { %6286 = vmatprep.mubr.msk.bf16.mxu0 %vm6807_vm0, %v8832_v36  ;;  %6313 = vmatpush3.bf16.msra.mxu0 %v7872_v41  ;;  %v2375_v48 = vpop.permute.xlu1 %2374 }
 0x661   : > { %6344 = vmatprep.subr.bf16.mxu0 %v8832_v36 }
 0x666   : > { %v2380_v21 = vpop.permute.xlu0 %2379 }
 0x667   : > { %6287 = vmatmul.mubr.msk.bf16.gmra.mrb[140].mxu0 %vm358_vm3, %v6722_v55  ;;  %v2398_v55 = vmul.f32 %v2375_v48, %v7434_v33  ;;  %v2177_v48 = vmul.f32 %v2158_v34, %v7423_v40 }
 0x668   : > { %6314 = vmatprep.mubr.msk.bf16.mxu0 %vm6807_vm0, %v8832_v36  ;;  %v2385_v13 = vpop.permute.xlu1 %2384 }
 0x669   : > { %v2404_v6 = vadd.f32 %v2398_v55, %v2182_v22  ;;  %v2399_v55 = vmul.f32 %v2380_v21, %v7434_v33  ;;  %v2183_v34 = vadd.f32 %v2177_v48, %v1961_v16  ;;  %v6726_v48 = vld [vmem:[%s8804_s2 + $0x30] sm:$0xff]  }
 0x66b   : > { %v2405_v14 = vadd.f32 %v2399_v55, %v2183_v34  ;;  %v5523_v34 = vld [vmem:[%s6856_s21 + $0x98] sm:$0xff] }
 0x66e   : > { %v2390_v58 = vpop.permute.xlu0 %2389 }
 0x66f   : > { %6315 = vmatmul.mubr.msk.bf16.vlgmr.msra.gmra.mrb[144].mxu0 %vm358_vm3, %v6723_v4  ;;  %v2181_v4 = vadd.f32 %v2175_v62, %v1959_v19  ;;  %v2178_v62 = vmul.f32 %v2163_v56, %v7423_v40 }
 0x670   : > { %6318 = vmatprep.mubr.msk.bf16.mxu0 %vm6807_vm0, %v8832_v36  ;;  %6345 = vmatpush3.bf16.msra.mxu0 %v7858_v42  ;;  %v2395_v1 = vpop.permute.xlu1 %2394 }
 0x671   : > { %6346 = vmatprep.subr.bf16.mxu0 %v8832_v36  ;;  %v2403_v10 = vadd.f32 %v2397_v43, %v2181_v4  ;;  %v1962_v43 = vmul.f32 %v7868_v26, %v7432_v3 }
 0x673   : > { %v2184_v22 = vadd.f32 %v2178_v62, %v1962_v43  ;;  %v1963_v62 = vmul.f32 %v7891_v30, %v7432_v3 }
 0x674   : > { %6347 = vmatpush3.bf16.msra.mxu0 %v7862_v57 }
 0x675   : > { %6348 = vmatprep.subr.bf16.mxu0 %v8832_v36 }
 0x676   : > { %v2592_v38 = vpop.permute.xlu0 %2591 }
 0x677   : > { %v2619_v63 = vmul.f32 %v2592_v38, %v7440_v9  ;;  %6319 = vmatmul.mubr.msk.bf16.gmra.mrb[148].mxu0 %vm358_vm3, %v6724_v61  ;;  %v6725_v61 = vld [vmem:[%s8804_s2 + $0x28] sm:$0x7f]  }
 0x678   : > { %v2597_v45 = vpop.permute.xlu1 %2596  ;;  %6322 = vmatprep.mubr.msk.bf16.mxu0 %vm6807_vm0, %v8832_v36  ;;  %6349 = vmatpush3.bf16.msra.mxu0 %v7872_v41 }
 0x679   : > { %v2620_v5 = vmul.f32 %v2597_v45, %v7440_v9  ;;  %6380 = vmatprep.subr.bf16.mxu0 %v8832_v36  ;;  %v2625_v51 = vadd.f32 %v2619_v63, %v2403_v10  ;;  %v2400_v45 = vmul.f32 %v2385_v13, %v7434_v33  ;;  %v2179_v13 = vmul.f32 %v2168_v0, %v7423_v40 }
 0x67a   : > { %v2180_v10 = vmul.f32 %v2173_v46, %v7423_v40 }
 0x67b   : > { %v2626_v19 = vadd.f32 %v2620_v5, %v2404_v6  ;;  %v2406_v26 = vadd.f32 %v2400_v45, %v2184_v22  ;;  %v2185_v43 = vadd.f32 %v2179_v13, %v1963_v62  ;;  %v5524_v22 = vld [vmem:[%s6856_s21 + $0xa0] sm:$0xff]  ;;  %v6742_v13 = vld [vmem:[%s8804_s2 + $0x58] sm:$0x7f]  }
 0x67c   : > { %v6780_v62 = vld [vmem:[%s6903_s28 + $0x18] sm:$0xff]  }
 0x67d   : > { %v2631_v38 = vpack.c.bf16 %v2626_v19, %v2625_v51  ;;  %v1964_v51 = vmul.f32 %v7879_v54, %v7432_v3  ;;  %v2401_v19 = vmul.f32 %v2390_v58, %v7434_v33 }
 0x67e   : > { %v2602_v4 = vpop.permute.xlu0 %2601 }
 0x67f   : > { %v2621_v63 = vmul.f32 %v2602_v4, %v7440_v9  ;;  %2637 = vrot.lane.b32.xlu0 %v2631_v38, %s6812_s14  ;;  %6323 = vmatmul.mubr.msk.bf16.gmra.mrb[152].mxu0 %vm358_vm3, %v6725_v61  ;;  %v2402_v61 = vmul.f32 %v2395_v1, %v7434_v33  ;;  %v2186_v46 = vadd.f32 %v2180_v10, %v1964_v51 }
 0x680   : > { %v2607_v56 = vpop.permute.xlu1 %2606  ;;  %6350 = vmatprep.mubr.msk.bf16.mxu0 %vm6807_vm0, %v8832_v36  ;;  %v2407_v54 = vadd.f32 %v2401_v19, %v2185_v43 }
 0x681   : > { %v2622_v21 = vmul.f32 %v2607_v56, %v7440_v9  ;;  %v2627_v6 = vadd.f32 %v2621_v63, %v2405_v14  ;;  %v2408_v30 = vadd.f32 %v2402_v61, %v2186_v46  ;;  %v8833_v63 = vmov 0   ;;  %v6734_v56 = vld [vmem:[%s8804_s2 + $0x38] sm:$0xff]   ;;  %v6736_v14 = vld [vmem:[%s8804_s2 + $0x40] sm:$0x7f]   ;;  %v6782_v46 = vld [vmem:[%s6903_s28 + $0x28] sm:$0x7f]  }
 0x683   : > { %v2628_v5 = vadd.f32 %v2622_v21, %v2406_v26  ;;  %v6740_v26 = vld [vmem:[%s8804_s2 + $0x50] sm:$0xff]  }
 0x685   : > { %v2632_v16 = vpack.c.bf16 %v2628_v5, %v2627_v6 }
 0x686   : > { %v2612_v0 = vpop.permute.xlu0 %2611 }
 0x687   : > { %v2623_v55 = vmul.f32 %v2612_v0, %v7440_v9  ;;  %2639 = vrot.lane.b32.xlu1 %v2632_v16, %s6812_s14  ;;  %6351 = vmatmul.mubr.msk.bf16.vlgmr.msra.gmra.mrb[156].mxu0 %vm358_vm3, %v6726_v48  ;;  %v6781_v16 = vld [vmem:[%s6903_s28 + $0x20] sm:$0xff]  }
 0x688   : > { %v2617_v45 = vpop.permute.xlu1 %2616  ;;  %6381 = vmatpush3.bf16.msra.mxu0 %v7858_v42  ;;  %6354 = vmatprep.mubr.msk.bf16.mxu0 %vm6807_vm0, %v8832_v36 }
 0x689   : > { %v2624_v58 = vmul.f32 %v2617_v45, %v7440_v9  ;;  %6382 = vmatprep.subr.bf16.mxu0 %v8832_v36  ;;  %v2629_v1 = vadd.f32 %v2623_v55, %v2407_v54 }
 0x68b   : > { %v2630_v38 = vadd.f32 %v2624_v58, %v2408_v30  ;;  %2956 = vrot.lane.b32.xlu1 %v7858_v42, %s6809_s29  ;;  %v5522_v42 = vld [vmem:[%s6856_s21 + $0x90] sm:$0xff]  ;;  %v6727_v58 = vld [vmem:[%s8804_s2 + $0x60] sm:$0xff]  }
 0x68c   : > { %6383 = vmatpush3.bf16.msra.mxu0 %v7862_v57 }
 0x68d   : > { %v2633_v4 = vpack.c.bf16 %v2630_v38, %v2629_v1  ;;  %6384 = vmatprep.subr.bf16.mxu0 %v8832_v36 }
 0x68f   : > { %2641 = vrot.lane.b32.xlu0 %v2633_v4, %s6812_s14  ;;  %2960 = vrot.lane.b32.xlu1 %v7866_v28, %s6809_s29  ;;  %v5525_v28 = vld [vmem:[%s6856_s21 + $0xa8] sm:$0xff] }
 0x690   : > { %6385 = vmatpush3.bf16.msra.mxu0 %v7872_v41  ;;  %v5526_v41 = vld [vmem:[%s6856_s21 + $0xb0] sm:$0xff] }
 0x691   : > { %6416 = vmatprep.subr.bf16.mxu0 %v8832_v36  ;;  %6355 = vmatmul.mubr.msk.bf16.gmra.mrb[160].mxu0 %vm358_vm3, %v6734_v56  ;;  %v6728_v56 = vld [vmem:[%s8804_s2 + $0x68] sm:$0xff]  }
 0x692   : > { %6358 = vmatprep.mubr.msk.bf16.mxu0 %vm6807_vm0, %v8832_v36 }
 0x693   : > { %2958 = vrot.lane.b32.xlu0 %v7862_v57, %s6809_s29  ;;  %3954 = vperm.xlu1 %6651, %v5523_v34   ;;  %v5527_v57 = vld [vmem:[%s6856_s21 + $0xb8] sm:$0x1f] }
 0x697   : > { %3984 = vperm.xlu0 %6653, %v5522_v42   ;;  %6655 = vset.pattern.permute.xlu1 %v8831_v60 }
 0x698   : > { %3988 = vperm.xlu1 %6655, %v5523_v34  }
 0x699   : > { %6359 = vmatmul.mubr.msk.bf16.gmra.mrb[164].mxu0 %vm358_vm3, %v6736_v14 }
 0x69a   : > { %6386 = vmatprep.mubr.msk.bf16.mxu0 %vm6807_vm0, %v8832_v36 }
 0x69b   : > { %6654 = vset.pattern.permute.xlu0 %v8833_v63 }
 0x69c   : > { %3949 = vperm.xlu0 %6654, %v5522_v42   ;;  %6656 = vset.pattern.permute.xlu1 %v8833_v63 }
 0x69d   : > { %3959 = vperm.xlu1 %6656, %v5524_v22  }
 0x6a0   : > { %3964 = vperm.xlu0 %6654, %v5525_v28  }
 0x6a1   : > { %6657 = vset.pattern.permute.xlu1 %v8831_v60 }
 0x6a2   : > { %3992 = vperm.xlu1 %6657, %v5524_v22  }
 0x6a4   : > { %3969 = vperm.xlu0 %6654, %v5526_v41  }
 0x6a6   : > { %3996 = vperm.xlu1 %6657, %v5525_v28  }
 0x6a8   : > { %6659 = vset.pattern.permute.xlu0 %v8831_v60 }
 0x6a9   : > { %4000 = vperm.xlu0 %6659, %v5526_v41  }
 0x6aa   : > { %6658 = vset.pattern.permute.xlu1 %v8833_v63 }
 0x6ab   : > { %3974 = vperm.xlu1 %6658, %v5527_v57  }
 0x6ad   : > { %6661 = vset.pattern.permute.xlu0 %v8833_v63 }
 0x6af   : > { %6660 = vset.pattern.permute.xlu1 %v8831_v60  ;;  %v6738_v60 = vld [vmem:[%s8804_s2 + $0x48] sm:$0xff]  }
 0x6b0   : > { %4004 = vperm.xlu1 %6660, %v5527_v57   ;;  %6387 = vmatmul.mubr.msk.bf16.vlgmr.msra.gmra.mrb[168].mxu0 %vm358_vm3, %v6738_v60 }
 0x6b1   : > { %6390 = vmatprep.mubr.msk.bf16.mxu0 %vm6807_vm0, %v8832_v36 }
 0x6b4   : > { %6662 = vset.pattern.permute.xlu1 %v8833_v63 }
 0x6b8   : > { %6391 = vmatmul.mubr.msk.bf16.gmra.mrb[172].mxu0 %vm358_vm3, %v6740_v26 }
 0x6b9   : > { %6394 = vmatprep.mubr.msk.bf16.mxu0 %vm6807_vm0, %v8832_v36 }
 0x6c0   : > { %6395 = vmatmul.mubr.msk.bf16.gmra.mrb[176].mxu0 %vm358_vm3, %v6742_v13 }
 0x6c1   : > { %6422 = vmatprep.mubr.msk.bf16.mxu0 %vm6807_vm0, %v8832_v36 }
 0x6f1   : > { %v2638_v21 = vpop.permute.xlu0 %2637 }
 0x6f2   : > { %6219 = vmatpush3.bf16.msra.mxu1 %v2638_v21 }
 0x6f3   : > { %6220 = vmatprep.subr.bf16.mxu1 %v8832_v36 }
 0x6f9   : > { %v2640_v10 = vpop.permute.xlu1 %2639 }
 0x6fa   : > { %6221 = vmatpush3.bf16.msra.mxu1 %v2640_v10 }
 0x6fb   : > { %6222 = vmatprep.subr.bf16.mxu1 %v8832_v36 }
 0x6fd   : > { %v8025_v48 = vpop.permute.xlu1 %2956 }
 0x701   : > { %v2642_v6 = vpop.permute.xlu0 %2641  ;;  %v2961_v19 = vpop.permute.xlu1 %2960 }
 0x702   : > { %v2646_v5 = vand.u32 %v2642_v6, %v6916_v53  ;;  %v8036_v61 = vand.u32 %v2961_v19, %v6916_v53  ;;  %v6729_v19 = vld [vmem:[%s8804_s2 + $0x70] sm:$0x7f]  }
 0x704   : > { %6223 = vmatpush3.bf16.msra.mxu1 %v2646_v5 }
 0x705   : > { %6254 = vmatprep.subr.bf16.mxu1 %v8832_v36  ;;  %v8033_v51 = vpop.permute.xlu0 %2958 }
 0x707   : > { %6225 = vmatmul.mubr.msk.bf16.vlgmr.msra.gmra.mrb[108].mxu1 %vm358_vm3, %v6780_v62 }
 0x708   : > { %6255 = vmatpush3.bf16.msra.mxu1 %v8025_v48  ;;  %6228 = vmatprep.mubr.msk.bf16.mxu1 %vm6807_vm0, %v8832_v36 }
 0x709   : > { %6256 = vmatprep.subr.bf16.mxu1 %v8832_v36 }
 0x70c   : > { %6257 = vmatpush3.bf16.msra.mxu1 %v8033_v51 }
 0x70d   : > { %6258 = vmatprep.subr.bf16.mxu1 %v8832_v36 }
 0x70f   : > { %6229 = vmatmul.mubr.msk.bf16.gmra.mrb[112].mxu1 %vm358_vm3, %v6781_v16 }
 0x710   : > { %6232 = vmatprep.mubr.msk.bf16.mxu1 %vm6807_vm0, %v8832_v36  ;;  %6259 = vmatpush3.bf16.msra.mxu1 %v8036_v61 }
 0x711   : > { %6290 = vmatprep.subr.bf16.mxu1 %v8832_v36 }
 0x712   : > { %v3955_v0 = vpop.permute.xlu1 %3954 }
 0x713   : > { %v3978_v1 = vmul.f32 %v3955_v0, %v6887_v18 }
 0x716   : > { %v3985_v43 = vpop.permute.xlu0 %3984 }
 0x717   : > { %6233 = vmatmul.mubr.msk.bf16.gmra.mrb[116].mxu1 %vm358_vm3, %v6782_v46  ;;  %v3989_v55 = vpop.permute.xlu1 %3988  ;;  %v4007_v45 = vmul.f32 %v3985_v43, %v6883_v17 }
 0x718   : > { %6260 = vmatprep.mubr.msk.bf16.mxu1 %vm6807_vm0, %v8832_v36  ;;  %v4008_v54 = vmul.f32 %v3989_v55, %v6883_v17 }
 0x71a   : > { %v4014_v34 = vadd.f32 %v4008_v54, %v3978_v1  ;;  %v6733_v1 = vld [vmem:[%s8804_s2 + $0x90] sm:$0xff]  }
 0x71b   : > { %v3950_v30 = vpop.permute.xlu0 %3949 }
 0x71c   : > { %v3977_v38 = vmul.f32 %v3950_v30, %v6887_v18  ;;  %v3960_v4 = vpop.permute.xlu1 %3959  ;;  %v6730_v30 = vld [vmem:[%s8804_s2 + $0x78] sm:$0xff]  }
 0x71d   : > { %v3979_v41 = vmul.f32 %v3960_v4, %v6887_v18 }
 0x71e   : > { %v4013_v42 = vadd.f32 %v4007_v45, %v3977_v38  ;;  %v6735_v38 = vld [vmem:[%s8804_s2 + $0x98] sm:$0xff]  }
 0x71f   : > { %6261 = vmatmul.mubr.msk.bf16.vlgmr.msra.gmra.mrb[120].mxu1 %vm358_vm3, %v6727_v58  ;;  %v3965_v22 = vpop.permute.xlu0 %3964 }
 0x720   : > { %v4019_v63 = vpack.c.bf16 %v4014_v34, %v4013_v42  ;;  %6291 = vmatpush3.bf16.msra.mxu1 %v8025_v48  ;;  %6264 = vmatprep.mubr.msk.bf16.mxu1 %vm6807_vm0, %v8832_v36  ;;  %v3980_v60 = vmul.f32 %v3965_v22, %v6887_v18 }
 0x721   : > { %6292 = vmatprep.subr.bf16.mxu1 %v8832_v36  ;;  %v3993_v28 = vpop.permute.xlu1 %3992 }
 0x722   : > { %4040 = vrot.lane.b32.xlu1 %v4019_v63, %s6806_s24  ;;  %v4009_v57 = vmul.f32 %v3993_v28, %v6883_v17  ;;  %v6743_v63 = vld [vmem:[%s8804_s2 + $0xb8] sm:$0x7f]  }
 0x723   : > { %v3970_v14 = vpop.permute.xlu0 %3969 }
 0x724   : > { %6293 = vmatpush3.bf16.msra.mxu1 %v8033_v51  ;;  %v4015_v21 = vadd.f32 %v4009_v57, %v3979_v41  ;;  %v3981_v16 = vmul.f32 %v3970_v14, %v6887_v18 }
 0x725   : > { %6294 = vmatprep.subr.bf16.mxu1 %v8832_v36  ;;  %v3997_v26 = vpop.permute.xlu1 %3996 }
 0x726   : > { %v4010_v13 = vmul.f32 %v3997_v26, %v6883_v17 }
 0x727   : > { %6265 = vmatmul.mubr.msk.bf16.gmra.mrb[124].mxu1 %vm358_vm3, %v6728_v56 }
 0x728   : > { %6295 = vmatpush3.bf16.msra.mxu1 %v8036_v61  ;;  %6268 = vmatprep.mubr.msk.bf16.mxu1 %vm6807_vm0, %v8832_v36  ;;  %v4016_v10 = vadd.f32 %v4010_v13, %v3980_v60  ;;  %v4001_v6 = vpop.permute.xlu0 %4000 }
 0x729   : > { %6326 = vmatprep.subr.bf16.mxu1 %v8832_v36  ;;  %v4011_v0 = vmul.f32 %v4001_v6, %v6883_v17 }
 0x72a   : > { %v4020_v5 = vpack.c.bf16 %v4016_v10, %v4015_v21  ;;  %v3975_v62 = vpop.permute.xlu1 %3974  ;;  %v8146_v4 = vpop.f32.mrb[132].mxu0 }
 0x72b   : > { %v3982_v43 = vmul.f32 %v3975_v62, %v6887_v18  ;;  %v4017_v55 = vadd.f32 %v4011_v0, %v3981_v16  ;;  %v6732_v18 = vld [vmem:[%s8804_s2 + $0x88] sm:$0x7f]   ;;  %v6280_v34 = vpop.f32.mrb[133].mxu0 }
 0x72c   : > { %4042 = vrot.lane.b32.xlu0 %v4020_v5, %s6806_s24  ;;  %v8149_v42 = vpop.f32.mrb[134].mxu0 }
 0x72d   : > { %v6281_v22 = vpop.f32.mrb[135].mxu0 }
 0x72f   : > { %6269 = vmatmul.mubr.msk.bf16.gmra.mrb[128].mxu1 %vm358_vm3, %v6729_v19  ;;  %v4005_v46 = vpop.permute.xlu1 %4004 }
 0x730   : > { %6296 = vmatprep.mubr.msk.bf16.mxu1 %vm6807_vm0, %v8832_v36  ;;  %v4012_v45 = vmul.f32 %v4005_v46, %v6883_v17  ;;  %v6731_v17 = vld [vmem:[%s8804_s2 + $0x80] sm:$0xff]  }
 0x732   : > { %v4018_v54 = vadd.f32 %v4012_v45, %v3982_v43  ;;  %v8157_v28 = vpop.f32.mrb[136].mxu0 }
 0x733   : > { %v6284_v41 = vpop.f32.mrb[137].mxu0 }
 0x734   : > { %v4021_v58 = vpack.c.bf16 %v4018_v54, %v4017_v55  ;;  %v8161_v57 = vpop.f32.mrb[138].mxu0 }
 0x735   : > { %v6285_v56 = vpop.f32.mrb[139].mxu0 }
 0x736   : > { %4044 = vrot.lane.b32.xlu1 %v4021_v58, %s6806_s24  ;;  %v6745_v56 = vld [vmem:[%s6903_s28 + $0x50] sm:$0xff]  }
 0x737   : > { %6297 = vmatmul.mubr.msk.bf16.vlgmr.msra.gmra.mrb[132].mxu1 %vm358_vm3, %v6730_v30 }
 0x738   : > { %6327 = vmatpush3.bf16.msra.mxu1 %v8025_v48  ;;  %6300 = vmatprep.mubr.msk.bf16.mxu1 %vm6807_vm0, %v8832_v36 }
 0x739   : > { %6328 = vmatprep.subr.bf16.mxu1 %v8832_v36 }
 0x73a   : > { %v8163_v14 = vpop.f32.mrb[140].mxu0 }
 0x73b   : > { %v6288_v60 = vpop.f32.mrb[141].mxu0 }
 0x73c   : > { %6329 = vmatpush3.bf16.msra.mxu1 %v8033_v51  ;;  %v8165_v26 = vpop.f32.mrb[142].mxu0 }
 0x73d   : > { %6330 = vmatprep.subr.bf16.mxu1 %v8832_v36  ;;  %v6289_v21 = vpop.f32.mrb[143].mxu0 }
 0x73f   : > { %6301 = vmatmul.mubr.msk.bf16.gmra.mrb[136].mxu1 %vm358_vm3, %v6731_v17 }
 0x740   : > { %6331 = vmatpush3.bf16.msra.mxu1 %v8036_v61  ;;  %6304 = vmatprep.mubr.msk.bf16.mxu1 %vm6807_vm0, %v8832_v36 }
 0x741   : > { %6362 = vmatprep.subr.bf16.mxu1 %v8832_v36 }
 0x742   : > { %v8167_v13 = vpop.f32.mrb[144].mxu0 }
 0x743   : > { %v6316_v10 = vpop.f32.mrb[145].mxu0 }
 0x744   : > { %v8169_v6 = vpop.f32.mrb[146].mxu0 }
 0x745   : > { %v6317_v5 = vpop.f32.mrb[147].mxu0 }
 0x747   : > { %6305 = vmatmul.mubr.msk.bf16.gmra.mrb[140].mxu1 %vm358_vm3, %v6732_v18 }
 0x748   : > { %6332 = vmatprep.mubr.msk.bf16.mxu1 %vm6807_vm0, %v8832_v36 }
 0x74a   : > { %v8171_v62 = vpop.f32.mrb[148].mxu0 }
 0x74b   : > { %v6320_v19 = vpop.f32.mrb[149].mxu0 }
 0x74c   : > { %v8173_v16 = vpop.f32.mrb[150].mxu0  ;;  %v6746_v19 = vld [vmem:[%s6903_s28 + $0x58] sm:$0x7f]  }
 0x74d   : > { %v6321_v0 = vpop.f32.mrb[151].mxu0 }
 0x74f   : > { %6333 = vmatmul.mubr.msk.bf16.vlgmr.msra.gmra.mrb[144].mxu1 %vm358_vm3, %v6733_v1 }
 0x750   : > { %6363 = vmatpush3.bf16.msra.mxu1 %v8025_v48  ;;  %6336 = vmatprep.mubr.msk.bf16.mxu1 %vm6807_vm0, %v8832_v36  ;;  %v6737_v48 = vld [vmem:[%s8804_s2 + $0xa0] sm:$0x7f]  }
 0x751   : > { %6364 = vmatprep.subr.bf16.mxu1 %v8832_v36 }
 0x752   : > { %v8176_v46 = vpop.f32.mrb[152].mxu0 }
 0x753   : > { %v6324_v55 = vpop.f32.mrb[153].mxu0 }
 0x754   : > { %6365 = vmatpush3.bf16.msra.mxu1 %v8033_v51  ;;  %v6739_v51 = vld [vmem:[%s8804_s2 + $0xa8] sm:$0xff]   ;;  %v8178_v45 = vpop.f32.mrb[154].mxu0 }
 0x755   : > { %6366 = vmatprep.subr.bf16.mxu1 %v8832_v36  ;;  %v6325_v54 = vpop.f32.mrb[155].mxu0 }
 0x757   : > { %6337 = vmatmul.mubr.msk.bf16.gmra.mrb[148].mxu1 %vm358_vm3, %v6735_v38 }
 0x758   : > { %6367 = vmatpush3.bf16.msra.mxu1 %v8036_v61  ;;  %6340 = vmatprep.mubr.msk.bf16.mxu1 %vm6807_vm0, %v8832_v36  ;;  %v6741_v61 = vld [vmem:[%s8804_s2 + $0xb0] sm:$0xff]  }
 0x759   : > { %6398 = vmatprep.subr.bf16.mxu1 %v8832_v36 }
 0x75a   : > { %v8180_v58 = vpop.f32.mrb[156].mxu0 }
 0x75b   : > { %v6352_v17 = vpop.f32.mrb[157].mxu0 }
 0x75c   : > { %v8183_v18 = vpop.f32.mrb[158].mxu0 }
 0x75d   : > { %v6353_v1 = vpop.f32.mrb[159].mxu0 }
 0x75f   : > { %6341 = vmatmul.mubr.msk.bf16.gmra.mrb[152].mxu1 %vm358_vm3, %v6737_v48 }
 0x760   : > { %6368 = vmatprep.mubr.msk.bf16.mxu1 %vm6807_vm0, %v8832_v36 }
 0x767   : > { %6369 = vmatmul.mubr.msk.bf16.vlgmr.msra.gmra.mrb[156].mxu1 %vm358_vm3, %v6739_v51  ;;  %v8186_v51 = vpop.f32.mrb[160].mxu0 }
 0x768   : > { %6372 = vmatprep.mubr.msk.bf16.mxu1 %vm6807_vm0, %v8832_v36  ;;  %v6356_v34 = vpop.f32.mrb[161].mxu0 }
 0x769   : > { %v8189_v22 = vpop.f32.mrb[162].mxu0 }
 0x76f   : > { %6373 = vmatmul.mubr.msk.bf16.gmra.mrb[160].mxu1 %vm358_vm3, %v6741_v61  ;;  %v6744_v61 = vld [vmem:[%s6903_s28 + $0x48] sm:$0xff]  }
 0x770   : > { %6376 = vmatprep.mubr.msk.bf16.mxu1 %vm6807_vm0, %v8832_v36 }
 0x777   : > { %6377 = vmatmul.mubr.msk.bf16.gmra.mrb[164].mxu1 %vm358_vm3, %v6743_v63  ;;  %v6357_v63 = vpop.f32.mrb[163].mxu0 }
 0x778   : > { %6404 = vmatprep.mubr.msk.bf16.mxu1 %vm6807_vm0, %v8832_v36  ;;  %v8195_v41 = vpop.f32.mrb[164].mxu0 }
 0x779   : > { %v6360_v60 = vpop.f32.mrb[165].mxu0 }
 0x77a   : > { %v8198_v21 = vpop.f32.mrb[166].mxu0 }
 0x77b   : > { %v6361_v10 = vpop.f32.mrb[167].mxu0 }
 0x783   : > { %v8203_v5 = vpop.f32.mrb[168].mxu0 }
 0x784   : > { %v6388_v0 = vpop.f32.mrb[169].mxu0 }
 0x794   : > { %v4041_v43 = vpop.permute.xlu1 %4040 }
 0x795   : > { %6417 = vmatpush3.bf16.msra.mxu0 %v4041_v43  ;;  %v8206_v43 = vpop.f32.mrb[170].mxu0 }
 0x796   : > { %6418 = vmatprep.subr.bf16.mxu0 %v8832_v36  ;;  %v6389_v55 = vpop.f32.mrb[171].mxu0 }
 0x797   : > { %v8211_v54 = vpop.f32.mrb[172].mxu0 }
 0x79e   : > { %v4043_v30 = vpop.permute.xlu0 %4042 }
 0x79f   : > { %6419 = vmatpush3.bf16.msra.mxu0 %v4043_v30  ;;  %v6392_v30 = vpop.f32.mrb[173].mxu0 }
 0x7a0   : > { %6420 = vmatprep.subr.bf16.mxu0 %v8832_v36  ;;  %v8213_v17 = vpop.f32.mrb[174].mxu0 }
 0x7a1   : > { %v6393_v1 = vpop.f32.mrb[175].mxu0 }
 0x7a8   : > { %v4045_v38 = vpop.permute.xlu1 %4044 }
 0x7a9   : > { %v4058_v48 = vand.u32 %v4045_v38, %v6916_v53  ;;  %v8215_v38 = vpop.f32.mrb[176].mxu0 }
 0x7ab   : > { %6421 = vmatpush3.bf16.msra.mxu0 %v4058_v48  ;;  %v6396_v48 = vpop.f32.mrb[177].mxu0 }
 0x7ac   : > { %6452 = vmatprep.subr.bf16.mxu0 %v8832_v36 }
 0x7ae   : > { %6423 = vmatmul.mubr.msk.bf16.vlgmr.msra.gmra.mrb[180].mxu0 %vm358_vm3, %v6744_v61  ;;  %v8217_v61 = vpop.f32.mrb[178].mxu0 }
 0x7af   : > { %6426 = vmatprep.mubr.msk.bf16.mxu0 %vm6807_vm0, %v8832_v36  ;;  %v6397_v34 = vpop.f32.mrb[179].mxu0 }
 0x7b6   : > { %6427 = vmatmul.mubr.msk.bf16.gmra.mrb[184].mxu0 %vm358_vm3, %v6745_v56 }
 0x7b7   : > { %6430 = vmatprep.mubr.msk.bf16.mxu0 %vm6807_vm0, %v8832_v36 }
 0x7be   : > { %6431 = vmatmul.mubr.msk.bf16.gmra.mrb[188].mxu0 %vm358_vm3, %v6746_v19 }
 0x7bf   : > { %6458 = vmatprep.mubr.msk.bf16.mxu0 %vm6807_vm0, %v8832_v36 }
 0x7da   : > { %v8219_v63 = vpop.f32.mrb[108].mxu1 }
 0x7db   : > { %8834 = vst [vmem:[#allocation12_spill] sm:$0xff] %v8219_v63  ;;  %v6226_v56 = vpop.f32.mrb[109].mxu1 }
 0x7dc   : > { %v8221_v60 = vpop.f32.mrb[110].mxu1 }
 0x7dd   : > { %8835 = vst [vmem:[#allocation13_spill] sm:$0xff] %v8221_v60  ;;  %v6227_v10 = vpop.f32.mrb[111].mxu1 }
 0x7e2   : > { %v8223_v19 = vpop.f32.mrb[112].mxu1 }
 0x7e3   : > { %8836 = vst [vmem:[#allocation14_spill] sm:$0xff] %v8223_v19  ;;  %v6230_v0 = vpop.f32.mrb[113].mxu1 }
 0x7e4   : > { %v8225_v55 = vpop.f32.mrb[114].mxu1 }
 0x7e5   : > { %8837 = vst [vmem:[#allocation15_spill] sm:$0xff] %v8225_v55  ;;  %v6231_v30 = vpop.f32.mrb[115].mxu1 }
 0x7ea   : > { %v8227_v9 = vpop.f32.mrb[116].mxu1 }
 0x7eb   : > { %8838 = vst [vmem:[#allocation16_spill] sm:$0xff] %v8227_v9  ;;  %v6234_v1 = vpop.f32.mrb[117].mxu1 }
 0x7ec   : > { %v8229_v33 = vpop.f32.mrb[118].mxu1 }
 0x7ed   : > { %8839 = vst [vmem:[#allocation17_spill] sm:$0xff] %v8229_v33  ;;  %v6235_v48 = vpop.f32.mrb[119].mxu1 }
 0x7f2   : > { %v3010_v3 = vpop.f32.mrb[120].mxu1 }
 0x7f3   : > { %v3095_v34 = vadd.f32 %v8146_v4, %v3010_v3  ;;  %v6262_v63 = vpop.f32.mrb[121].mxu1 }
 0x7f4   : > { %v3013_v56 = vpop.f32.mrb[122].mxu1 }
 0x7f5   : > { %v3117_v60 = vadd.f32 %v7783_v11, %v3095_v34  ;;  %v3098_v10 = vadd.f32 %v8149_v42, %v3013_v56  ;;  %v6263_v19 = vpop.f32.mrb[123].mxu1 }
 0x7f7   : > { %v3118_v0 = vadd.f32 %v7790_v27, %v3098_v10  ;;  %3125 = vperm.xlu0 %6661, %v3117_v60  }
 0x7f9   : > { %3130 = vperm.xlu1 %6662, %v3118_v0  }
 0x7fa   : > { %v3018_v30 = vpop.f32.mrb[124].mxu1 }
 0x7fb   : > { %v3103_v1 = vadd.f32 %v8157_v28, %v3018_v30  ;;  %v6266_v55 = vpop.f32.mrb[125].mxu1 }
 0x7fc   : > { %v3021_v33 = vpop.f32.mrb[126].mxu1 }
 0x7fd   : > { %v3119_v48 = vadd.f32 %v7797_v24, %v3103_v1  ;;  %v3106_v3 = vadd.f32 %v8161_v57, %v3021_v33  ;;  %v6267_v4 = vpop.f32.mrb[127].mxu1 }
 0x7ff   : > { %v3120_v63 = vadd.f32 %v7804_v15, %v3106_v3  ;;  %3135 = vperm.xlu1 %6662, %v3119_v48  }
 0x801   : > { %3140 = vperm.xlu0 %6661, %v3120_v63  }
 0x802   : > { %v3026_v11 = vpop.f32.mrb[128].mxu1 }
 0x803   : > { %v3111_v42 = vadd.f32 %v8163_v14, %v3026_v11  ;;  %v6270_v27 = vpop.f32.mrb[129].mxu1 }
 0x804   : > { %v3029_v60 = vpop.f32.mrb[130].mxu1 }
 0x805   : > { %v3121_v19 = vadd.f32 %v7811_v8, %v3111_v42  ;;  %v3114_v28 = vadd.f32 %v8165_v26, %v3029_v60  ;;  %v6271_v55 = vpop.f32.mrb[131].mxu1 }
 0x807   : > { %v3122_v34 = vadd.f32 %v7818_v12, %v3114_v28  ;;  %3145 = vperm.xlu1 %6662, %v3121_v19  }
 0x809   : > { %3150 = vperm.xlu0 %6661, %v3122_v34  }
 0x80a   : > { %v3229_v33 = vpop.f32.mrb[132].mxu1 }
 0x80b   : > { %v3311_v24 = vadd.f32 %v8167_v13, %v3229_v33  ;;  %v6298_v15 = vpop.f32.mrb[133].mxu1 }
 0x80c   : > { %v3232_v57 = vpop.f32.mrb[134].mxu1 }
 0x80d   : > { %v3333_v56 = vadd.f32 %v3311_v24, %v7305_v39  ;;  %v3314_v14 = vadd.f32 %v8169_v6, %v3232_v57  ;;  %v6299_v10 = vpop.f32.mrb[135].mxu1 }
 0x80f   : > { %v3334_v0 = vadd.f32 %v3314_v14, %v7308_v25  ;;  %3341 = vperm.xlu1 %6662, %v3333_v56  }
 0x811   : > { %3346 = vperm.xlu0 %6661, %v3334_v0  }
 0x812   : > { %v3237_v8 = vpop.f32.mrb[136].mxu1 }
 0x813   : > { %v3319_v26 = vadd.f32 %v8171_v62, %v3237_v8  ;;  %v6302_v12 = vpop.f32.mrb[137].mxu1 }
 0x814   : > { %v3240_v30 = vpop.f32.mrb[138].mxu1 }
 0x815   : > { %v3335_v1 = vadd.f32 %v3319_v26, %v7320_v47  ;;  %v3322_v13 = vadd.f32 %v8173_v16, %v3240_v30  ;;  %v6303_v48 = vpop.f32.mrb[139].mxu1 }
 0x817   : > { %v3336_v3 = vadd.f32 %v3322_v13, %v7323_v50  ;;  %3351 = vperm.xlu1 %6662, %v3335_v1  }
 0x819   : > { %3356 = vperm.xlu0 %6661, %v3336_v3  }
 0x81a   : > { %v3245_v6 = vpop.f32.mrb[140].mxu1 }
 0x81b   : > { %v3327_v4 = vadd.f32 %v8176_v46, %v3245_v6  ;;  %v6306_v63 = vpop.f32.mrb[141].mxu1 }
 0x81c   : > { %v3248_v11 = vpop.f32.mrb[142].mxu1 }
 0x81d   : > { %v3337_v42 = vadd.f32 %v3327_v4, %v7333_v7  ;;  %v3330_v62 = vadd.f32 %v8178_v45, %v3248_v11  ;;  %v6307_v27 = vpop.f32.mrb[143].mxu1 }
 0x81f   : > { %v3338_v60 = vadd.f32 %v3330_v62, %v7336_v37  ;;  %3361 = vperm.xlu1 %6662, %v3337_v42  }
 0x821   : > { %3366 = vperm.xlu0 %6661, %v3338_v60  }
 0x822   : > { %v3451_v16 = vpop.f32.mrb[144].mxu1 }
 0x823   : > { %v3533_v19 = vadd.f32 %v8180_v58, %v3451_v16  ;;  %v6334_v28 = vpop.f32.mrb[145].mxu1 }
 0x824   : > { %v3454_v55 = vpop.f32.mrb[146].mxu1 }
 0x825   : > { %v3555_v34 = vadd.f32 %v3533_v19, %v7313_v31  ;;  %v3536_v46 = vadd.f32 %v8183_v18, %v3454_v55  ;;  %v6335_v33 = vpop.f32.mrb[147].mxu1 }
 0x827   : > { %v3556_v24 = vadd.f32 %v3536_v46, %v7315_v35  ;;  %3563 = vperm.xlu1 %6662, %v3555_v34  }
 0x829   : > { %3568 = vperm.xlu0 %6661, %v3556_v24   ;;  %v8840_v24 = vld [vmem:[#allocation2_spill] sm:$0xff] }
 0x82a   : > { %v3459_v45 = vpop.f32.mrb[148].mxu1 }
 0x82b   : > { %v3541_v15 = vadd.f32 %v8186_v51, %v3459_v45  ;;  %v6338_v57 = vpop.f32.mrb[149].mxu1 }
 0x82c   : > { %v3462_v56 = vpop.f32.mrb[150].mxu1 }
 0x82d   : > { %v3557_v14 = vadd.f32 %v3541_v15, %v7345_v32  ;;  %v3544_v58 = vadd.f32 %v8189_v22, %v3462_v56  ;;  %v6339_v10 = vpop.f32.mrb[151].mxu1 }
 0x82f   : > { %v3558_v0 = vadd.f32 %v3544_v58, %v7348_v44  ;;  %3573 = vperm.xlu1 %6662, %v3557_v14  }
 0x831   : > { %3578 = vperm.xlu0 %6661, %v3558_v0  }
 0x832   : > { %v3467_v18 = vpop.f32.mrb[152].mxu1 }
 0x833   : > { %v3549_v8 = vadd.f32 %v8195_v41, %v3467_v18  ;;  %v6342_v26 = vpop.f32.mrb[153].mxu1 }
 0x834   : > { %v3470_v12 = vpop.f32.mrb[154].mxu1 }
 0x835   : > { %v3559_v30 = vadd.f32 %v3549_v8, %v7353_v52  ;;  %v3552_v51 = vadd.f32 %v8198_v21, %v3470_v12  ;;  %v6343_v1 = vpop.f32.mrb[155].mxu1 }
 0x836   : > { %v6747_v1 = vld [vmem:[%s8804_s2] sm:$0xff]  }
 0x837   : > { %v3560_v13 = vadd.f32 %v3552_v51, %v7356_v49  ;;  %3583 = vperm.xlu1 %6662, %v3559_v30  }
 0x839   : > { %3588 = vperm.xlu0 %6661, %v3560_v13  }
 0x83a   : > { %v3673_v22 = vpop.f32.mrb[156].mxu1 }
 0x83b   : > { %v3755_v48 = vadd.f32 %v8203_v5, %v3673_v22  ;;  %v6370_v3 = vpop.f32.mrb[157].mxu1 }
 0x83c   : > { %v3676_v6 = vpop.f32.mrb[158].mxu1  ;;  %v6748_v3 = vld [vmem:[%s8804_s2 + $0x8] sm:$0xff]  }
 0x83d   : > { %v3777_v4 = vadd.f32 %v3755_v48, %v7326_v59  ;;  %v3758_v41 = vadd.f32 %v8206_v43, %v3676_v6  ;;  %v6371_v63 = vpop.f32.mrb[159].mxu1 }
 0x83f   : > { %v3778_v11 = vadd.f32 %v3758_v41, %v7330_v2  ;;  %3785 = vperm.xlu1 %6662, %v3777_v4  }
 0x841   : > { %3790 = vperm.xlu0 %6661, %v3778_v11   ;;  %v6749_v11 = vld [vmem:[%s8804_s2 + $0x10] sm:$0x7f]  }
 0x842   : > { %v3681_v21 = vpop.f32.mrb[160].mxu1 }
 0x843   : > { %v3763_v42 = vadd.f32 %v8211_v54, %v3681_v21  ;;  %v6374_v62 = vpop.f32.mrb[161].mxu1 }
 0x844   : > { %v3684_v27 = vpop.f32.mrb[162].mxu1 }
 0x845   : > { %v3779_v60 = vadd.f32 %v3763_v42, %v7365_v20  ;;  %v3766_v5 = vadd.f32 %v8213_v17, %v3684_v27  ;;  %v6375_v16 = vpop.f32.mrb[163].mxu1 }
 0x847   : > { %v3780_v19 = vadd.f32 %v3766_v5, %v7368_v23  ;;  %3795 = vperm.xlu1 %6662, %v3779_v60   ;;  %v6750_v60 = vld [vmem:[%s8804_s2 + $0x18] sm:$0xff]  }
 0x849   : > { %3800 = vperm.xlu0 %6661, %v3780_v19  }
 0x84a   : > { %v3689_v43 = vpop.f32.mrb[164].mxu1 }
 0x84b   : > { %v3771_v28 = vadd.f32 %v8215_v38, %v3689_v43  ;;  %v6378_v55 = vpop.f32.mrb[165].mxu1 }
 0x84c   : > { %v3692_v34 = vpop.f32.mrb[166].mxu1 }
 0x84d   : > { %v3781_v46 = vadd.f32 %v3771_v28, %v7373_v29  ;;  %v3774_v54 = vadd.f32 %v8217_v61, %v3692_v34  ;;  %v6379_v33 = vpop.f32.mrb[167].mxu1  ;;  %v6751_v28 = vld [vmem:[%s8804_s2 + $0x20] sm:$0xff]  }
 0x84f   : > { %v3782_v45 = vadd.f32 %v3774_v54, %v8840_v24  ;;  %3805 = vperm.xlu1 %6662, %v3781_v46  }
 0x851   : > { %3810 = vperm.xlu0 %6661, %v3782_v45   ;;  %v8841_v45 = vld [vmem:[#allocation3_spill] sm:$0xff] }
 0x876   : > { %v3126_v22 = vpop.permute.xlu0 %3125 }
 0x878   : > { %v3131_v13 = vpop.permute.xlu1 %3130 }
 0x87e   : > { %v3136_v48 = vpop.permute.xlu1 %3135 }
 0x880   : > { %v3141_v6 = vpop.permute.xlu0 %3140 }
 0x881   : > { %v4094_v17 = vpop.f32.mrb[180].mxu0 }
 0x882   : > { %v6424_v15 = vpop.f32.mrb[181].mxu0 }
 0x883   : > { %v4097_v57 = vpop.f32.mrb[182].mxu0  ;;  %v3154_v15 = vmul.f32 %v3131_v13, %v8841_v45 }
 0x884   : > { %v8279_v56 = vpack.c.bf16 %v4097_v57, %v4094_v17  ;;  %v6425_v14 = vpop.f32.mrb[183].mxu0  ;;  %v3153_v17 = vmul.f32 %v3126_v22, %v8841_v45  ;;  %v8842_v57 = vld [vmem:[#allocation4_spill] sm:$0xff] }
 0x886   : > { %6453 = vmatpush3.bf16.msra.mxu0 %v8279_v56  ;;  %v8308_v4 = vpop.permute.xlu1 %3145 }
 0x887   : > { %6454 = vmatprep.subr.bf16.mxu0 %v8832_v36 }
 0x888   : > { %v8311_v41 = vpop.permute.xlu0 %3150 }
 0x889   : > { %v4102_v38 = vpop.f32.mrb[184].mxu0 }
 0x88a   : > { %v6428_v58 = vpop.f32.mrb[185].mxu0 }
 0x88b   : > { %v4105_v10 = vpop.f32.mrb[186].mxu0 }
 0x88c   : > { %v8283_v0 = vpack.c.bf16 %v4105_v10, %v4102_v38  ;;  %v6429_v61 = vpop.f32.mrb[187].mxu0 }
 0x88e   : > { %6455 = vmatpush3.bf16.msra.mxu0 %v8283_v0  ;;  %v3342_v63 = vpop.permute.xlu1 %3341 }
 0x88f   : > { %6456 = vmatprep.subr.bf16.mxu0 %v8832_v36  ;;  %v3369_v46 = vmul.f32 %v3342_v63, %v7423_v40 }
 0x890   : > { %v3347_v21 = vpop.permute.xlu0 %3346 }
 0x891   : > { %v4110_v18 = vpop.f32.mrb[188].mxu0  ;;  %v3370_v54 = vmul.f32 %v3347_v21, %v7423_v40  ;;  %v3375_v10 = vadd.f32 %v3369_v46, %v3153_v17 }
 0x892   : > { %v6432_v8 = vpop.f32.mrb[189].mxu0 }
 0x893   : > { %v4113_v26 = vpop.f32.mrb[190].mxu0  ;;  %v3376_v61 = vadd.f32 %v3370_v54, %v3154_v15 }
 0x894   : > { %v8287_v12 = vpack.c.bf16 %v4113_v26, %v4110_v18  ;;  %v6433_v30 = vpop.f32.mrb[191].mxu0  ;;  %v8843_v18 = vld [vmem:[#allocation5_spill] sm:$0xff]  ;;  %v6752_v26 = vld [vmem:[%s8804_s2 + $0x28] sm:$0x7f]  }
 0x896   : > { %v8291_v51 = vand.u32 %v8287_v12, %v6916_v53  ;;  %v3352_v42 = vpop.permute.xlu1 %3351 }
 0x898   : > { %6457 = vmatpush3.bf16.msra.mxu0 %v8291_v51  ;;  %v3357_v62 = vpop.permute.xlu0 %3356 }
 0x899   : > { %6488 = vmatprep.subr.bf16.mxu0 %v8832_v36  ;;  %v3372_v63 = vmul.f32 %v3357_v62, %v7423_v40 }
 0x89b   : > { %6459 = vmatmul.mubr.msk.bf16.vlgmr.msra.gmra.mrb[192].mxu0 %vm358_vm3, %v6747_v1 }
 0x89c   : > { %6462 = vmatprep.mubr.msk.bf16.mxu0 %vm6807_vm0, %v8832_v36  ;;  %6489 = vmatpush3.bf16.msra.mxu0 %v8279_v56 }
 0x89d   : > { %6490 = vmatprep.subr.bf16.mxu0 %v8832_v36 }
 0x89e   : > { %v3362_v27 = vpop.permute.xlu1 %3361 }
 0x8a0   : > { %6491 = vmatpush3.bf16.msra.mxu0 %v8283_v0  ;;  %v3367_v5 = vpop.permute.xlu0 %3366 }
 0x8a1   : > { %6492 = vmatprep.subr.bf16.mxu0 %v8832_v36 }
 0x8a3   : > { %6463 = vmatmul.mubr.msk.bf16.gmra.mrb[196].mxu0 %vm358_vm3, %v6748_v3  ;;  %v3371_v3 = vmul.f32 %v3352_v42, %v7423_v40 }
 0x8a4   : > { %6466 = vmatprep.mubr.msk.bf16.mxu0 %vm6807_vm0, %v8832_v36  ;;  %6493 = vmatpush3.bf16.msra.mxu0 %v8291_v51 }
 0x8a5   : > { %6524 = vmatprep.subr.bf16.mxu0 %v8832_v36 }
 0x8a6   : > { %v3564_v16 = vpop.permute.xlu1 %3563 }
 0x8a7   : > { %v3591_v14 = vmul.f32 %v3564_v16, %v8842_v57  ;;  %v3156_v16 = vmul.f32 %v3141_v6, %v8841_v45 }
 0x8a8   : > { %v3569_v19 = vpop.permute.xlu0 %3568 }
 0x8a9   : > { %v3592_v38 = vmul.f32 %v3569_v19, %v8842_v57  ;;  %v3597_v1 = vadd.f32 %v3591_v14, %v3375_v10  ;;  %v3378_v17 = vadd.f32 %v3372_v63, %v3156_v16 }
 0x8ab   : > { %6467 = vmatmul.mubr.msk.bf16.gmra.mrb[200].mxu0 %vm358_vm3, %v6749_v11  ;;  %v3598_v22 = vadd.f32 %v3592_v38, %v3376_v61  ;;  %v3157_v61 = vmul.f32 %v8308_v4, %v8841_v45 }
 0x8ac   : > { %6494 = vmatprep.mubr.msk.bf16.mxu0 %vm6807_vm0, %v8832_v36 }
 0x8ae   : > { %v3574_v43 = vpop.permute.xlu1 %3573 }
 0x8af   : > { %v3593_v19 = vmul.f32 %v3574_v43, %v8842_v57  ;;  %v3373_v43 = vmul.f32 %v3362_v27, %v7423_v40 }
 0x8b0   : > { %v3579_v55 = vpop.permute.xlu0 %3578 }
 0x8b3   : > { %6495 = vmatmul.mubr.msk.bf16.vlgmr.msra.gmra.mrb[204].mxu0 %vm358_vm3, %v6750_v60  ;;  %v3155_v60 = vmul.f32 %v3136_v48, %v8841_v45  ;;  %v6753_v48 = vld [vmem:[%s8804_s2 + $0x30] sm:$0xff]  }
 0x8b4   : > { %6498 = vmatprep.mubr.msk.bf16.mxu0 %vm6807_vm0, %v8832_v36  ;;  %6525 = vmatpush3.bf16.msra.mxu0 %v8279_v56 }
 0x8b5   : > { %6526 = vmatprep.subr.bf16.mxu0 %v8832_v36  ;;  %v3377_v42 = vadd.f32 %v3371_v3, %v3155_v60  ;;  %v6769_v60 = vld [vmem:[%s8804_s2 + $0x58] sm:$0x7f]  }
 0x8b6   : > { %v3584_v34 = vpop.permute.xlu1 %3583 }
 0x8b7   : > { %v3599_v14 = vadd.f32 %v3593_v19, %v3377_v42 }
 0x8b8   : > { %6527 = vmatpush3.bf16.msra.mxu0 %v8283_v0  ;;  %v3589_v33 = vpop.permute.xlu0 %3588 }
 0x8b9   : > { %6528 = vmatprep.subr.bf16.mxu0 %v8832_v36  ;;  %v3596_v27 = vmul.f32 %v3589_v33, %v8842_v57 }
 0x8bb   : > { %6499 = vmatmul.mubr.msk.bf16.gmra.mrb[208].mxu0 %vm358_vm3, %v6751_v28  ;;  %v3594_v28 = vmul.f32 %v3579_v55, %v8842_v57  ;;  %v3374_v55 = vmul.f32 %v3367_v5, %v7423_v40 }
 0x8bc   : > { %6502 = vmatprep.mubr.msk.bf16.mxu0 %vm6807_vm0, %v8832_v36  ;;  %6529 = vmatpush3.bf16.msra.mxu0 %v8291_v51 }
 0x8bd   : > { %6560 = vmatprep.subr.bf16.mxu0 %v8832_v36  ;;  %v3600_v38 = vadd.f32 %v3594_v28, %v3378_v17 }
 0x8be   : > { %v3786_v58 = vpop.permute.xlu1 %3785 }
 0x8bf   : > { %v3813_v8 = vmul.f32 %v3786_v58, %v8843_v18 }
 0x8c0   : > { %v3791_v30 = vpop.permute.xlu0 %3790 }
 0x8c1   : > { %v3814_v13 = vmul.f32 %v3791_v30, %v8843_v18  ;;  %v3819_v11 = vadd.f32 %v3813_v8, %v3597_v1  ;;  %v3158_v8 = vmul.f32 %v8311_v41, %v8841_v45  ;;  %v3379_v1 = vadd.f32 %v3373_v43, %v3157_v61  ;;  %v6757_v43 = vld [vmem:[%s8804_s2 + $0x78] sm:$0xff]  }
 0x8c2   : > { %v6762_v61 = vld [vmem:[%s8804_s2 + $0x98] sm:$0xff]  }
 0x8c3   : > { %v3820_v21 = vadd.f32 %v3814_v13, %v3598_v22  ;;  %6503 = vmatmul.mubr.msk.bf16.gmra.mrb[212].mxu0 %vm358_vm3, %v6752_v26  ;;  %v3595_v26 = vmul.f32 %v3584_v34, %v8842_v57  ;;  %v3380_v22 = vadd.f32 %v3374_v55, %v3158_v8  ;;  %v6758_v55 = vld [vmem:[%s8804_s2 + $0x80] sm:$0xff]  }
 0x8c4   : > { %6530 = vmatprep.mubr.msk.bf16.mxu0 %vm6807_vm0, %v8832_v36  ;;  %v6764_v8 = vld [vmem:[%s8804_s2 + $0xa0] sm:$0x7f]  }
 0x8c5   : > { %v3825_v46 = vpack.c.bf16 %v3820_v21, %v3819_v11  ;;  %v3601_v3 = vadd.f32 %v3595_v26, %v3379_v1  ;;  %v3602_v63 = vadd.f32 %v3596_v27, %v3380_v22  ;;  %v6761_v21 = vld [vmem:[%s8804_s2 + $0x38] sm:$0xff]   ;;  %v6766_v26 = vld [vmem:[%s8804_s2 + $0xa8] sm:$0xff]   ;;  %v6768_v27 = vld [vmem:[%s8804_s2 + $0xb0] sm:$0xff]  }
 0x8c6   : > { %v3796_v54 = vpop.permute.xlu1 %3795 }
 0x8c7   : > { %v3815_v62 = vmul.f32 %v3796_v54, %v8843_v18  ;;  %3831 = vrot.lane.b32.xlu1 %v3825_v46, %s6812_s14  ;;  %v6783_v54 = vld [vmem:[%s6903_s28 + $0x30] sm:$0xff]  }
 0x8c8   : > { %v3801_v15 = vpop.permute.xlu0 %3800 }
 0x8c9   : > { %v3816_v6 = vmul.f32 %v3801_v15, %v8843_v18  ;;  %v3821_v58 = vadd.f32 %v3815_v62, %v3599_v14  ;;  %v6785_v15 = vld [vmem:[%s6903_s28 + $0x40] sm:$0x7f]  }
 0x8ca   : > { %v6754_v14 = vld [vmem:[%s8804_s2 + $0x60] sm:$0xff]  }
 0x8cb   : > { %v3822_v10 = vadd.f32 %v3816_v6, %v3600_v38  ;;  %6531 = vmatmul.mubr.msk.bf16.vlgmr.msra.gmra.mrb[216].mxu0 %vm358_vm3, %v6753_v48  ;;  %v6784_v48 = vld [vmem:[%s6903_s28 + $0x38] sm:$0xff]   ;;  %v6755_v38 = vld [vmem:[%s8804_s2 + $0x68] sm:$0xff]   ;;  %v6756_v6 = vld [vmem:[%s8804_s2 + $0x70] sm:$0x7f]  }
 0x8cc   : > { %6561 = vmatpush3.bf16.msra.mxu0 %v8279_v56  ;;  %6534 = vmatprep.mubr.msk.bf16.mxu0 %vm6807_vm0, %v8832_v36 }
 0x8cd   : > { %v3826_v5 = vpack.c.bf16 %v3822_v10, %v3821_v58  ;;  %6562 = vmatprep.subr.bf16.mxu0 %v8832_v36  ;;  %v6759_v58 = vld [vmem:[%s8804_s2 + $0x88] sm:$0x7f]   ;;  %v6760_v10 = vld [vmem:[%s8804_s2 + $0x90] sm:$0xff]  }
 0x8ce   : > { %v3806_v30 = vpop.permute.xlu1 %3805 }
 0x8cf   : > { %v3817_v4 = vmul.f32 %v3806_v30, %v8843_v18  ;;  %3833 = vrot.lane.b32.xlu0 %v3826_v5, %s6812_s14 }
 0x8d0   : > { %v3811_v13 = vpop.permute.xlu0 %3810  ;;  %6563 = vmatpush3.bf16.msra.mxu0 %v8283_v0 }
 0x8d1   : > { %v3818_v41 = vmul.f32 %v3811_v13, %v8843_v18  ;;  %6564 = vmatprep.subr.bf16.mxu0 %v8832_v36  ;;  %v3823_v34 = vadd.f32 %v3817_v4, %v3601_v3  ;;  %v6770_v4 = vld [vmem:[%s8804_s2 + $0xb8] sm:$0x7f]  }
 0x8d3   : > { %v3824_v33 = vadd.f32 %v3818_v41, %v3602_v63  ;;  %4150 = vrot.lane.b32.xlu0 %v8279_v56, %s6809_s29  ;;  %6535 = vmatmul.mubr.msk.bf16.gmra.mrb[220].mxu0 %vm358_vm3, %v6761_v21  ;;  %v6763_v56 = vld [vmem:[%s8804_s2 + $0x40] sm:$0x7f]  }
 0x8d4   : > { %6565 = vmatpush3.bf16.msra.mxu0 %v8291_v51  ;;  %6538 = vmatprep.mubr.msk.bf16.mxu0 %vm6807_vm0, %v8832_v36 }
 0x8d5   : > { %v3827_v11 = vpack.c.bf16 %v3824_v33, %v3823_v34 }
 0x8d7   : > { %3835 = vrot.lane.b32.xlu1 %v3827_v11, %s6812_s14  ;;  %4154 = vrot.lane.b32.xlu0 %v8287_v12, %s6809_s29  ;;  %v6767_v12 = vld [vmem:[%s8804_s2 + $0x50] sm:$0xff]  }
 0x8db   : > { %4152 = vrot.lane.b32.xlu1 %v8283_v0, %s6809_s29  ;;  %6539 = vmatmul.mubr.msk.bf16.gmra.mrb[224].mxu0 %vm358_vm3, %v6763_v56  ;;  %v6765_v0 = vld [vmem:[%s8804_s2 + $0x48] sm:$0xff]   ;;  %s6814_s29 = smov 106  }
 0x8dc   : > { %6566 = vmatprep.mubr.msk.bf16.mxu0 %vm6807_vm0, %v8832_v36 }
 0x8e3   : > { %6567 = vmatmul.mubr.msk.bf16.vlgmr.msra.gmra.mrb[228].mxu0 %vm358_vm3, %v6765_v0 }
 0x8e4   : > { %6570 = vmatprep.mubr.msk.bf16.mxu0 %vm6807_vm0, %v8832_v36 }
 0x8eb   : > { %6571 = vmatmul.mubr.msk.bf16.gmra.mrb[232].mxu0 %vm358_vm3, %v6767_v12 }
 0x8ec   : > { %6574 = vmatprep.mubr.msk.bf16.mxu0 %vm6807_vm0, %v8832_v36 }
 0x8f3   : > { %6575 = vmatmul.mubr.msk.bf16.gmra.mrb[236].mxu0 %vm358_vm3, %v6769_v60 }
 0x939   : > { %v3832_v51 = vpop.permute.xlu1 %3831 }
 0x93a   : > { %6399 = vmatpush3.bf16.msra.mxu1 %v3832_v51 }
 0x93b   : > { %6400 = vmatprep.subr.bf16.mxu1 %v8832_v36 }
 0x941   : > { %v3834_v16 = vpop.permute.xlu0 %3833 }
 0x942   : > { %6401 = vmatpush3.bf16.msra.mxu1 %v3834_v16 }
 0x943   : > { %6402 = vmatprep.subr.bf16.mxu1 %v8832_v36 }
 0x945   : > { %v4151_v46 = vpop.permute.xlu0 %4150 }
 0x949   : > { %v3836_v19 = vpop.permute.xlu1 %3835  ;;  %v4155_v17 = vpop.permute.xlu0 %4154 }
 0x94a   : > { %v3840_v28 = vand.u32 %v3836_v19, %v6916_v53  ;;  %v4168_v62 = vand.u32 %v4155_v17, %v6916_v53 }
 0x94c   : > { %6403 = vmatpush3.bf16.msra.mxu1 %v3840_v28 }
 0x94d   : > { %6434 = vmatprep.subr.bf16.mxu1 %v8832_v36  ;;  %v4153_v42 = vpop.permute.xlu1 %4152 }
 0x94f   : > { %6405 = vmatmul.mubr.msk.bf16.vlgmr.msra.gmra.mrb[168].mxu1 %vm358_vm3, %v6783_v54 }
 0x950   : > { %6435 = vmatpush3.bf16.msra.mxu1 %v4151_v46  ;;  %6408 = vmatprep.mubr.msk.bf16.mxu1 %vm6807_vm0, %v8832_v36 }
 0x951   : > { %6436 = vmatprep.subr.bf16.mxu1 %v8832_v36 }
 0x954   : > { %6437 = vmatpush3.bf16.msra.mxu1 %v4153_v42 }
 0x955   : > { %6438 = vmatprep.subr.bf16.mxu1 %v8832_v36 }
 0x957   : > { %6409 = vmatmul.mubr.msk.bf16.gmra.mrb[172].mxu1 %vm358_vm3, %v6784_v48 }
 0x958   : > { %6412 = vmatprep.mubr.msk.bf16.mxu1 %vm6807_vm0, %v8832_v36  ;;  %6439 = vmatpush3.bf16.msra.mxu1 %v4168_v62 }
 0x959   : > { %6470 = vmatprep.subr.bf16.mxu1 %v8832_v36 }
 0x95f   : > { %6413 = vmatmul.mubr.msk.bf16.gmra.mrb[176].mxu1 %vm358_vm3, %v6785_v15 }
 0x960   : > { %6440 = vmatprep.mubr.msk.bf16.mxu1 %vm6807_vm0, %v8832_v36 }
 0x967   : > { %6441 = vmatmul.mubr.msk.bf16.vlgmr.msra.gmra.mrb[180].mxu1 %vm358_vm3, %v6754_v14 }
 0x968   : > { %6471 = vmatpush3.bf16.msra.mxu1 %v4151_v46  ;;  %6444 = vmatprep.mubr.msk.bf16.mxu1 %vm6807_vm0, %v8832_v36 }
 0x969   : > { %6472 = vmatprep.subr.bf16.mxu1 %v8832_v36 }
 0x96c   : > { %6473 = vmatpush3.bf16.msra.mxu1 %v4153_v42 }
 0x96d   : > { %6474 = vmatprep.subr.bf16.mxu1 %v8832_v36 }
 0x96e   : > { %v8513_v5 = vpop.f32.mrb[192].mxu0 }
 0x96f   : > { %6445 = vmatmul.mubr.msk.bf16.gmra.mrb[184].mxu1 %vm358_vm3, %v6755_v38  ;;  %v6460_v30 = vpop.f32.mrb[193].mxu0 }
 0x970   : > { %6475 = vmatpush3.bf16.msra.mxu1 %v4168_v62  ;;  %6448 = vmatprep.mubr.msk.bf16.mxu1 %vm6807_vm0, %v8832_v36  ;;  %v8516_v1 = vpop.f32.mrb[194].mxu0 }
 0x971   : > { %6506 = vmatprep.subr.bf16.mxu1 %v8832_v36  ;;  %v6461_v22 = vpop.f32.mrb[195].mxu0 }
 0x976   : > { %v8524_v13 = vpop.f32.mrb[196].mxu0 }
 0x977   : > { %6449 = vmatmul.mubr.msk.bf16.gmra.mrb[188].mxu1 %vm358_vm3, %v6756_v6  ;;  %v6464_v3 = vpop.f32.mrb[197].mxu0 }
 0x978   : > { %6476 = vmatprep.mubr.msk.bf16.mxu1 %vm6807_vm0, %v8832_v36  ;;  %v8528_v63 = vpop.f32.mrb[198].mxu0 }
 0x979   : > { %v6465_v41 = vpop.f32.mrb[199].mxu0 }
 0x97e   : > { %v8530_v34 = vpop.f32.mrb[200].mxu0 }
 0x97f   : > { %6477 = vmatmul.mubr.msk.bf16.vlgmr.msra.gmra.mrb[192].mxu1 %vm358_vm3, %v6757_v43  ;;  %v6468_v33 = vpop.f32.mrb[201].mxu0 }
 0x980   : > { %6507 = vmatpush3.bf16.msra.mxu1 %v4151_v46  ;;  %6480 = vmatprep.mubr.msk.bf16.mxu1 %vm6807_vm0, %v8832_v36  ;;  %v8532_v11 = vpop.f32.mrb[202].mxu0 }
 0x981   : > { %6508 = vmatprep.subr.bf16.mxu1 %v8832_v36  ;;  %v6469_v21 = vpop.f32.mrb[203].mxu0 }
 0x984   : > { %6509 = vmatpush3.bf16.msra.mxu1 %v4153_v42 }
 0x985   : > { %6510 = vmatprep.subr.bf16.mxu1 %v8832_v36 }
 0x986   : > { %v8534_v56 = vpop.f32.mrb[204].mxu0 }
 0x987   : > { %6481 = vmatmul.mubr.msk.bf16.gmra.mrb[196].mxu1 %vm358_vm3, %v6758_v55  ;;  %v6496_v0 = vpop.f32.mrb[205].mxu0 }
 0x988   : > { %6511 = vmatpush3.bf16.msra.mxu1 %v4168_v62  ;;  %6484 = vmatprep.mubr.msk.bf16.mxu1 %vm6807_vm0, %v8832_v36  ;;  %v8536_v12 = vpop.f32.mrb[206].mxu0 }
 0x989   : > { %6542 = vmatprep.subr.bf16.mxu1 %v8832_v36  ;;  %v6497_v51 = vpop.f32.mrb[207].mxu0 }
 0x98e   : > { %v8538_v60 = vpop.f32.mrb[208].mxu0 }
 0x98f   : > { %6485 = vmatmul.mubr.msk.bf16.gmra.mrb[200].mxu1 %vm358_vm3, %v6759_v58  ;;  %v6500_v16 = vpop.f32.mrb[209].mxu0 }
 0x990   : > { %6512 = vmatprep.mubr.msk.bf16.mxu1 %vm6807_vm0, %v8832_v36  ;;  %v8540_v19 = vpop.f32.mrb[210].mxu0 }
 0x991   : > { %v6501_v28 = vpop.f32.mrb[211].mxu0 }
 0x997   : > { %6513 = vmatmul.mubr.msk.bf16.vlgmr.msra.gmra.mrb[204].mxu1 %vm358_vm3, %v6760_v10 }
 0x998   : > { %6543 = vmatpush3.bf16.msra.mxu1 %v4151_v46  ;;  %6516 = vmatprep.mubr.msk.bf16.mxu1 %vm6807_vm0, %v8832_v36  ;;  %v8542_v46 = vpop.f32.mrb[212].mxu0 }
 0x999   : > { %6544 = vmatprep.subr.bf16.mxu1 %v8832_v36  ;;  %v6504_v54 = vpop.f32.mrb[213].mxu0 }
 0x99c   : > { %6545 = vmatpush3.bf16.msra.mxu1 %v4153_v42  ;;  %v8544_v42 = vpop.f32.mrb[214].mxu0 }
 0x99d   : > { %6546 = vmatprep.subr.bf16.mxu1 %v8832_v36  ;;  %v6505_v17 = vpop.f32.mrb[215].mxu0 }
 0x99f   : > { %6517 = vmatmul.mubr.msk.bf16.gmra.mrb[208].mxu1 %vm358_vm3, %v6762_v61 }
 0x9a0   : > { %6547 = vmatpush3.bf16.msra.mxu1 %v4168_v62  ;;  %6520 = vmatprep.mubr.msk.bf16.mxu1 %vm6807_vm0, %v8832_v36  ;;  %v8546_v62 = vpop.f32.mrb[216].mxu0 }
 0x9a1   : > { %6578 = vmatprep.subr.bf16.mxu1 %v8832_v36  ;;  %v6532_v48 = vpop.f32.mrb[217].mxu0 }
 0x9a2   : > { %v8548_v15 = vpop.f32.mrb[218].mxu0 }
 0x9a3   : > { %v6533_v14 = vpop.f32.mrb[219].mxu0 }
 0x9a6   : > { %v8550_v38 = vpop.f32.mrb[220].mxu0 }
 0x9a7   : > { %6521 = vmatmul.mubr.msk.bf16.gmra.mrb[212].mxu1 %vm358_vm3, %v6764_v8  ;;  %v6536_v6 = vpop.f32.mrb[221].mxu0 }
 0x9a8   : > { %6548 = vmatprep.mubr.msk.bf16.mxu1 %vm6807_vm0, %v8832_v36  ;;  %v8552_v43 = vpop.f32.mrb[222].mxu0 }
 0x9a9   : > { %v6537_v55 = vpop.f32.mrb[223].mxu0 }
 0x9ae   : > { %v8554_v58 = vpop.f32.mrb[224].mxu0 }
 0x9af   : > { %6549 = vmatmul.mubr.msk.bf16.vlgmr.msra.gmra.mrb[216].mxu1 %vm358_vm3, %v6766_v26  ;;  %v6540_v10 = vpop.f32.mrb[225].mxu0 }
 0x9b0   : > { %6552 = vmatprep.mubr.msk.bf16.mxu1 %vm6807_vm0, %v8832_v36  ;;  %v8556_v61 = vpop.f32.mrb[226].mxu0 }
 0x9b1   : > { %v6541_v8 = vpop.f32.mrb[227].mxu0 }
 0x9b6   : > { %v8558_v26 = vpop.f32.mrb[228].mxu0 }
 0x9b7   : > { %6553 = vmatmul.mubr.msk.bf16.gmra.mrb[220].mxu1 %vm358_vm3, %v6768_v27  ;;  %v6568_v27 = vpop.f32.mrb[229].mxu0 }
 0x9b8   : > { %6556 = vmatprep.mubr.msk.bf16.mxu1 %vm6807_vm0, %v8832_v36  ;;  %v8560_v30 = vpop.f32.mrb[230].mxu0 }
 0x9b9   : > { %v6569_v22 = vpop.f32.mrb[231].mxu0 }
 0x9bf   : > { %6557 = vmatmul.mubr.msk.bf16.gmra.mrb[224].mxu1 %vm358_vm3, %v6770_v4  ;;  %v8562_v4 = vpop.f32.mrb[232].mxu0 }
 0x9c0   : > { %6584 = vmatprep.mubr.msk.bf16.mxu1 %vm6807_vm0, %v8832_v36  ;;  %v6572_v3 = vpop.f32.mrb[233].mxu0 }
 0x9c1   : > { %v8564_v41 = vpop.f32.mrb[234].mxu0 }
 0x9c2   : > { %v6573_v33 = vpop.f32.mrb[235].mxu0 }
 0x9c6   : > { %v8566_v21 = vpop.f32.mrb[236].mxu0 }
 0x9c7   : > { %v6576_v0 = vpop.f32.mrb[237].mxu0 }
 0x9c8   : > { %v8568_v51 = vpop.f32.mrb[238].mxu0 }
 0x9c9   : > { %v6577_v16 = vpop.f32.mrb[239].mxu0 }
 0xa22   : > { %v8570_v28 = vpop.f32.mrb[168].mxu1 }
 0xa23   : > { %v6406_v54 = vpop.f32.mrb[169].mxu1 }
 0xa24   : > { %v8572_v17 = vpop.f32.mrb[170].mxu1 }
 0xa25   : > { %v6407_v48 = vpop.f32.mrb[171].mxu1 }
 0xa26   : > { %v8586_v48 = vld [vmem:[%s8805_s3] sm:$0xff] }
 0xa2a   : > { %v8574_v14 = vpop.f32.mrb[172].mxu1 }
 0xa2b   : > { %v6410_v6 = vpop.f32.mrb[173].mxu1 }
 0xa2c   : > { %v8576_v55 = vpop.f32.mrb[174].mxu1 }
 0xa2d   : > { %8844 = vst [vmem:[#allocation2_spill] sm:$0xff] %v8576_v55  ;;  %v6411_v10 = vpop.f32.mrb[175].mxu1 }
 0xa32   : > { %v8578_v8 = vpop.f32.mrb[176].mxu1 }
 0xa33   : > { %8845 = vst [vmem:[#allocation3_spill] sm:$0xff] %v8578_v8  ;;  %v6414_v27 = vpop.f32.mrb[177].mxu1 }
 0xa34   : > { %v8580_v22 = vpop.f32.mrb[178].mxu1  ;;  %v8593_v27 = vld [vmem:[%s8805_s3 + $0x8] sm:$0xff] }
 0xa35   : > { %8846 = vst [vmem:[#allocation4_spill] sm:$0xff] %v8580_v22  ;;  %v6415_v3 = vpop.f32.mrb[179].mxu1 }
 0xa3a   : > { %v4204_v33 = vpop.f32.mrb[180].mxu1 }
 0xa3b   : > { %v4289_v0 = vadd.f32 %v8513_v5, %v4204_v33  ;;  %v6442_v16 = vpop.f32.mrb[181].mxu1 }
 0xa3c   : > { %v4207_v54 = vpop.f32.mrb[182].mxu1 }
 0xa3d   : > { %v4311_v6 = vadd.f32 %v8586_v48, %v4289_v0  ;;  %v4292_v10 = vadd.f32 %v8516_v1, %v4207_v54  ;;  %v6443_v55 = vpop.f32.mrb[183].mxu1  ;;  %v8600_v0 = vld [vmem:[%s8805_s3 + $0x10] sm:$0xff] }
 0xa3f   : > { %v4312_v3 = vadd.f32 %v8593_v27, %v4292_v10  ;;  %4319 = vperm.xlu1 %6662, %v4311_v6   ;;  %v8607_v6 = vld [vmem:[%s8805_s3 + $0x18] sm:$0xff] }
 0xa41   : > { %4324 = vperm.xlu0 %6661, %v4312_v3  }
 0xa42   : > { %v4212_v5 = vpop.f32.mrb[184].mxu1 }
 0xa43   : > { %v4297_v33 = vadd.f32 %v8524_v13, %v4212_v5  ;;  %v6446_v16 = vpop.f32.mrb[185].mxu1 }
 0xa44   : > { %v4215_v22 = vpop.f32.mrb[186].mxu1 }
 0xa45   : > { %v4313_v1 = vadd.f32 %v8600_v0, %v4297_v33  ;;  %v4300_v55 = vadd.f32 %v8528_v63, %v4215_v22  ;;  %v6447_v54 = vpop.f32.mrb[187].mxu1  ;;  %v8614_v33 = vld [vmem:[%s8805_s3 + $0x20] sm:$0xff] }
 0xa47   : > { %v4314_v10 = vadd.f32 %v8607_v6, %v4300_v55  ;;  %4329 = vperm.xlu1 %6662, %v4313_v1   ;;  %v8621_v1 = vld [vmem:[%s8805_s3 + $0x28] sm:$0x1f] }
 0xa49   : > { %4334 = vperm.xlu0 %6661, %v4314_v10  }
 0xa4a   : > { %v4220_v13 = vpop.f32.mrb[188].mxu1 }
 0xa4b   : > { %v4305_v3 = vadd.f32 %v8530_v34, %v4220_v13  ;;  %v6450_v5 = vpop.f32.mrb[189].mxu1 }
 0xa4c   : > { %v4223_v16 = vpop.f32.mrb[190].mxu1 }
 0xa4d   : > { %v4315_v63 = vadd.f32 %v8614_v33, %v4305_v3  ;;  %v4308_v22 = vadd.f32 %v8532_v11, %v4223_v16  ;;  %v6451_v54 = vpop.f32.mrb[191].mxu1 }
 0xa4f   : > { %v4316_v55 = vadd.f32 %v8621_v1, %v4308_v22  ;;  %4339 = vperm.xlu1 %6662, %v4315_v63  }
 0xa51   : > { %4344 = vperm.xlu0 %6661, %v4316_v55  }
 0xa52   : > { %v4423_v34 = vpop.f32.mrb[192].mxu1 }
 0xa53   : > { %v4505_v10 = vadd.f32 %v8534_v56, %v4423_v34  ;;  %v6478_v13 = vpop.f32.mrb[193].mxu1 }
 0xa54   : > { %v4426_v5 = vpop.f32.mrb[194].mxu1 }
 0xa55   : > { %v4527_v8 = vadd.f32 %v4505_v10, %v7305_v39  ;;  %v4508_v3 = vadd.f32 %v8536_v12, %v4426_v5  ;;  %v6479_v11 = vpop.f32.mrb[195].mxu1 }
 0xa57   : > { %v4528_v16 = vadd.f32 %v4508_v3, %v7308_v25  ;;  %4535 = vperm.xlu1 %6662, %v4527_v8  }
 0xa59   : > { %4540 = vperm.xlu0 %6661, %v4528_v16  }
 0xa5a   : > { %v4431_v54 = vpop.f32.mrb[196].mxu1 }
 0xa5b   : > { %v4513_v9 = vadd.f32 %v8538_v60, %v4431_v54  ;;  %v6482_v22 = vpop.f32.mrb[197].mxu1 }
 0xa5c   : > { %v4434_v63 = vpop.f32.mrb[198].mxu1 }
 0xa5d   : > { %v4529_v55 = vadd.f32 %v4513_v9, %v7320_v47  ;;  %v4516_v56 = vadd.f32 %v8540_v19, %v4434_v63  ;;  %v6483_v34 = vpop.f32.mrb[199].mxu1 }
 0xa5f   : > { %v4530_v13 = vadd.f32 %v4516_v56, %v7323_v50  ;;  %4545 = vperm.xlu1 %6662, %v4529_v55  }
 0xa61   : > { %4550 = vperm.xlu0 %6661, %v4530_v13  }
 0xa62   : > { %v4439_v39 = vpop.f32.mrb[200].mxu1 }
 0xa63   : > { %v4521_v12 = vadd.f32 %v8542_v46, %v4439_v39  ;;  %v6486_v25 = vpop.f32.mrb[201].mxu1 }
 0xa64   : > { %v4442_v8 = vpop.f32.mrb[202].mxu1 }
 0xa65   : > { %v4531_v10 = vadd.f32 %v4521_v12, %v7333_v7  ;;  %v4524_v60 = vadd.f32 %v8544_v42, %v4442_v8  ;;  %v6487_v5 = vpop.f32.mrb[203].mxu1 }
 0xa67   : > { %v4532_v3 = vadd.f32 %v4524_v60, %v7336_v37  ;;  %4555 = vperm.xlu1 %6662, %v4531_v10  }
 0xa69   : > { %4560 = vperm.xlu0 %6661, %v4532_v3  }
 0xa6a   : > { %v4645_v47 = vpop.f32.mrb[204].mxu1 }
 0xa6b   : > { %v4727_v9 = vadd.f32 %v8546_v62, %v4645_v47  ;;  %v6514_v50 = vpop.f32.mrb[205].mxu1 }
 0xa6c   : > { %v4648_v19 = vpop.f32.mrb[206].mxu1 }
 0xa6d   : > { %v4749_v11 = vadd.f32 %v4727_v9, %v7313_v31  ;;  %v4730_v46 = vadd.f32 %v8548_v15, %v4648_v19  ;;  %v6515_v16 = vpop.f32.mrb[207].mxu1 }
 0xa6f   : > { %v4750_v54 = vadd.f32 %v4730_v46, %v7315_v35  ;;  %4757 = vperm.xlu1 %6662, %v4749_v11  }
 0xa71   : > { %4762 = vperm.xlu0 %6661, %v4750_v54  }
 0xa72   : > { %v4653_v7 = vpop.f32.mrb[208].mxu1 }
 0xa73   : > { %v4735_v42 = vadd.f32 %v8550_v38, %v4653_v7  ;;  %v6518_v37 = vpop.f32.mrb[209].mxu1 }
 0xa74   : > { %v4656_v22 = vpop.f32.mrb[210].mxu1 }
 0xa75   : > { %v4751_v63 = vadd.f32 %v4735_v42, %v7345_v32  ;;  %v4738_v62 = vadd.f32 %v8552_v43, %v4656_v22  ;;  %v6519_v55 = vpop.f32.mrb[211].mxu1 }
 0xa77   : > { %v4752_v56 = vadd.f32 %v4738_v62, %v7348_v44  ;;  %4767 = vperm.xlu1 %6662, %v4751_v63  }
 0xa79   : > { %4772 = vperm.xlu0 %6661, %v4752_v56  }
 0xa7a   : > { %v4661_v31 = vpop.f32.mrb[212].mxu1 }
 0xa7b   : > { %v4743_v15 = vadd.f32 %v8554_v58, %v4661_v31  ;;  %v6522_v35 = vpop.f32.mrb[213].mxu1 }
 0xa7c   : > { %v4664_v34 = vpop.f32.mrb[214].mxu1 }
 0xa7d   : > { %v4753_v13 = vadd.f32 %v4743_v15, %v7353_v52  ;;  %v4746_v38 = vadd.f32 %v8556_v61, %v4664_v34  ;;  %v6523_v39 = vpop.f32.mrb[215].mxu1 }
 0xa7f   : > { %v4754_v12 = vadd.f32 %v4746_v38, %v7356_v49  ;;  %4777 = vperm.xlu1 %6662, %v4753_v13  }
 0xa81   : > { %4782 = vperm.xlu0 %6661, %v4754_v12  }
 0xa82   : > { %v4867_v32 = vpop.f32.mrb[216].mxu1 }
 0xa83   : > { %v4949_v43 = vadd.f32 %v8558_v26, %v4867_v32  ;;  %v6550_v44 = vpop.f32.mrb[217].mxu1 }
 0xa84   : > { %v4870_v25 = vpop.f32.mrb[218].mxu1 }
 0xa85   : > { %v4971_v8 = vadd.f32 %v4949_v43, %v7326_v59  ;;  %v4952_v58 = vadd.f32 %v8560_v30, %v4870_v25  ;;  %v6551_v10 = vpop.f32.mrb[219].mxu1 }
 0xa87   : > { %v4972_v60 = vadd.f32 %v4952_v58, %v7330_v2  ;;  %4979 = vperm.xlu1 %6662, %v4971_v8  }
 0xa89   : > { %4984 = vperm.xlu0 %6661, %v4972_v60  }
 0xa8a   : > { %v4875_v52 = vpop.f32.mrb[220].mxu1 }
 0xa8b   : > { %v4957_v61 = vadd.f32 %v8562_v4, %v4875_v52  ;;  %v6554_v49 = vpop.f32.mrb[221].mxu1 }
 0xa8c   : > { %v4878_v5 = vpop.f32.mrb[222].mxu1 }
 0xa8d   : > { %v4973_v3 = vadd.f32 %v4957_v61, %v7365_v20  ;;  %v4960_v26 = vadd.f32 %v8564_v41, %v4878_v5  ;;  %v6555_v47 = vpop.f32.mrb[223].mxu1 }
 0xa8f   : > { %v4974_v9 = vadd.f32 %v4960_v26, %v7368_v23  ;;  %4989 = vperm.xlu1 %6662, %v4973_v3  }
 0xa91   : > { %4994 = vperm.xlu0 %6661, %v4974_v9  }
 0xa92   : > { %v4883_v59 = vpop.f32.mrb[224].mxu1 }
 0xa93   : > { %v4965_v30 = vadd.f32 %v8566_v21, %v4883_v59  ;;  %v6558_v2 = vpop.f32.mrb[225].mxu1 }
 0xa94   : > { %v4886_v50 = vpop.f32.mrb[226].mxu1 }
 0xa95   : > { %v4975_v19 = vadd.f32 %v4965_v30, %v7373_v29  ;;  %v4968_v4 = vadd.f32 %v8568_v51, %v4886_v50  ;;  %v6559_v11 = vpop.f32.mrb[227].mxu1 }
 0xa97   : > { %v4976_v46 = vadd.f32 %v4968_v4, %v8840_v24  ;;  %4999 = vperm.xlu1 %6662, %v4975_v19  }
 0xa99   : > { %5004 = vperm.xlu0 %6661, %v4976_v46  }
 0xabe   : > { %v4320_v20 = vpop.permute.xlu1 %4319 }
 0xabf   : > { %v4347_v34 = vmul.f32 %v4320_v20, %v8841_v45 }
 0xac0   : > { %v4325_v41 = vpop.permute.xlu0 %4324 }
 0xac1   : > { %v4348_v13 = vmul.f32 %v4325_v41, %v8841_v45 }
 0xac6   : > { %v4330_v16 = vpop.permute.xlu1 %4329 }
 0xac7   : > { %v4349_v5 = vmul.f32 %v4330_v16, %v8841_v45 }
 0xac8   : > { %v4335_v23 = vpop.permute.xlu0 %4334 }
 0xac9   : > { %v4350_v3 = vmul.f32 %v4335_v23, %v8841_v45 }
 0xace   : > { %v4340_v54 = vpop.permute.xlu1 %4339 }
 0xad0   : > { %v4345_v7 = vpop.permute.xlu0 %4344 }
 0xad6   : > { %v4536_v42 = vpop.permute.xlu1 %4535 }
 0xad7   : > { %v4563_v24 = vmul.f32 %v4536_v42, %v7423_v40  ;;  %v4351_v42 = vmul.f32 %v4340_v54, %v8841_v45 }
 0xad8   : > { %v4541_v37 = vpop.permute.xlu0 %4540 }
 0xad9   : > { %v4564_v15 = vmul.f32 %v4541_v37, %v7423_v40  ;;  %v4569_v32 = vadd.f32 %v4563_v24, %v4347_v34  ;;  %v4352_v37 = vmul.f32 %v4345_v7, %v8841_v45 }
 0xadb   : > { %v4570_v43 = vadd.f32 %v4564_v15, %v4348_v13  ;;  %v8849_v13 = vld [vmem:[#allocation8_spill] sm:$0xff] }
 0xade   : > { %v4546_v21 = vpop.permute.xlu1 %4545 }
 0xadf   : > { %v4565_v60 = vmul.f32 %v4546_v21, %v7423_v40 }
 0xae0   : > { %v4551_v22 = vpop.permute.xlu0 %4550 }
 0xae1   : > { %v4566_v52 = vmul.f32 %v4551_v22, %v7423_v40  ;;  %v4571_v30 = vadd.f32 %v4565_v60, %v4349_v5  ;;  %v6792_v5 = vld [vmem:[%s6903_s28 + $0x48] sm:$0xff]  }
 0xae3   : > { %v4572_v2 = vadd.f32 %v4566_v52, %v4350_v3 }
 0xae6   : > { %v4556_v63 = vpop.permute.xlu1 %4555 }
 0xae7   : > { %v4567_v20 = vmul.f32 %v4556_v63, %v7423_v40 }
 0xae8   : > { %v4561_v62 = vpop.permute.xlu0 %4560 }
 0xae9   : > { %v4568_v41 = vmul.f32 %v4561_v62, %v7423_v40 }
 0xaee   : > { %v4758_v29 = vpop.permute.xlu1 %4757 }
 0xaef   : > { %v4785_v38 = vmul.f32 %v4758_v29, %v8842_v57 }
 0xaf0   : > { %v4763_v55 = vpop.permute.xlu0 %4762 }
 0xaf1   : > { %v4786_v39 = vmul.f32 %v4763_v55, %v8842_v57  ;;  %v4791_v8 = vadd.f32 %v4785_v38, %v4569_v32 }
 0xaf3   : > { %v4792_v58 = vadd.f32 %v4786_v39, %v4570_v43  ;;  %v8850_v39 = vld [vmem:[#allocation14_spill] sm:$0xff] }
 0xaf6   : > { %v4768_v51 = vpop.permute.xlu1 %4767 }
 0xaf7   : > { %v4787_v26 = vmul.f32 %v4768_v51, %v8842_v57  ;;  %v4573_v51 = vadd.f32 %v4567_v20, %v4351_v42  ;;  %v8856_v20 = vld [vmem:[#allocation9_spill] sm:$0xff]  ;;  %v8858_v42 = vld [vmem:[#allocation2_spill] sm:$0xff] }
 0xaf8   : > { %v4773_v56 = vpop.permute.xlu0 %4772 }
 0xaf9   : > { %v4788_v47 = vmul.f32 %v4773_v56, %v8842_v57  ;;  %v4793_v4 = vadd.f32 %v4787_v26, %v4571_v30  ;;  %v4574_v56 = vadd.f32 %v4568_v41, %v4352_v37 }
 0xafb   : > { %v4794_v11 = vadd.f32 %v4788_v47, %v4572_v2 }
 0xafe   : > { %v4778_v31 = vpop.permute.xlu1 %4777 }
 0xaff   : > { %v4789_v21 = vmul.f32 %v4778_v31, %v8842_v57 }
 0xb00   : > { %v4783_v35 = vpop.permute.xlu0 %4782 }
 0xb01   : > { %v4790_v22 = vmul.f32 %v4783_v35, %v8842_v57  ;;  %v4795_v40 = vadd.f32 %v4789_v21, %v4573_v51 }
 0xb03   : > { %v4796_v62 = vadd.f32 %v4790_v22, %v4574_v56 }
 0xb06   : > { %v4980_v12 = vpop.permute.xlu1 %4979 }
 0xb07   : > { %v5007_v44 = vmul.f32 %v4980_v12, %v8843_v18 }
 0xb08   : > { %v4985_v25 = vpop.permute.xlu0 %4984 }
 0xb09   : > { %v5008_v10 = vmul.f32 %v4985_v25, %v8843_v18  ;;  %v5013_v61 = vadd.f32 %v5007_v44, %v4791_v8 }
 0xb0b   : > { %v5014_v49 = vadd.f32 %v5008_v10, %v4792_v58  ;;  %v8852_v58 = vld [vmem:[#allocation13_spill] sm:$0xff] }
 0xb0d   : > { %v5019_v9 = vpack.c.bf16 %v5014_v49, %v5013_v61 }
 0xb0e   : > { %v4990_v59 = vpop.permute.xlu1 %4989 }
 0xb0f   : > { %v5009_v50 = vmul.f32 %v4990_v59, %v8843_v18  ;;  %5025 = vrot.lane.b32.xlu1 %v5019_v9, %s6812_s14  ;;  %v8853_v9 = vld [vmem:[#allocation10_spill] sm:$0xff] }
 0xb10   : > { %v4995_v19 = vpop.permute.xlu0 %4994 }
 0xb11   : > { %v5010_v46 = vmul.f32 %v4995_v19, %v8843_v18  ;;  %v5015_v16 = vadd.f32 %v5009_v50, %v4793_v4  ;;  %v8854_v50 = vld [vmem:[#allocation16_spill] sm:$0xff] }
 0xb13   : > { %v5016_v23 = vadd.f32 %v5010_v46, %v4794_v11  ;;  %v8855_v11 = vld [vmem:[#allocation3_spill] sm:$0xff] }
 0xb15   : > { %v5020_v29 = vpack.c.bf16 %v5016_v23, %v5015_v16  ;;  %v8857_v16 = vld [vmem:[#allocation15_spill] sm:$0xff] }
 0xb16   : > { %v5000_v55 = vpop.permute.xlu1 %4999 }
 0xb17   : > { %v5011_v24 = vmul.f32 %v5000_v55, %v8843_v18  ;;  %5027 = vrot.lane.b32.xlu0 %v5020_v29, %s6812_s14 }
 0xb18   : > { %v5005_v63 = vpop.permute.xlu0 %5004 }
 0xb19   : > { %v5012_v15 = vmul.f32 %v5005_v63, %v8843_v18  ;;  %v5017_v54 = vadd.f32 %v5011_v24, %v4795_v40 }
 0xb1b   : > { %v5018_v34 = vadd.f32 %v5012_v15, %v4796_v62  ;;  %1491 = vrot.lane.b32.xlu0 %v8586_v48, %s6813_s13 }
 0xb1d   : > { %v5021_v45 = vpack.c.bf16 %v5018_v34, %v5017_v54  ;;  %v8859_v34 = vld [vmem:[#allocation11_spill] sm:$0xff] }
 0xb1f   : > { %1495 = vrot.lane.b32.xlu0 %v8600_v0, %s6813_s13  ;;  %5029 = vrot.lane.b32.xlu1 %v5021_v45, %s6812_s14  ;;  %v8847_v0 = vld [vmem:[#allocation6_spill] sm:$0xff] }
 0xb23   : > { %1499 = vrot.lane.b32.xlu0 %v8614_v33, %s6813_s13  ;;  %1493 = vrot.lane.b32.xlu1 %v8593_v27, %s6813_s13  ;;  %v8848_v27 = vld [vmem:[#allocation12_spill] sm:$0xff] }
 0xb27   : > { %1497 = vrot.lane.b32.xlu1 %v8607_v6, %s6813_s13 }
 0xb2b   : > { %1501 = vrot.lane.b32.xlu1 %v8621_v1, %s6813_s13 }
 0xb81   : > { %v5026_v57 = vpop.permute.xlu1 %5025 }
 0xb82   : > { %6579 = vmatpush3.bf16.msra.mxu1 %v5026_v57  ;;  %v8860_v57 = vld [vmem:[#allocation17_spill] sm:$0xff] }
 0xb83   : > { %6580 = vmatprep.subr.bf16.mxu1 %v8832_v36 }
 0xb89   : > { %v5028_v18 = vpop.permute.xlu0 %5027 }
 0xb8a   : > { %6581 = vmatpush3.bf16.msra.mxu1 %v5028_v18 }
 0xb8b   : > { %6582 = vmatprep.subr.bf16.mxu1 %v8832_v36 }
 0xb8d   : > { %v8695_v48 = vpop.permute.xlu0 %1491 }
 0xb8e   : > { %v1509_v7 = vmul.f32 %v8695_v48, %v8847_v0  ;;  %v2705_v6 = vmul.f32 %v8848_v27, %v8695_v48  ;;  %v3899_v35 = vmul.f32 %v8570_v28, %v8695_v48  ;;  %v8851_v28 = vld [vmem:[#allocation7_spill] sm:$0xff]  ;;  %v8861_v0 = vld [vmem:[#allocation4_spill] sm:$0xff] }
 0xb8f   : > { %v6793_v27 = vld [vmem:[%s6903_s28 + $0x50] sm:$0xff]  }
 0xb90   : > { %v1516_v43 = vsel %vm1515_vm4, %v1509_v7, 0.0 }
 0xb91   : > { %v5030_v33 = vpop.permute.xlu1 %5029  ;;  %v8699_v31 = vpop.permute.xlu0 %1495 }
 0xb92   : > { %v5034_v1 = vand.u32 %v5030_v33, %v6916_v53  ;;  %v1511_v38 = vmul.f32 %v8699_v31, %v8849_v13  ;;  %v2707_v12 = vmul.f32 %v8850_v39, %v8699_v31  ;;  %v3901_v32 = vmul.f32 %v8574_v14, %v8699_v31 }
 0xb93   : > { %v2711_v53 = vsel %vm1515_vm4, %v2705_v6, 0.0  ;;  %v3905_v14 = vsel %vm1515_vm4, %v3899_v35, 0.0 }
 0xb94   : > { %6583 = vmatpush3.bf16.msra.mxu1 %v5034_v1  ;;  %v1519_v52 = vsel %vm1515_vm4, %v1511_v38, 0.0  ;;  %v2714_v61 = vsel %vm1515_vm4, %v2707_v12, 0.0  ;;  %v3908_v49 = vsel %vm1515_vm4, %v3901_v32, 0.0 }
 0xb95   : > { %v8713_v44 = vpop.permute.xlu1 %1493  ;;  %v8715_v25 = vpop.permute.xlu0 %1499 }
 0xb96   : > { %v1510_v8 = vmul.f32 %v8713_v44, %v8851_v28  ;;  %v2706_v10 = vmul.f32 %v8852_v58, %v8713_v44  ;;  %v3900_v60 = vmul.f32 %v8572_v17, %v8713_v44  ;;  %v1513_v17 = vmul.f32 %v8715_v25, %v8853_v9 }
 0xb97   : > { %6585 = vmatmul.mubr.msk.bf16.vlgmr.msra.gmra.mrb[228].mxu1 %vm358_vm3, %v6792_v5  ;;  %v2709_v19 = vmul.f32 %v8854_v50, %v8715_v25  ;;  %v3903_v46 = vmul.f32 %v8855_v11, %v8715_v25 }
 0xb98   : > { %v1517_v3 = vsel %vm1515_vm4, %v1510_v8, 0.0  ;;  %v2712_v26 = vsel %vm1515_vm4, %v2706_v10, 0.0  ;;  %v3906_v47 = vsel %vm1515_vm4, %v3900_v60, 0.0  ;;  %6588 = vmatprep.mubr.msk.bf16.mxu1 %vm6807_vm0, %v8832_v36  ;;  %v1523_v24 = vsel %vm1515_vm4, %v1513_v17, 0.0 }
 0xb99   : > { %v1518_v59 = vadd.f32 %v1517_v3, %v1516_v43  ;;  %v2713_v30 = vadd.f32 %v2712_v26, %v2711_v53  ;;  %v3907_v2 = vadd.f32 %v3906_v47, %v3905_v14  ;;  %v8739_v4 = vpop.permute.xlu1 %1497  ;;  %v2718_v15 = vsel %vm1515_vm4, %v2709_v19, 0.0  ;;  %v6794_v53 = vld [vmem:[%s6903_s28 + $0x58] sm:$0x7f]  }
 0xb9a   : > { %v1512_v41 = vmul.f32 %v8739_v4, %v8856_v20  ;;  %v2708_v23 = vmul.f32 %v8857_v16, %v8739_v4  ;;  %v3902_v37 = vmul.f32 %v8858_v42, %v8739_v4  ;;  %v3912_v33 = vsel %vm1515_vm4, %v3903_v46, 0.0  ;;  %v236_v16 = vld [vmem:[%s8805_s3] sm:$0x1] }
 0xb9b   : > { %v1520_v21 = vadd.f32 %v1519_v52, %v1518_v59  ;;  %v2715_v22 = vadd.f32 %v2714_v61, %v2713_v30  ;;  %v3909_v29 = vadd.f32 %v3908_v49, %v3907_v2 }
 0xb9c   : > { %v1521_v55 = vsel %vm1515_vm4, %v1512_v41, 0.0  ;;  %v2716_v51 = vsel %vm1515_vm4, %v2708_v23, 0.0  ;;  %v3910_v56 = vsel %vm1515_vm4, %v3902_v37, 0.0 }
 0xb9d   : > { %v8753_v63 = vpop.permute.xlu1 %1501  ;;  %v1522_v40 = vadd.f32 %v1521_v55, %v1520_v21  ;;  %v2717_v62 = vadd.f32 %v2716_v51, %v2715_v22  ;;  %v3911_v54 = vadd.f32 %v3910_v56, %v3909_v29 }
 0xb9e   : > { %v1514_v45 = vmul.f32 %v8753_v63, %v8859_v34  ;;  %v2710_v18 = vmul.f32 %v8860_v57, %v8753_v63  ;;  %v3904_v7 = vmul.f32 %v8861_v0, %v8753_v63 }
 0xb9f   : > { %6589 = vmatmul.mubr.msk.bf16.gmra.mrb[232].mxu1 %vm358_vm3, %v6793_v27  ;;  %v1524_v6 = vadd.f32 %v1523_v24, %v1522_v40  ;;  %v2719_v1 = vadd.f32 %v2718_v15, %v2717_v62  ;;  %v3913_v35 = vadd.f32 %v3912_v33, %v3911_v54 }
 0xba0   : > { %v1526_v13 = vsel %vm1525_vm5, %v1514_v45, 0.0  ;;  %v2720_v38 = vsel %vm1525_vm5, %v2710_v18, 0.0  ;;  %6592 = vmatprep.mubr.msk.bf16.mxu1 %vm6807_vm0, %v8832_v36  ;;  %v3914_v39 = vsel %vm1525_vm5, %v3904_v7, 0.0 }
 0xba1   : > { %v1527_v12 = vadd.f32 %v1526_v13, %v1524_v6  ;;  %v2721_v32 = vadd.f32 %v2720_v38, %v2719_v1  ;;  %v3915_v43 = vadd.f32 %v3914_v39, %v3913_v35 }
 0xba3   : > { %1528 = vadd.xlane.f32.xlu0 %v1527_v12  ;;  %2722 = vadd.xlane.f32.xlu1 %v2721_v32 }
 0xba7   : > { %6593 = vmatmul.mubr.msk.bf16.gmra.mrb[236].mxu1 %vm358_vm3, %v6794_v53  ;;  %3916 = vadd.xlane.f32.xlu0 %v3915_v43 }
 0xc30   : > { %v1529_v28 = vpop.xlane.xlu0 %1528  ;;  %v2723_v8 = vpop.xlane.xlu1 %2722 }
 0xc31   : > { %v1530_v58 = vrot.slane %v1529_v28, 4  ;;  %v2724_v10 = vrot.slane %v2723_v8, 4 }
 0xc33   : > { %v1531_v60 = vadd.f32 %v1530_v58, %v1529_v28  ;;  %v2725_v14 = vadd.f32 %v2724_v10, %v2723_v8 }
 0xc34   : > { %v3917_v52 = vpop.xlane.xlu0 %3916 }
 0xc35   : > { %v1532_v61 = vrot.slane %v1531_v60, 2  ;;  %v2726_v36 = vrot.slane %v2725_v14, 2  ;;  %v3918_v49 = vrot.slane %v3917_v52, 4 }
 0xc37   : > { %v3919_v5 = vadd.f32 %v3918_v49, %v3917_v52  ;;  %v1533_v3 = vadd.f32 %v1532_v61, %v1531_v60  ;;  %v2727_v26 = vadd.f32 %v2726_v36, %v2725_v14 }
 0xc39   : > { %v3920_v47 = vrot.slane %v3919_v5, 2  ;;  %v1534_v9 = vrot.slane %v1533_v3, 1  ;;  %v2728_v17 = vrot.slane %v2727_v26, 1 }
 0xc3b   : > { %v1535_v59 = vadd.f32 %v1534_v9, %v1533_v3  ;;  %v2729_v30 = vadd.f32 %v2728_v17, %v2727_v26  ;;  %v3921_v2 = vadd.f32 %v3920_v47, %v3919_v5 }
 0xc3d   : > { %6598 = vpush %v1535_v59  ;;  %v3922_v50 = vrot.slane %v3921_v2, 1 }
 0xc3e   : > { %6600 = vpush %v2729_v30 }
 0xc3f   : > { %v3923_v19 = vadd.f32 %v3922_v50, %v3921_v2 }
 0xc41   : > { %6602 = vpush %v3923_v19 }
 0xc6a   : > { %v5070_v11 = vpop.f32.mrb[228].mxu1 }
 0xc6b   : > { %v5093_v46 = vmul.f32 %v5070_v11, %v8695_v48  ;;  %v6586_v20 = vpop.f32.mrb[229].mxu1 }
 0xc6c   : > { %v5073_v41 = vpop.f32.mrb[230].mxu1 }
 0xc6d   : > { %v5094_v23 = vmul.f32 %v5073_v41, %v8713_v44  ;;  %v6587_v42 = vpop.f32.mrb[231].mxu1  ;;  %v5099_v37 = vsel %vm1515_vm4, %v5093_v46, 0.0 }
 0xc6e   : > { %s6599_s16 = spop %6598 }
 0xc6f   : > { %v1537_v21 = vstv %s6599_s16  ;;  %v5100_v22 = vsel %vm1515_vm4, %v5094_v23, 0.0  ;;  %s6601_s18 = spop %6600 }
 0xc70   : > { %v1538_v29 = vadd.f32 %v1537_v21, %v236_v16  ;;  %v5101_v55 = vadd.f32 %v5100_v22, %v5099_v37  ;;  %v2731_v13 = vstv %s6601_s18 }
 0xc71   : > { %v2732_v38 = vadd.f32 %v2731_v13, %v236_v16 }
 0xc72   : > { %v5078_v51 = vpop.f32.mrb[232].mxu1  ;;  %1540 = vrot.lane.b32.xlu1 %v1538_v29, %s6814_s29  ;;  %s6603_s19 = spop %6602 }
 0xc73   : > { %v5095_v48 = vmul.f32 %v5078_v51, %v8699_v31  ;;  %v3925_v56 = vstv %s6603_s19  ;;  %v6590_v24 = vpop.f32.mrb[233].mxu1 }
 0xc74   : > { %v3926_v44 = vadd.f32 %v3925_v56, %v236_v16  ;;  %v5081_v40 = vpop.f32.mrb[234].mxu1 }
 0xc75   : > { %v5102_v62 = vsel %vm1515_vm4, %v5095_v48, 0.0  ;;  %v5096_v15 = vmul.f32 %v5081_v40, %v8739_v4  ;;  %v6591_v54 = vpop.f32.mrb[235].mxu1 }
 0xc76   : > { %v5103_v34 = vadd.f32 %v5102_v62, %v5101_v55  ;;  %3928 = vrot.lane.b32.xlu1 %v3926_v44, %s6814_s29 }
 0xc77   : > { %v5104_v45 = vsel %vm1515_vm4, %v5096_v15, 0.0 }
 0xc78   : > { %v5105_v57 = vadd.f32 %v5104_v45, %v5103_v34 }
 0xc7a   : > { %v5086_v18 = vpop.f32.mrb[236].mxu1 }
 0xc7b   : > { %v5097_v0 = vmul.f32 %v5086_v18, %v8715_v25  ;;  %v6594_v31 = vpop.f32.mrb[237].mxu1 }
 0xc7c   : > { %v5089_v7 = vpop.f32.mrb[238].mxu1 }
 0xc7d   : > { %v5106_v33 = vsel %vm1515_vm4, %v5097_v0, 0.0  ;;  %v5098_v27 = vmul.f32 %v5089_v7, %v8753_v63  ;;  %v6595_v6 = vpop.f32.mrb[239].mxu1 }
 0xc7e   : > { %v5107_v1 = vadd.f32 %v5106_v33, %v5105_v57 }
 0xc7f   : > { %v5108_v4 = vsel %vm1525_vm5, %v5098_v27, 0.0 }
 0xc80   : > { %v5109_v35 = vadd.f32 %v5108_v4, %v5107_v1 }
 0xc82   : > { %5110 = vadd.xlane.f32.xlu0 %v5109_v35 }
 0xc98   : > { %2734 = vrot.lane.b32.xlu0 %v2732_v38, %s6814_s29 }
 0xce4   : > { %v1541_v25 = vpop.permute.xlu1 %1540 }
 0xce5   : > { %1544 = vst.msk [vmem:[%s225_s23] sm:$0x1] %vm1543_vm6, %v1541_v25 }
 0xce8   : > { %v3929_v43 = vpop.permute.xlu1 %3928 }
 0xce9   : > { %5521 = vst.msk [vmem:[%s225_s23 + $0x2] sm:$0x1] %vm1543_vm6, %v3929_v43 }
 0xd0f   : > { %v5111_v39 = vpop.xlane.xlu0 %5110 }
 0xd10   : > { %v5112_v63 = vrot.slane %v5111_v39, 4 }
 0xd12   : > { %v5113_v12 = vadd.f32 %v5112_v63, %v5111_v39 }
 0xd13   : > { %v2735_v32 = vpop.permute.xlu0 %2734 }
 0xd14   : > { %v5114_v53 = vrot.slane %v5113_v12, 2  ;;  %5409 = vst.msk [vmem:[%s225_s23 + $0x1] sm:$0x1] %vm1543_vm6, %v2735_v32 }
 0xd16   : > { %v5115_v28 = vadd.f32 %v5114_v53, %v5113_v12 }
 0xd18   : > { %v5116_v8 = vrot.slane %v5115_v28, 1 }
 0xd1a   : > { %v5117_v58 = vadd.f32 %v5116_v8, %v5115_v28 }
 0xd1c   : > { %6604 = vpush %v5117_v58 }
 0xd4d   : > { %s6605_s25 = spop %6604 }
 0xd4e   : > { %v5119_v10 = vstv %s6605_s25 }
 0xd4f   : > { %v5120_v60 = vadd.f32 %v5119_v10, %v236_v16 }
 0xd51   : > { %5122 = vrot.lane.b32.xlu1 %v5120_v60, %s6814_s29 }
 0xdc3   : > { %v5123_v14 = vpop.permute.xlu1 %5122 }
 0xdc4   : > { %5633 = vst.msk [vmem:[%s225_s23 + $0x3] sm:$0x1] %vm1543_vm6, %v5123_v14 }
 0xdc5 PF: > { %s14_s15 = sadd.s32 1, %s6801_s15  }
 0xdc6   : > { %p11_p4 = scmp.ge.s32.totalorder %s14_s15, 4  }
 0xdc8   :  { %13 = sbr.rel (!%p11_p4) target bundleno = 1 (0x1), region = 85 }

</bundles_post_ra>
